<compile_context>
chip_gen: v6e
topology: v6e:2x2x1
jax: 0.10.0
libtpu: 0.0.40
codegen_flags: <defaults>
</compile_context>

<pallas_src>
import math
import functools

import jax
import jax.numpy as jnp
from jax import lax
from jax.experimental import pallas as pl
from jax.experimental.pallas import tpu as pltpu


# --------------------------------- the kernel ---------------------------------

def decoder_kernel(x0_ref, e_ref, tb_ref, sb_ref,
                   wqkv_ref, bqkv_ref, wso_ref, bso_ref,
                   wcq_ref, bcq_ref, wckv_ref, bckv_ref, wco_ref, bco_ref,
                   wff1_ref, bff1_ref, wff2_ref, bff2_ref,
                   n1a_ref, n1b_ref, n2a_ref, n2b_ref, n3a_ref, n3b_ref,
                   fa_ref, fb_ref,
                   xout_ref, *, heads):
    layer = pl.program_id(1)
    n_layers = pl.num_programs(1)

    # x stays resident in the output VMEM block across all layer steps of this
    # batch tile (output block index depends only on the batch grid axis).
    @pl.when(layer == 0)
    def _():
        xout_ref[...] = x0_ref[...]

    x = xout_ref[...]                     # (S, D)   f32 residual stream
    e = e_ref[...]                        # (Se, D)  f32 encoder output
    tbias = tb_ref[...]                   # (S, S)   additive f32 mask bias
    sbias = sb_ref[...]                   # (S, Se)  additive f32 mask bias

    S, D = x.shape
    Se = e.shape[0]
    H = heads
    dk = D // H
    scale = 1.0 / math.sqrt(dk)

    def norm(y, a_ref, b_ref):
        # torch Norm: alpha * (y - mean) / (y.std(-1, unbiased) + eps) + bias.
        # Exact divide (not approx reciprocal) to stay close to torch f32.
        mean = jnp.mean(y, axis=-1, keepdims=True)
        var = jnp.sum((y - mean) ** 2, axis=-1, keepdims=True) * (1.0 / (D - 1))
        return a_ref[...] * (y - mean) / (jnp.sqrt(var) + 1e-6) + b_ref[...]

    def mm(a, w_ref, b_ref):
        # bf16 x bf16 -> f32 MXU matmul; f32 accumulate + bias.
        return (jnp.dot(a.astype(jnp.bfloat16), w_ref[...],
                        preferred_element_type=jnp.float32) + b_ref[...])

    def split_heads(y, base):
        # (rows, *) -> (H, rows, dk): static lane slices of the fused-matmul
        # output stacked along a new leading (head) batch dim.
        return jnp.stack([y[:, base + h * dk: base + (h + 1) * dk]
                          for h in range(H)])

    def attend(q, k, v, bias):
        # q: (H, Sq, dk); k, v: (H, Sk, dk); bias: (Sq, Sk) additive f32.
        s = lax.dot_general(q.astype(jnp.bfloat16), k.astype(jnp.bfloat16),
                            (((2,), (2,)), ((0,), (0,))),
                            preferred_element_type=jnp.float32)      # (H,Sq,Sk)
        s = s * scale + bias[None]
        m = jnp.max(s, axis=-1, keepdims=True)
        p = jnp.exp(s - m)
        p = p * pl.reciprocal(jnp.sum(p, axis=-1, keepdims=True), approx=True)
        c = lax.dot_general(p.astype(jnp.bfloat16), v.astype(jnp.bfloat16),
                            (((2,), (1,)), ((0,), (0,))),
                            preferred_element_type=jnp.float32)      # (H,Sq,dk)
        # concat heads back onto the lane axis -> single full-K output proj
        return jnp.concatenate([c[h] for h in range(H)], axis=-1)    # (Sq, D)

    # ---- masked self-attention + residual + norm1 (dropout = identity) ----
    qkv = mm(x, wqkv_ref, bqkv_ref)                      # (S, 3D) one fused matmul
    a1 = attend(split_heads(qkv, 0), split_heads(qkv, D),
                split_heads(qkv, 2 * D), tbias)
    x = norm(x + mm(a1, wso_ref, bso_ref), n1a_ref, n1b_ref)

    # ---- encoder/decoder cross-attention + residual + norm2 ----
    q2 = split_heads(mm(x, wcq_ref, bcq_ref), 0)         # (H, S, dk)
    kv = mm(e, wckv_ref, bckv_ref)                       # (Se, 2D) one fused matmul
    a2 = attend(q2, split_heads(kv, 0), split_heads(kv, D), sbias)
    x = norm(x + mm(a2, wco_ref, bco_ref), n2a_ref, n2b_ref)

    # ---- feed-forward (ReLU, d_ff) + residual + norm3 ----
    h1 = jnp.maximum(mm(x, wff1_ref, bff1_ref), 0.0)     # (S, F) lane-dense
    x = norm(x + mm(h1, wff2_ref, bff2_ref), n3a_ref, n3b_ref)

    @pl.when(layer < n_layers - 1)
    def _():
        xout_ref[...] = x

    @pl.when(layer == n_layers - 1)
    def _():
        xout_ref[...] = norm(x, fa_ref, fb_ref)          # final Decoder norm


# --------------------------------- wrapper -------------------------------------

def decoder_forward(trg, e_outputs, src_mask, trg_mask, params, *,
                    d_model, heads, n_layers):
    B, S = trg.shape
    _, Se, _ = e_outputs.shape
    D, L = d_model, n_layers
    F = params["w_ff1"].shape[-1]

    # Embedder + PositionalEncoder (plain JAX glue; dropout = eval/identity).
    x = params["embed"][trg].astype(jnp.float32) * math.sqrt(D)
    pos = jnp.arange(S, dtype=jnp.float32)[:, None]
    i_pair = jnp.arange(D // 2, dtype=jnp.float32)[None, :]
    angles = pos / jnp.power(10000.0, (2.0 * i_pair) / D)
    pe = (jnp.zeros((S, D), jnp.float32)
          .at[:, 0::2].set(jnp.sin(angles))
          .at[:, 1::2].set(jnp.cos(angles)))
    x = (x + pe[None]).astype(jnp.float32)               # (B, S, D)
    e = e_outputs.astype(jnp.float32)                    # (B, Se, D)

    # Per-batch additive attention biases (0 = keep, -1e9 = masked).
    def additive_bias(mask, sq, sk):
        m = mask
        if m.ndim == 4:                                  # (B, 1/H, sq, sk)
            m = m[:, 0]
        m = jnp.broadcast_to(m != 0, (B, sq, sk))
        return jnp.where(m, 0.0, -1e9).astype(jnp.float32)

    tbias = additive_bias(trg_mask, S, S)                # (B, S, S)
    sbias = additive_bias(src_mask, S, Se)               # (B, S, Se)

    def batch_spec(a):
        nd = a.ndim
        return pl.BlockSpec((None,) + tuple(a.shape[1:]),
                            lambda b, l, _nd=nd: (b,) + (0,) * (_nd - 1))

    def layer_spec(a):
        nd = a.ndim
        return pl.BlockSpec((None,) + tuple(a.shape[1:]),
                            lambda b, l, _nd=nd: (l,) + (0,) * (_nd - 1))

    def full_spec(a):
        nd = a.ndim
        return pl.BlockSpec(tuple(a.shape), lambda b, l, _nd=nd: (0,) * _nd)

    per_layer = [params[k] for k in (
        "w_self_qkv", "b_self_qkv", "w_self_o", "b_self_o",
        "w_cross_q", "b_cross_q", "w_cross_kv", "b_cross_kv",
        "w_cross_o", "b_cross_o",
        "w_ff1", "b_ff1", "w_ff2", "b_ff2",
        "norm1_a", "norm1_b", "norm2_a", "norm2_b", "norm3_a", "norm3_b")]

    in_arrays = [x, e, tbias, sbias, *per_layer,
                 params["final_a"], params["final_b"]]
    in_specs = ([batch_spec(x), batch_spec(e), batch_spec(tbias), batch_spec(sbias)]
                + [layer_spec(a) for a in per_layer]
                + [full_spec(params["final_a"]), full_spec(params["final_b"])])

    # Rough per-call cost hint for XLA's scheduler.
    def mmf(m, k, n):
        return 2 * m * k * n
    per_layer_flops = (mmf(S, D, 3 * D) + 2 * mmf(S, S, D) + mmf(S, D, D)
                       + mmf(S, D, D) + mmf(Se, D, 2 * D) + 2 * mmf(S, Se, D)
                       + mmf(S, D, D) + mmf(S, D, F) + mmf(S, F, D))
    weight_bytes = sum(int(a.size) * a.dtype.itemsize for a in per_layer)
    act_bytes = sum(int(a.size) * a.dtype.itemsize for a in (x, e, tbias, sbias))
    cost = pl.CostEstimate(
        flops=int(B * L * per_layer_flops),
        transcendentals=int(B * L * heads * (S * S + S * Se)),
        bytes_accessed=int(B * weight_bytes + 2 * act_bytes))

    kernel = functools.partial(decoder_kernel, heads=heads)

    out = pl.pallas_call(
        kernel,
        out_shape=jax.ShapeDtypeStruct((B, S, D), jnp.float32),
        grid_spec=pltpu.PrefetchScalarGridSpec(
            num_scalar_prefetch=0,
            grid=(B, L),                 # batch (parallel) x layers (sequential)
            in_specs=in_specs,
            out_specs=pl.BlockSpec((None, S, D), lambda b, l: (b, 0, 0)),
        ),
        input_output_aliases={0: 0},     # reuse the x0 HBM buffer for the output
        compiler_params=pltpu.CompilerParams(
            dimension_semantics=("parallel", "arbitrary"),
            vmem_limit_bytes=32 * 1024 * 1024),
        cost_estimate=cost,
    )(*in_arrays)

    return out


# ------------------------------ deterministic init ------------------------------

def init_params(key, vocab_size, d_model, n_layers, heads, d_ff=2048):
    D, F, L = d_model, d_ff, n_layers
    ks = jax.random.split(key, 8)
    f32, bf16 = jnp.float32, jnp.bfloat16

    def w(k, shape, scale=0.05):
        return (scale * jax.random.normal(k, shape)).astype(bf16)

    return {
        "embed": jax.random.normal(ks[0], (vocab_size, D)).astype(f32),
        # fused projections ("in x out" layout, bf16):
        #   QKV columns = [Wq | Wk | Wv], head-major inside each block.
        "w_self_qkv": w(ks[1], (L, D, 3 * D)),
        "b_self_qkv": jnp.zeros((L, 1, 3 * D), f32),
        "w_self_o": w(ks[2], (L, D, D)), "b_self_o": jnp.zeros((L, 1, D), f32),
        "w_cross_q": w(ks[3], (L, D, D)), "b_cross_q": jnp.zeros((L, 1, D), f32),
        "w_cross_kv": w(ks[4], (L, D, 2 * D)),
        "b_cross_kv": jnp.zeros((L, 1, 2 * D), f32),
        "w_cross_o": w(ks[5], (L, D, D)), "b_cross_o": jnp.zeros((L, 1, D), f32),
        # feed-forward (lane-dense last dims)
        "w_ff1": w(ks[6], (L, D, F)), "b_ff1": jnp.zeros((L, 1, F), f32),
        "w_ff2": w(ks[7], (L, F, D)), "b_ff2": jnp.zeros((L, 1, D), f32),
        # per-layer Norms (alpha = 1, bias = 0) and the final Decoder norm
        "norm1_a": jnp.ones((L, 1, D), f32), "norm1_b": jnp.zeros((L, 1, D), f32),
        "norm2_a": jnp.ones((L, 1, D), f32), "norm2_b": jnp.zeros((L, 1, D), f32),
        "norm3_a": jnp.ones((L, 1, D), f32), "norm3_b": jnp.zeros((L, 1, D), f32),
        "final_a": jnp.ones((1, D), f32), "final_b": jnp.zeros((1, D), f32),
    }


# ------------------------------------ main --------------------------------------

if __name__ == "__main__":
    vocab_size, d_model, n_layers, heads = 50, 32, 2, 4
    B, S, S_src = 2, 8, 16

    key = jax.random.PRNGKey(0)
    kp, kt, ke = jax.random.split(key, 3)
    params = init_params(kp, vocab_size, d_model, n_layers, heads)

    trg = jax.random.randint(kt, (B, S), 0, vocab_size, dtype=jnp.int32)
    e_outputs = jax.random.normal(ke, (B, S_src, d_model), dtype=jnp.float32)

    # no-peek causal target mask (B, S, S); source mask (B, 1, S_src) w/ padding
    trg_mask = jnp.tile(jnp.tril(jnp.ones((S, S), jnp.int32))[None], (B, 1, 1))
    src_mask = jnp.ones((B, 1, S_src), jnp.int32).at[1, 0, S_src - 3:].set(0)

    fwd = jax.jit(functools.partial(decoder_forward, d_model=d_model,
                                    heads=heads, n_layers=n_layers))
    out = jax.block_until_ready(fwd(trg, e_outputs, src_mask, trg_mask, params))

    assert out.shape == (B, S, d_model)
    assert bool(jnp.all(jnp.isfinite(out)))
    print("KERNEL_OK")
</pallas_src>

<mosaic_0001>
module attributes {stable_mosaic.version = 11 : i64} {
  func.func @decoder_kernel(%arg0: i32, %arg1: i32, %arg2: memref<1x8x32xf32, #tpu.memory_space<vmem>>, %arg3: memref<1x16x32xf32, #tpu.memory_space<vmem>>, %arg4: memref<1x8x8xf32, #tpu.memory_space<vmem>>, %arg5: memref<1x8x16xf32, #tpu.memory_space<vmem>>, %arg6: memref<1x32x96xbf16, #tpu.memory_space<vmem>>, %arg7: memref<1x1x96xf32, #tpu.memory_space<vmem>>, %arg8: memref<1x32x32xbf16, #tpu.memory_space<vmem>>, %arg9: memref<1x1x32xf32, #tpu.memory_space<vmem>>, %arg10: memref<1x32x32xbf16, #tpu.memory_space<vmem>>, %arg11: memref<1x1x32xf32, #tpu.memory_space<vmem>>, %arg12: memref<1x32x64xbf16, #tpu.memory_space<vmem>>, %arg13: memref<1x1x64xf32, #tpu.memory_space<vmem>>, %arg14: memref<1x32x32xbf16, #tpu.memory_space<vmem>>, %arg15: memref<1x1x32xf32, #tpu.memory_space<vmem>>, %arg16: memref<1x32x2048xbf16, #tpu.memory_space<vmem>>, %arg17: memref<1x1x2048xf32, #tpu.memory_space<vmem>>, %arg18: memref<1x2048x32xbf16, #tpu.memory_space<vmem>>, %arg19: memref<1x1x32xf32, #tpu.memory_space<vmem>>, %arg20: memref<1x1x32xf32, #tpu.memory_space<vmem>>, %arg21: memref<1x1x32xf32, #tpu.memory_space<vmem>>, %arg22: memref<1x1x32xf32, #tpu.memory_space<vmem>>, %arg23: memref<1x1x32xf32, #tpu.memory_space<vmem>>, %arg24: memref<1x1x32xf32, #tpu.memory_space<vmem>>, %arg25: memref<1x1x32xf32, #tpu.memory_space<vmem>>, %arg26: memref<1x32xf32, #tpu.memory_space<vmem>>, %arg27: memref<1x32xf32, #tpu.memory_space<vmem>>, %arg28: memref<1x8x32xf32, #tpu.memory_space<vmem>>) attributes {dimension_semantics = [#tpu.dimension_semantics<parallel>, #tpu.dimension_semantics<arbitrary>], iteration_bounds = array<i64: 2, 2>, scalar_prefetch = 0 : i64, scratch_operands = 0 : i64, tpu.core_type = #tpu.core_type<tc>, window_params = [{transform_indices = @transform_0, window_bounds = array<i64: 1, 8, 32>}, {transform_indices = @transform_1, window_bounds = array<i64: 1, 16, 32>}, {transform_indices = @transform_2, window_bounds = array<i64: 1, 8, 8>}, {transform_indices = @transform_3, window_bounds = array<i64: 1, 8, 16>}, {transform_indices = @transform_4, window_bounds = array<i64: 1, 32, 96>}, {transform_indices = @transform_5, window_bounds = array<i64: 1, 1, 96>}, {transform_indices = @transform_6, window_bounds = array<i64: 1, 32, 32>}, {transform_indices = @transform_7, window_bounds = array<i64: 1, 1, 32>}, {transform_indices = @transform_8, window_bounds = array<i64: 1, 32, 32>}, {transform_indices = @transform_9, window_bounds = array<i64: 1, 1, 32>}, {transform_indices = @transform_10, window_bounds = array<i64: 1, 32, 64>}, {transform_indices = @transform_11, window_bounds = array<i64: 1, 1, 64>}, {transform_indices = @transform_12, window_bounds = array<i64: 1, 32, 32>}, {transform_indices = @transform_13, window_bounds = array<i64: 1, 1, 32>}, {transform_indices = @transform_14, window_bounds = array<i64: 1, 32, 2048>}, {transform_indices = @transform_15, window_bounds = array<i64: 1, 1, 2048>}, {transform_indices = @transform_16, window_bounds = array<i64: 1, 2048, 32>}, {transform_indices = @transform_17, window_bounds = array<i64: 1, 1, 32>}, {transform_indices = @transform_18, window_bounds = array<i64: 1, 1, 32>}, {transform_indices = @transform_19, window_bounds = array<i64: 1, 1, 32>}, {transform_indices = @transform_20, window_bounds = array<i64: 1, 1, 32>}, {transform_indices = @transform_21, window_bounds = array<i64: 1, 1, 32>}, {transform_indices = @transform_22, window_bounds = array<i64: 1, 1, 32>}, {transform_indices = @transform_23, window_bounds = array<i64: 1, 1, 32>}, {pipeline_mode = #tpu.pipeline_mode<synchronous>, transform_indices = @transform_24, window_bounds = array<i64: 1, 32>}, {pipeline_mode = #tpu.pipeline_mode<synchronous>, transform_indices = @transform_25, window_bounds = array<i64: 1, 32>}, {transform_indices = @transform_26, window_bounds = array<i64: 1, 8, 32>}]} {
    %c0_i32 = arith.constant 0 : i32
    %0 = arith.cmpi eq, %arg1, %c0_i32 : i32
    %1 = arith.extui %0 : i1 to i32
    %c0_i32_0 = arith.constant 0 : i32
    %2 = arith.cmpi ne, %1, %c0_i32_0 : i32
    scf.if %2 {
      %c0_107 = arith.constant 0 : index
      %c0_108 = arith.constant 0 : index
      %c0_109 = arith.constant 0 : index
      %270 = vector.load %arg2[%c0_107, %c0_108, %c0_109] : memref<1x8x32xf32, #tpu.memory_space<vmem>>, vector<1x8x32xf32>
      %271 = vector.shape_cast %270 : vector<1x8x32xf32> to vector<8x32xf32>
      %c0_110 = arith.constant 0 : index
      %c0_111 = arith.constant 0 : index
      %c0_112 = arith.constant 0 : index
      %272 = vector.load %arg28[%c0_110, %c0_111, %c0_112] : memref<1x8x32xf32, #tpu.memory_space<vmem>>, vector<1x8x32xf32>
      %273 = vector.shape_cast %272 : vector<1x8x32xf32> to vector<8x32xf32>
      %274 = vector.shape_cast %271 : vector<8x32xf32> to vector<1x8x32xf32>
      tpu.vector_store %arg28[%c0_110, %c0_111, %c0_112], %274 {strides = array<i32>} : memref<1x8x32xf32, #tpu.memory_space<vmem>>, vector<1x8x32xf32>,
    } else {
    }
    %c0 = arith.constant 0 : index
    %c0_1 = arith.constant 0 : index
    %c0_2 = arith.constant 0 : index
    %3 = vector.load %arg28[%c0, %c0_1, %c0_2] : memref<1x8x32xf32, #tpu.memory_space<vmem>>, vector<1x8x32xf32>
    %4 = vector.shape_cast %3 : vector<1x8x32xf32> to vector<8x32xf32>
    %c0_3 = arith.constant 0 : index
    %c0_4 = arith.constant 0 : index
    %c0_5 = arith.constant 0 : index
    %5 = vector.load %arg3[%c0_3, %c0_4, %c0_5] : memref<1x16x32xf32, #tpu.memory_space<vmem>>, vector<1x16x32xf32>
    %6 = vector.shape_cast %5 : vector<1x16x32xf32> to vector<16x32xf32>
    %c0_6 = arith.constant 0 : index
    %c0_7 = arith.constant 0 : index
    %c0_8 = arith.constant 0 : index
    %7 = vector.load %arg4[%c0_6, %c0_7, %c0_8] : memref<1x8x8xf32, #tpu.memory_space<vmem>>, vector<1x8x8xf32>
    %8 = vector.shape_cast %7 : vector<1x8x8xf32> to vector<8x8xf32>
    %c0_9 = arith.constant 0 : index
    %c0_10 = arith.constant 0 : index
    %c0_11 = arith.constant 0 : index
    %9 = vector.load %arg5[%c0_9, %c0_10, %c0_11] : memref<1x8x16xf32, #tpu.memory_space<vmem>>, vector<1x8x16xf32>
    %10 = vector.shape_cast %9 : vector<1x8x16xf32> to vector<8x16xf32>
    %11 = arith.truncf %4 : vector<8x32xf32> to vector<8x32xbf16>
    %c0_12 = arith.constant 0 : index
    %c0_13 = arith.constant 0 : index
    %c0_14 = arith.constant 0 : index
    %12 = vector.load %arg6[%c0_12, %c0_13, %c0_14] : memref<1x32x96xbf16, #tpu.memory_space<vmem>>, vector<1x32x96xbf16>
    %13 = vector.shape_cast %12 : vector<1x32x96xbf16> to vector<32x96xbf16>
    %cst = arith.constant dense<0.000000e+00> : vector<8x96xf32>
    %14 = tpu.matmul %11, %13, %cst {dimension_numbers = #tpu.dot_dimension_numbers<[1], [0], [0], [1], [0, 0, 1, 1], [], []>} : vector<8x32xbf16>, vector<32x96xbf16>, vector<8x96xf32> -> vector<8x96xf32>
    %c0_15 = arith.constant 0 : index
    %c0_16 = arith.constant 0 : index
    %c0_17 = arith.constant 0 : index
    %15 = vector.load %arg7[%c0_15, %c0_16, %c0_17] : memref<1x1x96xf32, #tpu.memory_space<vmem>>, vector<1x1x96xf32>
    %16 = vector.shape_cast %15 : vector<1x1x96xf32> to vector<1x96xf32>
    %17 = vector.broadcast %16 : vector<1x96xf32> to vector<8x96xf32>
    %18 = arith.addf %14, %17 : vector<8x96xf32>
    %19 = vector.extract_strided_slice %18 {offsets = [0, 0], sizes = [8, 8], strides = [1, 1]} : vector<8x96xf32> to vector<8x8xf32>
    %20 = vector.extract_strided_slice %18 {offsets = [0, 8], sizes = [8, 8], strides = [1, 1]} : vector<8x96xf32> to vector<8x8xf32>
    %21 = vector.extract_strided_slice %18 {offsets = [0, 16], sizes = [8, 8], strides = [1, 1]} : vector<8x96xf32> to vector<8x8xf32>
    %22 = vector.extract_strided_slice %18 {offsets = [0, 24], sizes = [8, 8], strides = [1, 1]} : vector<8x96xf32> to vector<8x8xf32>
    %23 = vector.shape_cast %19 : vector<8x8xf32> to vector<1x8x8xf32>
    %24 = vector.shape_cast %20 : vector<8x8xf32> to vector<1x8x8xf32>
    %25 = vector.shape_cast %21 : vector<8x8xf32> to vector<1x8x8xf32>
    %26 = vector.shape_cast %22 : vector<8x8xf32> to vector<1x8x8xf32>
    %27 = tpu.concatenate %23, %24, %25, %26 in 0 : vector<1x8x8xf32>, vector<1x8x8xf32>, vector<1x8x8xf32>, vector<1x8x8xf32> -> vector<4x8x8xf32>
    %28 = vector.extract_strided_slice %18 {offsets = [0, 32], sizes = [8, 8], strides = [1, 1]} : vector<8x96xf32> to vector<8x8xf32>
    %29 = vector.extract_strided_slice %18 {offsets = [0, 40], sizes = [8, 8], strides = [1, 1]} : vector<8x96xf32> to vector<8x8xf32>
    %30 = vector.extract_strided_slice %18 {offsets = [0, 48], sizes = [8, 8], strides = [1, 1]} : vector<8x96xf32> to vector<8x8xf32>
    %31 = vector.extract_strided_slice %18 {offsets = [0, 56], sizes = [8, 8], strides = [1, 1]} : vector<8x96xf32> to vector<8x8xf32>
    %32 = vector.shape_cast %28 : vector<8x8xf32> to vector<1x8x8xf32>
    %33 = vector.shape_cast %29 : vector<8x8xf32> to vector<1x8x8xf32>
    %34 = vector.shape_cast %30 : vector<8x8xf32> to vector<1x8x8xf32>
    %35 = vector.shape_cast %31 : vector<8x8xf32> to vector<1x8x8xf32>
    %36 = tpu.concatenate %32, %33, %34, %35 in 0 : vector<1x8x8xf32>, vector<1x8x8xf32>, vector<1x8x8xf32>, vector<1x8x8xf32> -> vector<4x8x8xf32>
    %37 = vector.extract_strided_slice %18 {offsets = [0, 64], sizes = [8, 8], strides = [1, 1]} : vector<8x96xf32> to vector<8x8xf32>
    %38 = vector.extract_strided_slice %18 {offsets = [0, 72], sizes = [8, 8], strides = [1, 1]} : vector<8x96xf32> to vector<8x8xf32>
    %39 = vector.extract_strided_slice %18 {offsets = [0, 80], sizes = [8, 8], strides = [1, 1]} : vector<8x96xf32> to vector<8x8xf32>
    %40 = vector.extract_strided_slice %18 {offsets = [0, 88], sizes = [8, 8], strides = [1, 1]} : vector<8x96xf32> to vector<8x8xf32>
    %41 = vector.shape_cast %37 : vector<8x8xf32> to vector<1x8x8xf32>
    %42 = vector.shape_cast %38 : vector<8x8xf32> to vector<1x8x8xf32>
    %43 = vector.shape_cast %39 : vector<8x8xf32> to vector<1x8x8xf32>
    %44 = vector.shape_cast %40 : vector<8x8xf32> to vector<1x8x8xf32>
    %45 = tpu.concatenate %41, %42, %43, %44 in 0 : vector<1x8x8xf32>, vector<1x8x8xf32>, vector<1x8x8xf32>, vector<1x8x8xf32> -> vector<4x8x8xf32>
    %46 = arith.truncf %27 : vector<4x8x8xf32> to vector<4x8x8xbf16>
    %47 = arith.truncf %36 : vector<4x8x8xf32> to vector<4x8x8xbf16>
    %cst_18 = arith.constant dense<0.000000e+00> : vector<4x8x8xf32>
    %48 = tpu.matmul %46, %47, %cst_18 {dimension_numbers = #tpu.dot_dimension_numbers<[2], [2], [1], [1], [0, 0, 0, 1, 1, 1], [0], [0]>} : vector<4x8x8xbf16>, vector<4x8x8xbf16>, vector<4x8x8xf32> -> vector<4x8x8xf32>
    %cst_19 = arith.constant 0.353553385 : f32
    %49 = vector.broadcast %cst_19 : f32 to vector<4x8x8xf32>
    %50 = arith.mulf %48, %49 : vector<4x8x8xf32>
    %51 = vector.shape_cast %8 : vector<8x8xf32> to vector<1x8x8xf32>
    %52 = vector.broadcast %51 : vector<1x8x8xf32> to vector<4x8x8xf32>
    %53 = arith.addf %50, %52 : vector<4x8x8xf32>
    %cst_20 = arith.constant dense<0xFF800000> : vector<4x8xf32>
    %54 = vector.multi_reduction <maximumf>, %53, %cst_20 [2] : vector<4x8x8xf32> to vector<4x8xf32>
    %55 = vector.shape_cast %54 : vector<4x8xf32> to vector<4x8x1xf32>
    %56 = vector.broadcast %55 : vector<4x8x1xf32> to vector<4x8x8xf32>
    %57 = arith.subf %53, %56 : vector<4x8x8xf32>
    %58 = math.exp %57 : vector<4x8x8xf32>
    %cst_21 = arith.constant dense<0.000000e+00> : vector<4x8xf32>
    %59 = vector.multi_reduction <add>, %58, %cst_21 [2] : vector<4x8x8xf32> to vector<4x8xf32>
    %60 = vector.shape_cast %59 : vector<4x8xf32> to vector<4x8x1xf32>
    %61 = tpu.reciprocal %60 {approx = true} : vector<4x8x1xf32> -> vector<4x8x1xf32>
    %62 = vector.broadcast %61 : vector<4x8x1xf32> to vector<4x8x8xf32>
    %63 = arith.mulf %58, %62 : vector<4x8x8xf32>
    %64 = arith.truncf %63 : vector<4x8x8xf32> to vector<4x8x8xbf16>
    %65 = arith.truncf %45 : vector<4x8x8xf32> to vector<4x8x8xbf16>
    %cst_22 = arith.constant dense<0.000000e+00> : vector<4x8x8xf32>
    %66 = tpu.matmul %64, %65, %cst_22 {dimension_numbers = #tpu.dot_dimension_numbers<[2], [1], [1], [2], [0, 0, 0, 1, 1, 2], [0], [0]>} : vector<4x8x8xbf16>, vector<4x8x8xbf16>, vector<4x8x8xf32> -> vector<4x8x8xf32>
    %67 = vector.extract_strided_slice %66 {offsets = [0, 0, 0], sizes = [1, 8, 8], strides = [1, 1, 1]} : vector<4x8x8xf32> to vector<1x8x8xf32>
    %68 = vector.shape_cast %67 : vector<1x8x8xf32> to vector<8x8xf32>
    %69 = vector.extract_strided_slice %66 {offsets = [1, 0, 0], sizes = [1, 8, 8], strides = [1, 1, 1]} : vector<4x8x8xf32> to vector<1x8x8xf32>
    %70 = vector.shape_cast %69 : vector<1x8x8xf32> to vector<8x8xf32>
    %71 = vector.extract_strided_slice %66 {offsets = [2, 0, 0], sizes = [1, 8, 8], strides = [1, 1, 1]} : vector<4x8x8xf32> to vector<1x8x8xf32>
    %72 = vector.shape_cast %71 : vector<1x8x8xf32> to vector<8x8xf32>
    %73 = vector.extract_strided_slice %66 {offsets = [3, 0, 0], sizes = [1, 8, 8], strides = [1, 1, 1]} : vector<4x8x8xf32> to vector<1x8x8xf32>
    %74 = vector.shape_cast %73 : vector<1x8x8xf32> to vector<8x8xf32>
    %75 = tpu.concatenate %68, %70, %72, %74 in 1 : vector<8x8xf32>, vector<8x8xf32>, vector<8x8xf32>, vector<8x8xf32> -> vector<8x32xf32>
    %76 = arith.truncf %75 : vector<8x32xf32> to vector<8x32xbf16>
    %c0_23 = arith.constant 0 : index
    %c0_24 = arith.constant 0 : index
    %c0_25 = arith.constant 0 : index
    %77 = vector.load %arg8[%c0_23, %c0_24, %c0_25] : memref<1x32x32xbf16, #tpu.memory_space<vmem>>, vector<1x32x32xbf16>
    %78 = vector.shape_cast %77 : vector<1x32x32xbf16> to vector<32x32xbf16>
    %cst_26 = arith.constant dense<0.000000e+00> : vector<8x32xf32>
    %79 = tpu.matmul %76, %78, %cst_26 {dimension_numbers = #tpu.dot_dimension_numbers<[1], [0], [0], [1], [0, 0, 1, 1], [], []>} : vector<8x32xbf16>, vector<32x32xbf16>, vector<8x32xf32> -> vector<8x32xf32>
    %c0_27 = arith.constant 0 : index
    %c0_28 = arith.constant 0 : index
    %c0_29 = arith.constant 0 : index
    %80 = vector.load %arg9[%c0_27, %c0_28, %c0_29] : memref<1x1x32xf32, #tpu.memory_space<vmem>>, vector<1x1x32xf32>
    %81 = vector.shape_cast %80 : vector<1x1x32xf32> to vector<1x32xf32>
    %82 = vector.broadcast %81 : vector<1x32xf32> to vector<8x32xf32>
    %83 = arith.addf %79, %82 : vector<8x32xf32>
    %84 = arith.addf %4, %83 : vector<8x32xf32>
    %cst_30 = arith.constant dense<0.000000e+00> : vector<8xf32>
    %85 = vector.multi_reduction <add>, %84, %cst_30 [1] : vector<8x32xf32> to vector<8xf32>
    %86 = vector.shape_cast %85 : vector<8xf32> to vector<8x1xf32>
    %cst_31 = arith.constant 3.200000e+01 : f32
    %87 = vector.broadcast %cst_31 : f32 to vector<8x1xf32>
    %88 = arith.divf %86, %87 : vector<8x1xf32>
    %89 = vector.broadcast %88 : vector<8x1xf32> to vector<8x32xf32>
    %90 = arith.subf %84, %89 : vector<8x32xf32>
    %91 = arith.mulf %90, %90 : vector<8x32xf32>
    %cst_32 = arith.constant dense<0.000000e+00> : vector<8xf32>
    %92 = vector.multi_reduction <add>, %91, %cst_32 [1] : vector<8x32xf32> to vector<8xf32>
    %93 = vector.shape_cast %92 : vector<8xf32> to vector<8x1xf32>
    %cst_33 = arith.constant 0.0322580636 : f32
    %94 = vector.broadcast %cst_33 : f32 to vector<8x1xf32>
    %95 = arith.mulf %93, %94 : vector<8x1xf32>
    %c0_34 = arith.constant 0 : index
    %c0_35 = arith.constant 0 : index
    %c0_36 = arith.constant 0 : index
    %96 = vector.load %arg20[%c0_34, %c0_35, %c0_36] : memref<1x1x32xf32, #tpu.memory_space<vmem>>, vector<1x1x32xf32>
    %97 = vector.shape_cast %96 : vector<1x1x32xf32> to vector<1x32xf32>
    %98 = vector.broadcast %88 : vector<8x1xf32> to vector<8x32xf32>
    %99 = arith.subf %84, %98 : vector<8x32xf32>
    %100 = vector.broadcast %97 : vector<1x32xf32> to vector<8x32xf32>
    %101 = arith.mulf %100, %99 : vector<8x32xf32>
    %102 = math.sqrt %95 : vector<8x1xf32>
    %cst_37 = arith.constant 9.99999997E-7 : f32
    %103 = vector.broadcast %cst_37 : f32 to vector<8x1xf32>
    %104 = arith.addf %102, %103 : vector<8x1xf32>
    %105 = vector.broadcast %104 : vector<8x1xf32> to vector<8x32xf32>
    %106 = arith.divf %101, %105 : vector<8x32xf32>
    %c0_38 = arith.constant 0 : index
    %c0_39 = arith.constant 0 : index
    %c0_40 = arith.constant 0 : index
    %107 = vector.load %arg21[%c0_38, %c0_39, %c0_40] : memref<1x1x32xf32, #tpu.memory_space<vmem>>, vector<1x1x32xf32>
    %108 = vector.shape_cast %107 : vector<1x1x32xf32> to vector<1x32xf32>
    %109 = vector.broadcast %108 : vector<1x32xf32> to vector<8x32xf32>
    %110 = arith.addf %106, %109 : vector<8x32xf32>
    %111 = arith.truncf %110 : vector<8x32xf32> to vector<8x32xbf16>
    %c0_41 = arith.constant 0 : index
    %c0_42 = arith.constant 0 : index
    %c0_43 = arith.constant 0 : index
    %112 = vector.load %arg10[%c0_41, %c0_42, %c0_43] : memref<1x32x32xbf16, #tpu.memory_space<vmem>>, vector<1x32x32xbf16>
    %113 = vector.shape_cast %112 : vector<1x32x32xbf16> to vector<32x32xbf16>
    %cst_44 = arith.constant dense<0.000000e+00> : vector<8x32xf32>
    %114 = tpu.matmul %111, %113, %cst_44 {dimension_numbers = #tpu.dot_dimension_numbers<[1], [0], [0], [1], [0, 0, 1, 1], [], []>} : vector<8x32xbf16>, vector<32x32xbf16>, vector<8x32xf32> -> vector<8x32xf32>
    %c0_45 = arith.constant 0 : index
    %c0_46 = arith.constant 0 : index
    %c0_47 = arith.constant 0 : index
    %115 = vector.load %arg11[%c0_45, %c0_46, %c0_47] : memref<1x1x32xf32, #tpu.memory_space<vmem>>, vector<1x1x32xf32>
    %116 = vector.shape_cast %115 : vector<1x1x32xf32> to vector<1x32xf32>
    %117 = vector.broadcast %116 : vector<1x32xf32> to vector<8x32xf32>
    %118 = arith.addf %114, %117 : vector<8x32xf32>
    %119 = vector.extract_strided_slice %118 {offsets = [0, 0], sizes = [8, 8], strides = [1, 1]} : vector<8x32xf32> to vector<8x8xf32>
    %120 = vector.extract_strided_slice %118 {offsets = [0, 8], sizes = [8, 8], strides = [1, 1]} : vector<8x32xf32> to vector<8x8xf32>
    %121 = vector.extract_strided_slice %118 {offsets = [0, 16], sizes = [8, 8], strides = [1, 1]} : vector<8x32xf32> to vector<8x8xf32>
    %122 = vector.extract_strided_slice %118 {offsets = [0, 24], sizes = [8, 8], strides = [1, 1]} : vector<8x32xf32> to vector<8x8xf32>
    %123 = vector.shape_cast %119 : vector<8x8xf32> to vector<1x8x8xf32>
    %124 = vector.shape_cast %120 : vector<8x8xf32> to vector<1x8x8xf32>
    %125 = vector.shape_cast %121 : vector<8x8xf32> to vector<1x8x8xf32>
    %126 = vector.shape_cast %122 : vector<8x8xf32> to vector<1x8x8xf32>
    %127 = tpu.concatenate %123, %124, %125, %126 in 0 : vector<1x8x8xf32>, vector<1x8x8xf32>, vector<1x8x8xf32>, vector<1x8x8xf32> -> vector<4x8x8xf32>
    %128 = arith.truncf %6 : vector<16x32xf32> to vector<16x32xbf16>
    %c0_48 = arith.constant 0 : index
    %c0_49 = arith.constant 0 : index
    %c0_50 = arith.constant 0 : index
    %129 = vector.load %arg12[%c0_48, %c0_49, %c0_50] : memref<1x32x64xbf16, #tpu.memory_space<vmem>>, vector<1x32x64xbf16>
    %130 = vector.shape_cast %129 : vector<1x32x64xbf16> to vector<32x64xbf16>
    %cst_51 = arith.constant dense<0.000000e+00> : vector<16x64xf32>
    %131 = tpu.matmul %128, %130, %cst_51 {dimension_numbers = #tpu.dot_dimension_numbers<[1], [0], [0], [1], [0, 0, 1, 1], [], []>} : vector<16x32xbf16>, vector<32x64xbf16>, vector<16x64xf32> -> vector<16x64xf32>
    %c0_52 = arith.constant 0 : index
    %c0_53 = arith.constant 0 : index
    %c0_54 = arith.constant 0 : index
    %132 = vector.load %arg13[%c0_52, %c0_53, %c0_54] : memref<1x1x64xf32, #tpu.memory_space<vmem>>, vector<1x1x64xf32>
    %133 = vector.shape_cast %132 : vector<1x1x64xf32> to vector<1x64xf32>
    %134 = vector.broadcast %133 : vector<1x64xf32> to vector<16x64xf32>
    %135 = arith.addf %131, %134 : vector<16x64xf32>
    %136 = vector.extract_strided_slice %135 {offsets = [0, 0], sizes = [16, 8], strides = [1, 1]} : vector<16x64xf32> to vector<16x8xf32>
    %137 = vector.extract_strided_slice %135 {offsets = [0, 8], sizes = [16, 8], strides = [1, 1]} : vector<16x64xf32> to vector<16x8xf32>
    %138 = vector.extract_strided_slice %135 {offsets = [0, 16], sizes = [16, 8], strides = [1, 1]} : vector<16x64xf32> to vector<16x8xf32>
    %139 = vector.extract_strided_slice %135 {offsets = [0, 24], sizes = [16, 8], strides = [1, 1]} : vector<16x64xf32> to vector<16x8xf32>
    %140 = vector.shape_cast %136 : vector<16x8xf32> to vector<1x16x8xf32>
    %141 = vector.shape_cast %137 : vector<16x8xf32> to vector<1x16x8xf32>
    %142 = vector.shape_cast %138 : vector<16x8xf32> to vector<1x16x8xf32>
    %143 = vector.shape_cast %139 : vector<16x8xf32> to vector<1x16x8xf32>
    %144 = tpu.concatenate %140, %141, %142, %143 in 0 : vector<1x16x8xf32>, vector<1x16x8xf32>, vector<1x16x8xf32>, vector<1x16x8xf32> -> vector<4x16x8xf32>
    %145 = vector.extract_strided_slice %135 {offsets = [0, 32], sizes = [16, 8], strides = [1, 1]} : vector<16x64xf32> to vector<16x8xf32>
    %146 = vector.extract_strided_slice %135 {offsets = [0, 40], sizes = [16, 8], strides = [1, 1]} : vector<16x64xf32> to vector<16x8xf32>
    %147 = vector.extract_strided_slice %135 {offsets = [0, 48], sizes = [16, 8], strides = [1, 1]} : vector<16x64xf32> to vector<16x8xf32>
    %148 = vector.extract_strided_slice %135 {offsets = [0, 56], sizes = [16, 8], strides = [1, 1]} : vector<16x64xf32> to vector<16x8xf32>
    %149 = vector.shape_cast %145 : vector<16x8xf32> to vector<1x16x8xf32>
    %150 = vector.shape_cast %146 : vector<16x8xf32> to vector<1x16x8xf32>
    %151 = vector.shape_cast %147 : vector<16x8xf32> to vector<1x16x8xf32>
    %152 = vector.shape_cast %148 : vector<16x8xf32> to vector<1x16x8xf32>
    %153 = tpu.concatenate %149, %150, %151, %152 in 0 : vector<1x16x8xf32>, vector<1x16x8xf32>, vector<1x16x8xf32>, vector<1x16x8xf32> -> vector<4x16x8xf32>
    %154 = arith.truncf %127 : vector<4x8x8xf32> to vector<4x8x8xbf16>
    %155 = arith.truncf %144 : vector<4x16x8xf32> to vector<4x16x8xbf16>
    %cst_55 = arith.constant dense<0.000000e+00> : vector<4x8x16xf32>
    %156 = tpu.matmul %154, %155, %cst_55 {dimension_numbers = #tpu.dot_dimension_numbers<[2], [2], [1], [1], [0, 0, 0, 1, 1, 1], [0], [0]>} : vector<4x8x8xbf16>, vector<4x16x8xbf16>, vector<4x8x16xf32> -> vector<4x8x16xf32>
    %cst_56 = arith.constant 0.353553385 : f32
    %157 = vector.broadcast %cst_56 : f32 to vector<4x8x16xf32>
    %158 = arith.mulf %156, %157 : vector<4x8x16xf32>
    %159 = vector.shape_cast %10 : vector<8x16xf32> to vector<1x8x16xf32>
    %160 = vector.broadcast %159 : vector<1x8x16xf32> to vector<4x8x16xf32>
    %161 = arith.addf %158, %160 : vector<4x8x16xf32>
    %cst_57 = arith.constant dense<0xFF800000> : vector<4x8xf32>
    %162 = vector.multi_reduction <maximumf>, %161, %cst_57 [2] : vector<4x8x16xf32> to vector<4x8xf32>
    %163 = vector.shape_cast %162 : vector<4x8xf32> to vector<4x8x1xf32>
    %164 = vector.broadcast %163 : vector<4x8x1xf32> to vector<4x8x16xf32>
    %165 = arith.subf %161, %164 : vector<4x8x16xf32>
    %166 = math.exp %165 : vector<4x8x16xf32>
    %cst_58 = arith.constant dense<0.000000e+00> : vector<4x8xf32>
    %167 = vector.multi_reduction <add>, %166, %cst_58 [2] : vector<4x8x16xf32> to vector<4x8xf32>
    %168 = vector.shape_cast %167 : vector<4x8xf32> to vector<4x8x1xf32>
    %169 = tpu.reciprocal %168 {approx = true} : vector<4x8x1xf32> -> vector<4x8x1xf32>
    %170 = vector.broadcast %169 : vector<4x8x1xf32> to vector<4x8x16xf32>
    %171 = arith.mulf %166, %170 : vector<4x8x16xf32>
    %172 = arith.truncf %171 : vector<4x8x16xf32> to vector<4x8x16xbf16>
    %173 = arith.truncf %153 : vector<4x16x8xf32> to vector<4x16x8xbf16>
    %cst_59 = arith.constant dense<0.000000e+00> : vector<4x8x8xf32>
    %174 = tpu.matmul %172, %173, %cst_59 {dimension_numbers = #tpu.dot_dimension_numbers<[2], [1], [1], [2], [0, 0, 0, 1, 1, 2], [0], [0]>} : vector<4x8x16xbf16>, vector<4x16x8xbf16>, vector<4x8x8xf32> -> vector<4x8x8xf32>
    %175 = vector.extract_strided_slice %174 {offsets = [0, 0, 0], sizes = [1, 8, 8], strides = [1, 1, 1]} : vector<4x8x8xf32> to vector<1x8x8xf32>
    %176 = vector.shape_cast %175 : vector<1x8x8xf32> to vector<8x8xf32>
    %177 = vector.extract_strided_slice %174 {offsets = [1, 0, 0], sizes = [1, 8, 8], strides = [1, 1, 1]} : vector<4x8x8xf32> to vector<1x8x8xf32>
    %178 = vector.shape_cast %177 : vector<1x8x8xf32> to vector<8x8xf32>
    %179 = vector.extract_strided_slice %174 {offsets = [2, 0, 0], sizes = [1, 8, 8], strides = [1, 1, 1]} : vector<4x8x8xf32> to vector<1x8x8xf32>
    %180 = vector.shape_cast %179 : vector<1x8x8xf32> to vector<8x8xf32>
    %181 = vector.extract_strided_slice %174 {offsets = [3, 0, 0], sizes = [1, 8, 8], strides = [1, 1, 1]} : vector<4x8x8xf32> to vector<1x8x8xf32>
    %182 = vector.shape_cast %181 : vector<1x8x8xf32> to vector<8x8xf32>
    %183 = tpu.concatenate %176, %178, %180, %182 in 1 : vector<8x8xf32>, vector<8x8xf32>, vector<8x8xf32>, vector<8x8xf32> -> vector<8x32xf32>
    %184 = arith.truncf %183 : vector<8x32xf32> to vector<8x32xbf16>
    %c0_60 = arith.constant 0 : index
    %c0_61 = arith.constant 0 : index
    %c0_62 = arith.constant 0 : index
    %185 = vector.load %arg14[%c0_60, %c0_61, %c0_62] : memref<1x32x32xbf16, #tpu.memory_space<vmem>>, vector<1x32x32xbf16>
    %186 = vector.shape_cast %185 : vector<1x32x32xbf16> to vector<32x32xbf16>
    %cst_63 = arith.constant dense<0.000000e+00> : vector<8x32xf32>
    %187 = tpu.matmul %184, %186, %cst_63 {dimension_numbers = #tpu.dot_dimension_numbers<[1], [0], [0], [1], [0, 0, 1, 1], [], []>} : vector<8x32xbf16>, vector<32x32xbf16>, vector<8x32xf32> -> vector<8x32xf32>
    %c0_64 = arith.constant 0 : index
    %c0_65 = arith.constant 0 : index
    %c0_66 = arith.constant 0 : index
    %188 = vector.load %arg15[%c0_64, %c0_65, %c0_66] : memref<1x1x32xf32, #tpu.memory_space<vmem>>, vector<1x1x32xf32>
    %189 = vector.shape_cast %188 : vector<1x1x32xf32> to vector<1x32xf32>
    %190 = vector.broadcast %189 : vector<1x32xf32> to vector<8x32xf32>
    %191 = arith.addf %187, %190 : vector<8x32xf32>
    %192 = arith.addf %110, %191 : vector<8x32xf32>
    %cst_67 = arith.constant dense<0.000000e+00> : vector<8xf32>
    %193 = vector.multi_reduction <add>, %192, %cst_67 [1] : vector<8x32xf32> to vector<8xf32>
    %194 = vector.shape_cast %193 : vector<8xf32> to vector<8x1xf32>
    %cst_68 = arith.constant 3.200000e+01 : f32
    %195 = vector.broadcast %cst_68 : f32 to vector<8x1xf32>
    %196 = arith.divf %194, %195 : vector<8x1xf32>
    %197 = vector.broadcast %196 : vector<8x1xf32> to vector<8x32xf32>
    %198 = arith.subf %192, %197 : vector<8x32xf32>
    %199 = arith.mulf %198, %198 : vector<8x32xf32>
    %cst_69 = arith.constant dense<0.000000e+00> : vector<8xf32>
    %200 = vector.multi_reduction <add>, %199, %cst_69 [1] : vector<8x32xf32> to vector<8xf32>
    %201 = vector.shape_cast %200 : vector<8xf32> to vector<8x1xf32>
    %cst_70 = arith.constant 0.0322580636 : f32
    %202 = vector.broadcast %cst_70 : f32 to vector<8x1xf32>
    %203 = arith.mulf %201, %202 : vector<8x1xf32>
    %c0_71 = arith.constant 0 : index
    %c0_72 = arith.constant 0 : index
    %c0_73 = arith.constant 0 : index
    %204 = vector.load %arg22[%c0_71, %c0_72, %c0_73] : memref<1x1x32xf32, #tpu.memory_space<vmem>>, vector<1x1x32xf32>
    %205 = vector.shape_cast %204 : vector<1x1x32xf32> to vector<1x32xf32>
    %206 = vector.broadcast %196 : vector<8x1xf32> to vector<8x32xf32>
    %207 = arith.subf %192, %206 : vector<8x32xf32>
    %208 = vector.broadcast %205 : vector<1x32xf32> to vector<8x32xf32>
    %209 = arith.mulf %208, %207 : vector<8x32xf32>
    %210 = math.sqrt %203 : vector<8x1xf32>
    %cst_74 = arith.constant 9.99999997E-7 : f32
    %211 = vector.broadcast %cst_74 : f32 to vector<8x1xf32>
    %212 = arith.addf %210, %211 : vector<8x1xf32>
    %213 = vector.broadcast %212 : vector<8x1xf32> to vector<8x32xf32>
    %214 = arith.divf %209, %213 : vector<8x32xf32>
    %c0_75 = arith.constant 0 : index
    %c0_76 = arith.constant 0 : index
    %c0_77 = arith.constant 0 : index
    %215 = vector.load %arg23[%c0_75, %c0_76, %c0_77] : memref<1x1x32xf32, #tpu.memory_space<vmem>>, vector<1x1x32xf32>
    %216 = vector.shape_cast %215 : vector<1x1x32xf32> to vector<1x32xf32>
    %217 = vector.broadcast %216 : vector<1x32xf32> to vector<8x32xf32>
    %218 = arith.addf %214, %217 : vector<8x32xf32>
    %219 = arith.truncf %218 : vector<8x32xf32> to vector<8x32xbf16>
    %c0_78 = arith.constant 0 : index
    %c0_79 = arith.constant 0 : index
    %c0_80 = arith.constant 0 : index
    %220 = vector.load %arg16[%c0_78, %c0_79, %c0_80] : memref<1x32x2048xbf16, #tpu.memory_space<vmem>>, vector<1x32x2048xbf16>
    %221 = vector.shape_cast %220 : vector<1x32x2048xbf16> to vector<32x2048xbf16>
    %cst_81 = arith.constant dense<0.000000e+00> : vector<8x2048xf32>
    %222 = tpu.matmul %219, %221, %cst_81 {dimension_numbers = #tpu.dot_dimension_numbers<[1], [0], [0], [1], [0, 0, 1, 1], [], []>} : vector<8x32xbf16>, vector<32x2048xbf16>, vector<8x2048xf32> -> vector<8x2048xf32>
    %c0_82 = arith.constant 0 : index
    %c0_83 = arith.constant 0 : index
    %c0_84 = arith.constant 0 : index
    %223 = vector.load %arg17[%c0_82, %c0_83, %c0_84] : memref<1x1x2048xf32, #tpu.memory_space<vmem>>, vector<1x1x2048xf32>
    %224 = vector.shape_cast %223 : vector<1x1x2048xf32> to vector<1x2048xf32>
    %225 = vector.broadcast %224 : vector<1x2048xf32> to vector<8x2048xf32>
    %226 = arith.addf %222, %225 : vector<8x2048xf32>
    %cst_85 = arith.constant 0.000000e+00 : f32
    %227 = vector.broadcast %cst_85 : f32 to vector<8x2048xf32>
    %228 = arith.maximumf %226, %227 : vector<8x2048xf32>
    %229 = arith.truncf %228 : vector<8x2048xf32> to vector<8x2048xbf16>
    %c0_86 = arith.constant 0 : index
    %c0_87 = arith.constant 0 : index
    %c0_88 = arith.constant 0 : index
    %230 = vector.load %arg18[%c0_86, %c0_87, %c0_88] : memref<1x2048x32xbf16, #tpu.memory_space<vmem>>, vector<1x2048x32xbf16>
    %231 = vector.shape_cast %230 : vector<1x2048x32xbf16> to vector<2048x32xbf16>
    %cst_89 = arith.constant dense<0.000000e+00> : vector<8x32xf32>
    %232 = tpu.matmul %229, %231, %cst_89 {dimension_numbers = #tpu.dot_dimension_numbers<[1], [0], [0], [1], [0, 0, 1, 1], [], []>} : vector<8x2048xbf16>, vector<2048x32xbf16>, vector<8x32xf32> -> vector<8x32xf32>
    %c0_90 = arith.constant 0 : index
    %c0_91 = arith.constant 0 : index
    %c0_92 = arith.constant 0 : index
    %233 = vector.load %arg19[%c0_90, %c0_91, %c0_92] : memref<1x1x32xf32, #tpu.memory_space<vmem>>, vector<1x1x32xf32>
    %234 = vector.shape_cast %233 : vector<1x1x32xf32> to vector<1x32xf32>
    %235 = vector.broadcast %234 : vector<1x32xf32> to vector<8x32xf32>
    %236 = arith.addf %232, %235 : vector<8x32xf32>
    %237 = arith.addf %218, %236 : vector<8x32xf32>
    %cst_93 = arith.constant dense<0.000000e+00> : vector<8xf32>
    %238 = vector.multi_reduction <add>, %237, %cst_93 [1] : vector<8x32xf32> to vector<8xf32>
    %239 = vector.shape_cast %238 : vector<8xf32> to vector<8x1xf32>
    %cst_94 = arith.constant 3.200000e+01 : f32
    %240 = vector.broadcast %cst_94 : f32 to vector<8x1xf32>
    %241 = arith.divf %239, %240 : vector<8x1xf32>
    %242 = vector.broadcast %241 : vector<8x1xf32> to vector<8x32xf32>
    %243 = arith.subf %237, %242 : vector<8x32xf32>
    %244 = arith.mulf %243, %243 : vector<8x32xf32>
    %cst_95 = arith.constant dense<0.000000e+00> : vector<8xf32>
    %245 = vector.multi_reduction <add>, %244, %cst_95 [1] : vector<8x32xf32> to vector<8xf32>
    %246 = vector.shape_cast %245 : vector<8xf32> to vector<8x1xf32>
    %cst_96 = arith.constant 0.0322580636 : f32
    %247 = vector.broadcast %cst_96 : f32 to vector<8x1xf32>
    %248 = arith.mulf %246, %247 : vector<8x1xf32>
    %c0_97 = arith.constant 0 : index
    %c0_98 = arith.constant 0 : index
    %c0_99 = arith.constant 0 : index
    %249 = vector.load %arg24[%c0_97, %c0_98, %c0_99] : memref<1x1x32xf32, #tpu.memory_space<vmem>>, vector<1x1x32xf32>
    %250 = vector.shape_cast %249 : vector<1x1x32xf32> to vector<1x32xf32>
    %251 = vector.broadcast %241 : vector<8x1xf32> to vector<8x32xf32>
    %252 = arith.subf %237, %251 : vector<8x32xf32>
    %253 = vector.broadcast %250 : vector<1x32xf32> to vector<8x32xf32>
    %254 = arith.mulf %253, %252 : vector<8x32xf32>
    %255 = math.sqrt %248 : vector<8x1xf32>
    %cst_100 = arith.constant 9.99999997E-7 : f32
    %256 = vector.broadcast %cst_100 : f32 to vector<8x1xf32>
    %257 = arith.addf %255, %256 : vector<8x1xf32>
    %258 = vector.broadcast %257 : vector<8x1xf32> to vector<8x32xf32>
    %259 = arith.divf %254, %258 : vector<8x32xf32>
    %c0_101 = arith.constant 0 : index
    %c0_102 = arith.constant 0 : index
    %c0_103 = arith.constant 0 : index
    %260 = vector.load %arg25[%c0_101, %c0_102, %c0_103] : memref<1x1x32xf32, #tpu.memory_space<vmem>>, vector<1x1x32xf32>
    %261 = vector.shape_cast %260 : vector<1x1x32xf32> to vector<1x32xf32>
    %262 = vector.broadcast %261 : vector<1x32xf32> to vector<8x32xf32>
    %263 = arith.addf %259, %262 : vector<8x32xf32>
    %c1_i32 = arith.constant 1 : i32
    %264 = arith.cmpi slt, %arg1, %c1_i32 : i32
    %265 = arith.extui %264 : i1 to i32
    %c0_i32_104 = arith.constant 0 : i32
    %266 = arith.cmpi ne, %265, %c0_i32_104 : i32
    scf.if %266 {
      %c0_107 = arith.constant 0 : index
      %c0_108 = arith.constant 0 : index
      %c0_109 = arith.constant 0 : index
      %270 = vector.load %arg28[%c0_107, %c0_108, %c0_109] : memref<1x8x32xf32, #tpu.memory_space<vmem>>, vector<1x8x32xf32>
      %271 = vector.shape_cast %270 : vector<1x8x32xf32> to vector<8x32xf32>
      %272 = vector.shape_cast %263 : vector<8x32xf32> to vector<1x8x32xf32>
      tpu.vector_store %arg28[%c0_107, %c0_108, %c0_109], %272 {strides = array<i32>} : memref<1x8x32xf32, #tpu.memory_space<vmem>>, vector<1x8x32xf32>,
    } else {
    }
    %c1_i32_105 = arith.constant 1 : i32
    %267 = arith.cmpi eq, %arg1, %c1_i32_105 : i32
    %268 = arith.extui %267 : i1 to i32
    %c0_i32_106 = arith.constant 0 : i32
    %269 = arith.cmpi ne, %268, %c0_i32_106 : i32
    scf.if %269 {
      %cst_107 = arith.constant dense<0.000000e+00> : vector<8xf32>
      %270 = vector.multi_reduction <add>, %263, %cst_107 [1] : vector<8x32xf32> to vector<8xf32>
      %271 = vector.shape_cast %270 : vector<8xf32> to vector<8x1xf32>
      %cst_108 = arith.constant 3.200000e+01 : f32
      %272 = vector.broadcast %cst_108 : f32 to vector<8x1xf32>
      %273 = arith.divf %271, %272 : vector<8x1xf32>
      %274 = vector.broadcast %273 : vector<8x1xf32> to vector<8x32xf32>
      %275 = arith.subf %263, %274 : vector<8x32xf32>
      %276 = arith.mulf %275, %275 : vector<8x32xf32>
      %cst_109 = arith.constant dense<0.000000e+00> : vector<8xf32>
      %277 = vector.multi_reduction <add>, %276, %cst_109 [1] : vector<8x32xf32> to vector<8xf32>
      %278 = vector.shape_cast %277 : vector<8xf32> to vector<8x1xf32>
      %cst_110 = arith.constant 0.0322580636 : f32
      %279 = vector.broadcast %cst_110 : f32 to vector<8x1xf32>
      %280 = arith.mulf %278, %279 : vector<8x1xf32>
      %c0_111 = arith.constant 0 : index
      %c0_112 = arith.constant 0 : index
      %281 = vector.load %arg26[%c0_111, %c0_112] : memref<1x32xf32, #tpu.memory_space<vmem>>, vector<1x32xf32>
      %282 = vector.broadcast %273 : vector<8x1xf32> to vector<8x32xf32>
      %283 = arith.subf %263, %282 : vector<8x32xf32>
      %284 = vector.broadcast %281 : vector<1x32xf32> to vector<8x32xf32>
      %285 = arith.mulf %284, %283 : vector<8x32xf32>
      %286 = math.sqrt %280 : vector<8x1xf32>
      %cst_113 = arith.constant 9.99999997E-7 : f32
      %287 = vector.broadcast %cst_113 : f32 to vector<8x1xf32>
      %288 = arith.addf %286, %287 : vector<8x1xf32>
      %289 = vector.broadcast %288 : vector<8x1xf32> to vector<8x32xf32>
      %290 = arith.divf %285, %289 : vector<8x32xf32>
      %c0_114 = arith.constant 0 : index
      %c0_115 = arith.constant 0 : index
      %291 = vector.load %arg27[%c0_114, %c0_115] : memref<1x32xf32, #tpu.memory_space<vmem>>, vector<1x32xf32>
      %292 = vector.broadcast %291 : vector<1x32xf32> to vector<8x32xf32>
      %293 = arith.addf %290, %292 : vector<8x32xf32>
      %c0_116 = arith.constant 0 : index
      %c0_117 = arith.constant 0 : index
      %c0_118 = arith.constant 0 : index
      %294 = vector.load %arg28[%c0_116, %c0_117, %c0_118] : memref<1x8x32xf32, #tpu.memory_space<vmem>>, vector<1x8x32xf32>
      %295 = vector.shape_cast %294 : vector<1x8x32xf32> to vector<8x32xf32>
      %296 = vector.shape_cast %293 : vector<8x32xf32> to vector<1x8x32xf32>
      tpu.vector_store %arg28[%c0_116, %c0_117, %c0_118], %296 {strides = array<i32>} : memref<1x8x32xf32, #tpu.memory_space<vmem>>, vector<1x8x32xf32>,
    } else {
    }
    return
  }
  func.func @transform_0(%arg0: i32, %arg1: i32) -> (i32, i32, i32) {
    %c0_i32 = arith.constant 0 : i32
    %c0_i32_0 = arith.constant 0 : i32
    %c0_i32_1 = arith.constant 0 : i32
    return %arg0, %c0_i32, %c0_i32_0 : i32, i32, i32
  }
  func.func @transform_1(%arg0: i32, %arg1: i32) -> (i32, i32, i32) {
    %c0_i32 = arith.constant 0 : i32
    %c0_i32_0 = arith.constant 0 : i32
    %c0_i32_1 = arith.constant 0 : i32
    return %arg0, %c0_i32, %c0_i32_0 : i32, i32, i32
  }
  func.func @transform_2(%arg0: i32, %arg1: i32) -> (i32, i32, i32) {
    %c0_i32 = arith.constant 0 : i32
    %c0_i32_0 = arith.constant 0 : i32
    %c0_i32_1 = arith.constant 0 : i32
    return %arg0, %c0_i32, %c0_i32_0 : i32, i32, i32
  }
  func.func @transform_3(%arg0: i32, %arg1: i32) -> (i32, i32, i32) {
    %c0_i32 = arith.constant 0 : i32
    %c0_i32_0 = arith.constant 0 : i32
    %c0_i32_1 = arith.constant 0 : i32
    return %arg0, %c0_i32, %c0_i32_0 : i32, i32, i32
  }
  func.func @transform_4(%arg0: i32, %arg1: i32) -> (i32, i32, i32) {
    %c0_i32 = arith.constant 0 : i32
    %c0_i32_0 = arith.constant 0 : i32
    %c0_i32_1 = arith.constant 0 : i32
    return %arg1, %c0_i32, %c0_i32_0 : i32, i32, i32
  }
  func.func @transform_5(%arg0: i32, %arg1: i32) -> (i32, i32, i32) {
    %c0_i32 = arith.constant 0 : i32
    %c0_i32_0 = arith.constant 0 : i32
    %c0_i32_1 = arith.constant 0 : i32
    return %arg1, %c0_i32, %c0_i32_0 : i32, i32, i32
  }
  func.func @transform_6(%arg0: i32, %arg1: i32) -> (i32, i32, i32) {
    %c0_i32 = arith.constant 0 : i32
    %c0_i32_0 = arith.constant 0 : i32
    %c0_i32_1 = arith.constant 0 : i32
    return %arg1, %c0_i32, %c0_i32_0 : i32, i32, i32
  }
  func.func @transform_7(%arg0: i32, %arg1: i32) -> (i32, i32, i32) {
    %c0_i32 = arith.constant 0 : i32
    %c0_i32_0 = arith.constant 0 : i32
    %c0_i32_1 = arith.constant 0 : i32
    return %arg1, %c0_i32, %c0_i32_0 : i32, i32, i32
  }
  func.func @transform_8(%arg0: i32, %arg1: i32) -> (i32, i32, i32) {
    %c0_i32 = arith.constant 0 : i32
    %c0_i32_0 = arith.constant 0 : i32
    %c0_i32_1 = arith.constant 0 : i32
    return %arg1, %c0_i32, %c0_i32_0 : i32, i32, i32
  }
  func.func @transform_9(%arg0: i32, %arg1: i32) -> (i32, i32, i32) {
    %c0_i32 = arith.constant 0 : i32
    %c0_i32_0 = arith.constant 0 : i32
    %c0_i32_1 = arith.constant 0 : i32
    return %arg1, %c0_i32, %c0_i32_0 : i32, i32, i32
  }
  func.func @transform_10(%arg0: i32, %arg1: i32) -> (i32, i32, i32) {
    %c0_i32 = arith.constant 0 : i32
    %c0_i32_0 = arith.constant 0 : i32
    %c0_i32_1 = arith.constant 0 : i32
    return %arg1, %c0_i32, %c0_i32_0 : i32, i32, i32
  }
  func.func @transform_11(%arg0: i32, %arg1: i32) -> (i32, i32, i32) {
    %c0_i32 = arith.constant 0 : i32
    %c0_i32_0 = arith.constant 0 : i32
    %c0_i32_1 = arith.constant 0 : i32
    return %arg1, %c0_i32, %c0_i32_0 : i32, i32, i32
  }
  func.func @transform_12(%arg0: i32, %arg1: i32) -> (i32, i32, i32) {
    %c0_i32 = arith.constant 0 : i32
    %c0_i32_0 = arith.constant 0 : i32
    %c0_i32_1 = arith.constant 0 : i32
    return %arg1, %c0_i32, %c0_i32_0 : i32, i32, i32
  }
  func.func @transform_13(%arg0: i32, %arg1: i32) -> (i32, i32, i32) {
    %c0_i32 = arith.constant 0 : i32
    %c0_i32_0 = arith.constant 0 : i32
    %c0_i32_1 = arith.constant 0 : i32
    return %arg1, %c0_i32, %c0_i32_0 : i32, i32, i32
  }
  func.func @transform_14(%arg0: i32, %arg1: i32) -> (i32, i32, i32) {
    %c0_i32 = arith.constant 0 : i32
    %c0_i32_0 = arith.constant 0 : i32
    %c0_i32_1 = arith.constant 0 : i32
    return %arg1, %c0_i32, %c0_i32_0 : i32, i32, i32
  }
  func.func @transform_15(%arg0: i32, %arg1: i32) -> (i32, i32, i32) {
    %c0_i32 = arith.constant 0 : i32
    %c0_i32_0 = arith.constant 0 : i32
    %c0_i32_1 = arith.constant 0 : i32
    return %arg1, %c0_i32, %c0_i32_0 : i32, i32, i32
  }
  func.func @transform_16(%arg0: i32, %arg1: i32) -> (i32, i32, i32) {
    %c0_i32 = arith.constant 0 : i32
    %c0_i32_0 = arith.constant 0 : i32
    %c0_i32_1 = arith.constant 0 : i32
    return %arg1, %c0_i32, %c0_i32_0 : i32, i32, i32
  }
  func.func @transform_17(%arg0: i32, %arg1: i32) -> (i32, i32, i32) {
    %c0_i32 = arith.constant 0 : i32
    %c0_i32_0 = arith.constant 0 : i32
    %c0_i32_1 = arith.constant 0 : i32
    return %arg1, %c0_i32, %c0_i32_0 : i32, i32, i32
  }
  func.func @transform_18(%arg0: i32, %arg1: i32) -> (i32, i32, i32) {
    %c0_i32 = arith.constant 0 : i32
    %c0_i32_0 = arith.constant 0 : i32
    %c0_i32_1 = arith.constant 0 : i32
    return %arg1, %c0_i32, %c0_i32_0 : i32, i32, i32
  }
  func.func @transform_19(%arg0: i32, %arg1: i32) -> (i32, i32, i32) {
    %c0_i32 = arith.constant 0 : i32
    %c0_i32_0 = arith.constant 0 : i32
    %c0_i32_1 = arith.constant 0 : i32
    return %arg1, %c0_i32, %c0_i32_0 : i32, i32, i32
  }
  func.func @transform_20(%arg0: i32, %arg1: i32) -> (i32, i32, i32) {
    %c0_i32 = arith.constant 0 : i32
    %c0_i32_0 = arith.constant 0 : i32
    %c0_i32_1 = arith.constant 0 : i32
    return %arg1, %c0_i32, %c0_i32_0 : i32, i32, i32
  }
  func.func @transform_21(%arg0: i32, %arg1: i32) -> (i32, i32, i32) {
    %c0_i32 = arith.constant 0 : i32
    %c0_i32_0 = arith.constant 0 : i32
    %c0_i32_1 = arith.constant 0 : i32
    return %arg1, %c0_i32, %c0_i32_0 : i32, i32, i32
  }
  func.func @transform_22(%arg0: i32, %arg1: i32) -> (i32, i32, i32) {
    %c0_i32 = arith.constant 0 : i32
    %c0_i32_0 = arith.constant 0 : i32
    %c0_i32_1 = arith.constant 0 : i32
    return %arg1, %c0_i32, %c0_i32_0 : i32, i32, i32
  }
  func.func @transform_23(%arg0: i32, %arg1: i32) -> (i32, i32, i32) {
    %c0_i32 = arith.constant 0 : i32
    %c0_i32_0 = arith.constant 0 : i32
    %c0_i32_1 = arith.constant 0 : i32
    return %arg1, %c0_i32, %c0_i32_0 : i32, i32, i32
  }
  func.func @transform_24(%arg0: i32, %arg1: i32) -> (i32, i32) {
    %c0_i32 = arith.constant 0 : i32
    %c0_i32_0 = arith.constant 0 : i32
    %c0_i32_1 = arith.constant 0 : i32
    return %c0_i32, %c0_i32_0 : i32, i32
  }
  func.func @transform_25(%arg0: i32, %arg1: i32) -> (i32, i32) {
    %c0_i32 = arith.constant 0 : i32
    %c0_i32_0 = arith.constant 0 : i32
    %c0_i32_1 = arith.constant 0 : i32
    return %c0_i32, %c0_i32_0 : i32, i32
  }
  func.func @transform_26(%arg0: i32, %arg1: i32) -> (i32, i32, i32) {
    %c0_i32 = arith.constant 0 : i32
    %c0_i32_0 = arith.constant 0 : i32
    %c0_i32_1 = arith.constant 0 : i32
    return %arg0, %c0_i32, %c0_i32_0 : i32, i32, i32
  }
}

</mosaic_0001>

<bundles_post_ra>
// kernel: decoder_forward.1
= control target key start
LH: loop header
LB: loop body
LE: loop exit
PB: predicated region body
PF: predicated region fallthrough
CT: control target
= control target key end

     0   :  { %s7014_s0 = inlined_call_operand.hbm [shape: f32[2,8,32], index: 0, kind: input, shape index: {}, may-alias: {0,26}]   ;;  %s7015_s1 = inlined_call_operand.vmem [shape: f32[2,16,32], index: 1, kind: input, shape index: {}]   ;;  %s7016_s2 = inlined_call_operand.vmem [shape: f32[2,8,8], index: 2, kind: input, shape index: {}]   ;;  %s7017_s3 = inlined_call_operand.vmem [shape: f32[2,8,16], index: 3, kind: input, shape index: {}]   ;;  %s7018_s4 = inlined_call_operand.vmem [shape: bf16[2,32,96], index: 4, kind: input, shape index: {}]   ;;  %s7019_s5 = inlined_call_operand.vmem [shape: f32[2,1,96], index: 5, kind: input, shape index: {}]   ;;  %s7020_s6 = inlined_call_operand.vmem [shape: bf16[2,32,32], index: 6, kind: input, shape index: {}]   ;;  %s7021_s7 = inlined_call_operand.vmem [shape: f32[2,1,32], index: 7, kind: input, shape index: {}]   ;;  %s7022_s8 = inlined_call_operand.vmem [shape: bf16[2,32,32], index: 8, kind: input, shape index: {}]   ;;  %s7023_s9 = inlined_call_operand.vmem [shape: f32[2,1,32], index: 9, kind: input, shape index: {}]   ;;  %s7024_s10 = inlined_call_operand.vmem [shape: bf16[2,32,64], index: 10, kind: input, shape index: {}]   ;;  %s7025_s11 = inlined_call_operand.vmem [shape: f32[2,1,64], index: 11, kind: input, shape index: {}]   ;;  %s7026_s12 = inlined_call_operand.vmem [shape: bf16[2,32,32], index: 12, kind: input, shape index: {}]   ;;  %s7027_s13 = inlined_call_operand.vmem [shape: f32[2,1,32], index: 13, kind: input, shape index: {}]   ;;  %s7028_s14 = inlined_call_operand.vmem [shape: bf16[2,32,2048], index: 14, kind: input, shape index: {}]   ;;  %s7029_s15 = inlined_call_operand.vmem [shape: f32[2,1,2048], index: 15, kind: input, shape index: {}]   ;;  %s7030_s16 = inlined_call_operand.vmem [shape: bf16[2,2048,32], index: 16, kind: input, shape index: {}]   ;;  %s7031_s17 = inlined_call_operand.vmem [shape: f32[2,1,32], index: 17, kind: input, shape index: {}]   ;;  %s7032_s18 = inlined_call_operand.vmem [shape: f32[2,1,32], index: 18, kind: input, shape index: {}]   ;;  %s7033_s19 = inlined_call_operand.vmem [shape: f32[2,1,32], index: 19, kind: input, shape index: {}]   ;;  %s7034_s20 = inlined_call_operand.vmem [shape: f32[2,1,32], index: 20, kind: input, shape index: {}]   ;;  %s7035_s21 = inlined_call_operand.vmem [shape: f32[2,1,32], index: 21, kind: input, shape index: {}]   ;;  %s7036_s22 = inlined_call_operand.vmem [shape: f32[2,1,32], index: 22, kind: input, shape index: {}]   ;;  %s7037_s23 = inlined_call_operand.vmem [shape: f32[2,1,32], index: 23, kind: input, shape index: {}]   ;;  %s7038_s24 = inlined_call_operand.vmem [shape: f32[1,32], index: 24, kind: input, shape index: {}]   ;;  %s7039_s25 = inlined_call_operand.vmem [shape: f32[1,32], index: 25, kind: input, shape index: {}]   ;;  %s7040_s26 = inlined_call_operand.hbm [shape: f32[2,8,32], index: 26, kind: output, shape index: {}, may-alias: {0,26}]  }
   0x1   :  { %7062 = sst [smem:[#allocation28_spill]] %s7014_s0 }
   0x2   :  { %7063 = sst [smem:[#allocation29_spill]] %s7015_s1 }
   0x3   :  { %7064 = sst [smem:[#allocation30_spill]] %s7016_s2 }
   0x4   :  { %7065 = sst [smem:[#allocation31_spill]] %s7017_s3 }
   0x5   :  { %7066 = sst [smem:[#allocation32_spill]] %s7018_s4 }
   0x6   :  { %7067 = sst [smem:[#allocation33_spill]] %s7019_s5 }
   0x7   :  { %7068 = sst [smem:[#allocation34_spill]] %s7020_s6 }
   0x8   :  { %7069 = sst [smem:[#allocation35_spill]] %s7021_s7 }
   0x9   :  { %7070 = sst [smem:[#allocation36_spill]] %s7022_s8 }
   0xa   :  { %7071 = sst [smem:[#allocation37_spill]] %s7023_s9 }
   0xb   :  { %7072 = sst [smem:[#allocation38_spill]] %s7024_s10 }
   0xc   :  { %7073 = sst [smem:[#allocation39_spill]] %s7026_s12 }
   0xd   :  { %7074 = sst [smem:[#allocation40_spill]] %s7027_s13 }
   0xe   :  { %7075 = sst [smem:[#allocation41_spill]] %s7028_s14 }
   0xf   :  { %7076 = sst [smem:[#allocation42_spill]] %s7029_s15 }
  0x10   :  { %7077 = sst [smem:[#allocation43_spill]] %s7030_s16 }
  0x11   :  { %7078 = sst [smem:[#allocation44_spill]] %s7031_s17 }
  0x12   :  { %7079 = sst [smem:[#allocation45_spill]] %s7033_s19 }
  0x13   :  { %7080 = sst [smem:[#allocation46_spill]] %s7034_s20 }
  0x14   :  { %7081 = sst [smem:[#allocation47_spill]] %s7035_s21 }
  0x15   :  { %7082 = sst [smem:[#allocation48_spill]] %s7036_s22 }
  0x16   :  { %7083 = sst [smem:[#allocation49_spill]] %s7037_s23 }
  0x17   :  { %7084 = sst [smem:[#allocation50_spill]] %s7038_s24 }
  0x18   :  { %7085 = sst [smem:[#allocation51_spill]] %s7039_s25 }
  0x19   :  { %7086 = sst [smem:[#allocation52_spill]] %s7040_s26 }
  0x1a   :  { %31 = vsyncpa [#allocation3], 0 }
  0x1b   :  { %33 = vsyncpa [#allocation3 + $0x1], 0 }
  0x1c   :  { %34 = vsyncpa [#allocation4], 0 }
  0x1d   :  { %36 = vsyncpa [#allocation4 + $0x1], 0  ;;  %s6169_s27 = smov 0   ;;  %s6171_s3 = smov 0  }
  0x1e   :  { %s6173_s7 = smov 0   ;;  %s6175_s28 = smov 0  }
  0x1f   :  { %s6177_s8 = smov 0   ;;  %s6179_s4 = smov 0  }
  0x20   :  { %s6181_s29 = smov 0   ;;  %s6183_s0 = smov 0  }
  0x21 LB: > { %7087 = sst [smem:[#allocation8_spill]] %s5991_s27  ;;  %s4990_s9 = sadd.s32 4294967295, %s6019_s0   ;;  %s6019_s0 = sphi %s6183_s0, %s42_s0   ;;  %s6015_s29 = sphi %s6181_s29, %s7175_s29   ;;  %s6011_s4 = sphi %s6179_s4, %s7174_s4   ;;  %s6007_s8 = sphi %s6177_s8, %s7173_s8   ;;  %s6003_s28 = sphi %s6175_s28, %s7172_s28   ;;  %s5999_s7 = sphi %s6173_s7, %s7171_s7   ;;  %s5995_s3 = sphi %s6171_s3, %s7170_s3   ;;  %s5991_s27 = sphi %s6169_s27, %s7169_s27  }
  0x22   : > { %7088 = sst [smem:[#allocation9_spill]] %s5995_s3  ;;  %s4991_s30 = sadd.s32 4294967294, %s6019_s0  }
  0x23   : > { %7089 = sst [smem:[#allocation10_spill]] %s5999_s7  ;;  %s51_s2 = sadd.s32 1, %s6011_s4 }
  0x24   : > { %7090 = sst [smem:[#allocation11_spill]] %s6007_s8  ;;  %s54_s5 = sadd.s32 1, %s6015_s29 }
  0x25   : > { %7091 = sst [smem:[#allocation12_spill]] %s6011_s4  ;;  %p52_p0 = scmp.ge.s32.totalorder %s51_s2, 2 }
  0x26   : > { %7092 = sst [smem:[#allocation13_spill]] %s6015_s29  ;;  %s61_s10 = sadd.s32 1, %s5999_s7 }
  0x27   : > { %7093 = sst [smem:[#allocation14_spill]] %s6019_s0  ;;  %p68_p1 = scmp.ne.s32.totalorder %s5999_s7, %s5995_s3 }
  0x28   : > { %p69_p2 = scmp.eq.s32.totalorder %s6019_s0, 0  ;;  %s7177_s2 = smov (%p52_p0, %s51_s2), 0 }
  0x29   : > { %7094 = sst [smem:[#allocation15_spill]] %s7177_s2  ;;  %s7179_s5 = smov (!%p52_p0, %s54_s5), %s6015_s29 }
  0x2a   : > { %p6220_p3 = por %p69_p2, %p68_p1  ;;  %p74_p4 = scmp.ne.s32.totalorder %s5995_s3, %s5991_s27 }
  0x2b   : > { %p56_p5 = scmp.ge.s32.totalorder %s7179_s5, 2  ;;  %p75_p6 = scmp.eq.s32.totalorder %s4990_s9, 0 }
  0x2c   : > { %p738_p7 = scmp.eq.s32.totalorder %s4990_s9, 3  ;;  %p744_p8 = scmp.eq.s32.totalorder %s4991_s30, 3 }
  0x2d   : > { %s7181_s5 = smov (%p56_p5, %s7179_s5), 0  ;;  %p6228_p9 = por %p75_p6, %p74_p4 }
  0x2e   : > { %7096 = sst [smem:[#allocation16_spill]] %s7181_s5  ;;  %p6232_p10 = por %p738_p7, %p68_p1 }
  0x2f   : > { %s58_s4 = ssub.s32 %s6015_s29, %s7181_s5  ;;  %p6238_p11 = por %p744_p8, %p74_p4 }
  0x30   : > { %s7098_s2 = scalar_select %p6232_p10, 1, 0 }
  0x31   : > { %s7100_s27 = scalar_select %p6238_p11, 1, 0 }
  0x32   : > { %7099 = sst [smem:[#allocation17_spill]] %s7098_s2  ;;  %p59_p12 = scmp.eq.s32.totalorder %s58_s4, 0 }
  0x33   : > { %7101 = sst [smem:[#allocation18_spill]] %s7100_s27  ;;  %p5617_p13 = scmp.lt.s32.totalorder %s6019_s0, 4 }
  0x34   : > { %s770_s9 = sand.u32 1, %s5999_s7   ;;  %s4995_s25 = sshll.u32 %s6015_s29, 7 }
  0x35   : > { %s6245_s30 = scalar_select %p59_p12, %s5999_s7, %s61_s10  }
  0x36   : > { %s4994_s26 = sshll.u32 %s770_s9, 3  ;;  %s7103_s22 = sld [smem:[#allocation28_spill]] }
  0x37   : > { %7102 = sst [smem:[#allocation19_spill]] %s6245_s30  ;;  %s774_s20 = scalar_lea.vmem [#allocation2], %s4994_s26 }
  0x38   : > { %s781_s19 = sshll.u32 %s774_s20, 4  ;;  %p6253_p0 = pnand %p5617_p13, %p6220_p3  ;;  %s782_s19 = int_to_ptr.vmem [resolvable:$true] %s781_s19 }
  0x39   : > { %p4996_p1 = scmp.ge.s32.totalorder %s6019_s0, 1  ;;  %p943_p2 = scmp.lt.s32.totalorder %s6019_s0, 5 }
  0x3a   : > { %s771_s4 = scalar_lea.sflag [#allocation3], %s770_s9  ;;  %p5897_p4 = pneg %p6253_p0 }
  0x3b   : > { %s5908_s10 = scalar_lea.vmem %s782_s19, 128  ;;  %s6021_s23 = smov [#allocation2]  }
  0x3c   : > { %s779_s21 = scalar_lea.hbm %s7103_s22, %s4995_s25  ;;  %p5909_p5 = scmp.ne.s32.totalorder %s782_s19, %s5908_s10 }
  0x3d   : > { %s5913_s22 = sshll.u32 %s6021_s23, 4  ;;  %s5914_s22 = int_to_ptr.vmem [resolvable:$false] %s5913_s22 }
  0x3e   : > { %p5911_p6 = pnand %p5909_p5, %p5897_p4  ;;  %s5915_s20 = scalar_lea.vmem %s5914_s22, 256 }
  0x3f   : > { %p5916_p8 = scmp.lt.s32.totalorder %s782_s19, %s5914_s22  ;;  %p5917_p12 = scmp.lt.s32.totalorder %s5915_s20, %s5908_s10 }
  0x40   : > { %p5912_p7 = pneg %p5911_p6 }
  0x41   : > { %p5918_p3 = por %p5917_p12, %p5916_p8 }
  0x43   : > { %p5919_p13 = pnand %p5918_p3, %p5912_p7 }
  0x45   : > { %5922 = shalt.err (!%p5919_p13)
}
  0x46   : > { %5612 = dma.hbm_to_vmem [thread:$0]  (!%p6253_p0), %s779_s21, 128, %s782_s19, %s771_s4  }
  0x47   : > { %p944_p11 = pnand %p4996_p1, %p943_p2 }
  0x49   : > { %947 = sbr.rel (%p944_p11) target bundleno = 4763 (0x129b), region = 124 }
  0x4e   : > { %s6268_s24 = sand.u32 1, %s5995_s3  }
  0x4f   : > { %s7045_s25 = sshll.u32 %s6268_s24, 3  ;;  %s950_s26 = scalar_lea.sflag [#allocation3], %s6268_s24 }
  0x50   : > { %s6274_s6 = scalar_lea.vmem [#allocation2], %s7045_s25 }
  0x51   : > { %5982 = dma.done.wait (%p6228_p9), %s950_s26, 128  }
  0x52   : > { %5984 = vsyncadd (%p6228_p9), %s950_s26, 4294967168  ;;  %p1110_p11 = scmp.lt.s32.totalorder %s6007_s8, 1  ;;  %p1123_p0 = scmp.lt.s32.totalorder %s6003_s28, 1 }
  0x53   : > { %s7105_s10 = sld [smem:[#allocation29_spill]]  ;;  %p5018_p9 = scmp.ne.s32.totalorder %s6003_s28, 0 }
  0x54   : > { %s1111_s19 = scalar_select %p1110_p11, %s6007_s8, 1 }
  0x55   : > { %s6284_s21 = scalar_select %p1123_p0, %s6003_s28, 1 }
  0x56   : > { %s5238_s5 = sshll.u32 %s1111_s19, 4  ;;  %s5001_s9 = sshll.u32 %s1111_s19, 3 }
  0x57   : > { %s7107_s26 = sld [smem:[#allocation30_spill]]  ;;  %s5239_s27 = sshll.u32 %s6284_s21, 4 }
  0x58   : > { %s7108_s7 = sld [smem:[#allocation31_spill]]  ;;  %s5244_s4 = sshll.u32 %s6284_s21, 8 }
  0x59   : > { %s6289_s23 = scalar_lea.vmem %s7105_s10, %s5238_s5  ;;  %s7110_s19 = sld [smem:[#allocation32_spill]] }
  0x5a   : > { %7106 = sst [smem:[#allocation20_spill]] %s6289_s23  ;;  %s5245_s30 = sshll.u32 %s6284_s21, 10 }
  0x5b   : > { %s7119_s12 = sld [smem:[#allocation39_spill]] }
  0x5c   : > { %s7122_s15 = sld [smem:[#allocation42_spill]] }
  0x5d   : > { %s6294_s25 = scalar_lea.vmem %s7107_s26, %s5001_s9  ;;  %s7112_s26 = sld [smem:[#allocation34_spill]] }
  0x5e   : > { %s6299_s3 = scalar_lea.vmem %s7108_s7, %s5001_s9  ;;  %s7124_s14 = sld [smem:[#allocation41_spill]] }
  0x5f   : > { %7109 = sst [smem:[#allocation21_spill]] %s6299_s3  ;;  %s6305_s8 = scalar_lea.vmem %s7110_s19, %s5239_s27 }
  0x60   : > { %s7115_s19 = sld [smem:[#allocation36_spill]] }
  0x61   : > { %s7126_s16 = sld [smem:[#allocation43_spill]] }
  0x62   : > { %s6351_s20 = scalar_lea.vmem %s7122_s15, %s5239_s27  ;;  %s7129_s15 = sld [smem:[#allocation45_spill]] }
  0x63   : > { %s6314_s29 = scalar_lea.vmem %s7112_s26, %s5239_s27  ;;  %s7118_s26 = sld [smem:[#allocation38_spill]] }
  0x64   : > { %7113 = sst [smem:[#allocation22_spill]] %s6314_s29  ;;  %s6356_s7 = scalar_lea.vmem %s7124_s14, %s5244_s4 }
  0x65   : > { %7123 = sst [smem:[#allocation25_spill]] %s6351_s20 }
  0x66   : > { %s6323_s23 = scalar_lea.vmem %s7115_s19, %s5239_s27  ;;  %s6341_s19 = scalar_lea.vmem %s7119_s12, %s5239_s27 }
  0x67   : > { %7116 = sst [smem:[#allocation23_spill]] %s6323_s23  ;;  %s6362_s2 = scalar_lea.vmem %s7126_s16, %s5245_s30 }
  0x68   : > { %7120 = sst [smem:[#allocation24_spill]] %s6341_s19  ;;  %s1185_s23 = scalar_lea.vmem %s7129_s15, %s6284_s21 }
  0x69   : > { %s6332_s29 = scalar_lea.vmem %s7118_s26, %s5239_s27  ;;  %7125 = sst [smem:[#allocation26_spill]] %s6356_s7 }
  0x6a   : > { %7127 = sst [smem:[#allocation27_spill]] %s6362_s2  ;;  %s7134_s27 = sshll.u32 %s6268_s24, 3 }
  0x6b   : > { %s7130_s14 = sld [smem:[#allocation46_spill]]  ;;  %s6394_s19 = scalar_lea.vmem [#allocation5], %s7134_s27 }
  0x6c   : > { %s7131_s30 = sld [smem:[#allocation47_spill]] }
  0x6d   : > { %s7132_s12 = sld [smem:[#allocation48_spill]] }
  0x6e   : > { %s7133_s13 = sld [smem:[#allocation49_spill]] }
  0x70   : > { %1202 = sbr.rel (%p5018_p9) target bundleno = 119 (0x77), region = 132 }
  0x71   : > { %s1188_s20 = scalar_lea.vmem %s7130_s14, %s6284_s21 }
  0x72   : > { %s1191_s0 = scalar_lea.vmem %s7131_s30, %s6284_s21 }
  0x73   : > { %s1194_s3 = scalar_lea.vmem %s7132_s12, %s6284_s21 }
  0x74   : > { %s1197_s1 = scalar_lea.vmem %s7133_s13, %s6284_s21 }
  0x75   : > { %v1203_v0 = vld [vmem:[%s6274_s6] sm:$0xff]  ;;  %vm1204_vm0 = vcmask 261120  }
  0x76   : > { %1205 = vst.msk [vmem:[%s6394_s19] sm:$0xff] %vm1204_vm0, %v1203_v0 }
  0x77 PF: > { %v5709_v1 = vld [vmem:[%s6305_s8 + $0x8] sm:$0xff]   ;;  %v6022_v2 = vmov 0.0   ;;  %v5710_v3 = vld [vmem:[%s6305_s8] sm:$0xff]   ;;  %vm6023_vm1 = vmmov 0   ;;  %vm1235_vm2 = vcmask 261120   ;;  %s7135_s16 = sld [smem:[#allocation33_spill]]  ;;  %s7142_s15 = scalar_lea.vmem %s7032_s18, %s6284_s21 }
  0x78   : > { %5469 = vmatprep.subr.bf16.mxu0 %v6022_v2  ;;  %5477 = vmatprep.subr.bf16.mxu1 %v6022_v2  ;;  %s6024_s8 = smov 104   ;;  %s6025_s6 = smov 120   ;;  %vm1296_vm3 = vcmask 64512   ;;  %v1209_v28 = vld [vmem:[%s6294_s25] sm:$0xff]  ;;  %vm1551_vm4 = vcmask 1043456   ;;  %vm1752_vm5 = vcmask 130048  }
  0x79   : > { %5470 = vmatpush3.bf16.msra.mxu0 %v5709_v1  ;;  %5473 = vmatprep.mubr.msk.bf16.mxu0 %vm6023_vm1, %v6022_v2  ;;  %s6026_s7 = smov 112   ;;  %s6027_s2 = smov 96   ;;  %vm1754_vm6 = vcmask 195584  }
  0x7a   : > { %5471 = vmatprep.subr.bf16.mxu0 %v6022_v2  ;;  %5479 = vmatprep.mubr.msk.bf16.mxu1 %vm6023_vm1, %v6022_v2  ;;  %s6028_s25 = smov 64   ;;  %s7137_s5 = sld [smem:[#allocation22_spill]] }
  0x7b   : > { %s6029_s27 = smov 8   ;;  %s6030_s10 = smov 16  }
  0x7c   : > { %s6031_s22 = smov 24   ;;  %s7138_s9 = sld [smem:[#allocation35_spill]] }
  0x7d   : > { %v6406_v4 = vld [vmem:[%s6394_s19] sm:$0xff]  ;;  %5472 = vmatpush3.bf16.msra.mxu0 %v5710_v3  ;;  %s7136_s17 = scalar_lea.vmem %s7135_s16, %s6284_s21  ;;  %s7140_s12 = sld [smem:[#allocation20_spill]] }
  0x7e   : > { %v1211_v5 = vpack.c.bf16 %v6406_v4, %v6406_v4  ;;  %5483 = vmatprep.subr.bf16.mxu0 %v6022_v2  ;;  %v5019_v6 = vld [vmem:[%s7136_s17] ss:$0 sm:$0xff]  ;;  %s7141_s13 = sld [smem:[#allocation23_spill]]  ;;  %s7144_s26 = scalar_lea.vmem %s7025_s11, %s6284_s21 }
  0x7f   : > { %s7156_s4 = sld [smem:[#allocation44_spill]]  ;;  %p5230_p1 = scmp.ge.s32.totalorder %s6003_s28, 1 }
  0x80   : > { %5474 = vmatmul.mubr.msk.bf16.vlgmr.msra.gmra.mxu0 %vm1235_vm2, %v1211_v5 }
  0x81   : > { %5485 = vmatprep.mubr.msk.bf16.mxu0 %vm6023_vm1, %v6022_v2 }
  0x82   : > { %s7139_s30 = scalar_lea.vmem %s7138_s9, %s6284_s21 }
 0x140   : > { %v1273_v7 = vpop.f32.mrf.mxu0 }
 0x141   : > { %v1274_v8 = vadd.f32 %v5019_v6, %v1273_v7 }
 0x142   : > { %v5475_v9 = vpop.f32.mrf.mxu0 }
 0x143   : > { %1286 = vrot.lane.b32.xlu1 %v1274_v8, %s6024_s8  ;;  %1280 = vrot.lane.b32.xlu0 %v1274_v8, %s6025_s6  ;;  %v6424_v11 = vpack.c.bf16 %v1274_v8, %v1274_v8 }
 0x144   : > { %v1276_v10 = vpop.f32.mrf.mxu0 }
 0x146   : > { %v5476_v12 = vpop.f32.mrf.mxu0 }
 0x147   : > { %1283 = vrot.lane.b32.xlu0 %v1274_v8, %s6026_s7  ;;  %1294 = vrot.lane.b32.xlu1 %v6424_v11, %s6027_s2 }
 0x1b5   : > { %v1287_v13 = vpop.permute.xlu1 %1286  ;;  %v1281_v14 = vpop.permute.xlu0 %1280 }
 0x1b6   : > { %v6429_v15 = vpack.c.bf16 %v1281_v14, %v1281_v14  ;;  %v6433_v18 = vpack.c.bf16 %v1287_v13, %v1287_v13 }
 0x1b8   : > { %1344 = vrot.lane.b32.xlu0 %v6429_v15, %s6027_s2 }
 0x1b9   : > { %v1284_v16 = vpop.permute.xlu0 %1283  ;;  %v1295_v17 = vpop.permute.xlu1 %1294 }
 0x1ba   : > { %v6435_v19 = vpack.c.bf16 %v1284_v16, %v1284_v16  ;;  %v1301_v20 = vsel %vm1296_vm3, %v1295_v17, 0 }
 0x1bb   : > { %5478 = vmatpush3.bf16.xpose.msra.mxu1 %v1301_v20 }
 0x1bc   : > { %1442 = vrot.lane.b32.xlu0 %v6433_v18, %s6027_s2  ;;  %1393 = vrot.lane.b32.xlu1 %v6435_v19, %s6027_s2 }
 0x1bd   : > { %5489 = vmatprep.subr.bf16.mxu1 %v6022_v2 }
 0x1c2   : > { %5480 = vmatmul.mubr.msk.bf16.vlgmr.msra.gmra.mxu1 %vm1296_vm3, %v6424_v11 }
 0x1c3   : > { %5491 = vmatprep.mubr.msk.bf16.mxu1 %vm6023_vm1, %v6022_v2 }
 0x22a   : > { %v1345_v21 = vpop.permute.xlu0 %1344 }
 0x22b   : > { %v1350_v22 = vsel %vm1296_vm3, %v1345_v21, 0 }
 0x22c   : > { %5484 = vmatpush3.bf16.xpose.msra.mxu0 %v1350_v22 }
 0x22d   : > { %5495 = vmatprep.subr.bf16.mxu0 %v6022_v2 }
 0x22e   : > { %v1394_v23 = vpop.permute.xlu1 %1393  ;;  %v1443_v25 = vpop.permute.xlu0 %1442 }
 0x22f   : > { %v1399_v24 = vsel %vm1296_vm3, %v1394_v23, 0  ;;  %v1448_v26 = vsel %vm1296_vm3, %v1443_v25, 0 }
 0x230   : > { %5490 = vmatpush3.bf16.xpose.msra.mxu1 %v1399_v24 }
 0x231   : > { %5501 = vmatprep.subr.bf16.mxu1 %v6022_v2 }
 0x233   : > { %5486 = vmatmul.mubr.msk.bf16.vlgmr.msra.gmra.mxu0 %vm1296_vm3, %v6429_v15 }
 0x234   : > { %5496 = vmatpush3.bf16.xpose.msra.mxu0 %v1448_v26  ;;  %5497 = vmatprep.mubr.msk.bf16.mxu0 %vm6023_vm1, %v6022_v2 }
 0x235   : > { %5507 = vmatprep.subr.bf16.mxu0 %v6022_v2 }
 0x237   : > { %5492 = vmatmul.mubr.msk.bf16.vlgmr.msra.gmra.mxu1 %vm1296_vm3, %v6435_v19 }
 0x238   : > { %5503 = vmatprep.mubr.msk.bf16.mxu1 %vm6023_vm1, %v6022_v2 }
 0x23b   : > { %5498 = vmatmul.mubr.msk.bf16.vlgmr.msra.gmra.mxu0 %vm1296_vm3, %v6433_v18 }
 0x23c   : > { %5509 = vmatprep.mubr.msk.bf16.mxu0 %vm6023_vm1, %v6022_v2 }
 0x282   : > { %v1337_v27 = vpop.f32.mrf.mxu1 }
 0x283   : > { %v1490_v29 = vmul.f32 0.35355338, %v1337_v27 }
 0x284   : > { %v5481_v30 = vpop.f32.mrf.mxu1 }
 0x285   : > { %v1494_v31 = vadd.f32 %v1490_v29, %v1209_v28 }
 0x286   : > { %v1340_v32 = vpop.f32.mrf.mxu1 }
 0x287   : > { %v1498_v33 = vsel %vm1296_vm3, %v1494_v31, -inf }
 0x288   : > { %1499 = vmax.xlane.f32.xlu1 %v1498_v33  ;;  %v5482_v34 = vpop.f32.mrf.mxu1 }
 0x2f3   : > { %v1386_v35 = vpop.f32.mrf.mxu0 }
 0x2f4   : > { %v1491_v36 = vmul.f32 0.35355338, %v1386_v35 }
 0x2f5   : > { %v5487_v37 = vpop.f32.mrf.mxu0 }
 0x2f6   : > { %v1495_v38 = vadd.f32 %v1491_v36, %v1209_v28 }
 0x2f7   : > { %v1389_v39 = vpop.f32.mrf.mxu0  ;;  %v1435_v40 = vpop.f32.mrf.mxu1 }
 0x2f8   : > { %v1492_v41 = vmul.f32 0.35355338, %v1435_v40  ;;  %v1501_v42 = vsel %vm1296_vm3, %v1495_v38, -inf }
 0x2f9   : > { %v5493_v43 = vpop.f32.mrf.mxu1  ;;  %1502 = vmax.xlane.f32.xlu0 %v1501_v42  ;;  %v5488_v44 = vpop.f32.mrf.mxu0  ;;  %v5711_v42 = vld [vmem:[%s7137_s5 + $0x8] sm:$0xff]  }
 0x2fa   : > { %v1496_v45 = vadd.f32 %v1492_v41, %v1209_v28  ;;  %v5712_v43 = vld [vmem:[%s7137_s5] sm:$0xff]  }
 0x2fb   : > { %v1438_v46 = vpop.f32.mrf.mxu1  ;;  %v1484_v47 = vpop.f32.mrf.mxu0 }
 0x2fc   : > { %v1493_v48 = vmul.f32 0.35355338, %v1484_v47  ;;  %v1504_v49 = vsel %vm1296_vm3, %v1496_v45, -inf }
 0x2fd   : > { %v5494_v50 = vpop.f32.mrf.mxu1  ;;  %1505 = vmax.xlane.f32.xlu0 %v1504_v49  ;;  %v5499_v51 = vpop.f32.mrf.mxu0 }
 0x2fe   : > { %v1497_v52 = vadd.f32 %v1493_v48, %v1209_v28 }
 0x2ff   : > { %v1487_v53 = vpop.f32.mrf.mxu0 }
 0x300   : > { %v1507_v54 = vsel %vm1296_vm3, %v1497_v52, -inf }
 0x301   : > { %1508 = vmax.xlane.f32.xlu1 %v1507_v54  ;;  %v5500_v55 = vpop.f32.mrf.mxu0 }
 0x311   : > { %v1500_v56 = vpop.xlane.xlu1 %1499 }
 0x312   : > { %1595 = vrot.lane.b32.xlu1 %v6429_v15, %s6028_s25  ;;  %v1510_v57 = vsub.f32 %v1494_v31, %v1500_v56 }
 0x313   : > { %1546 = vrot.lane.b32.xlu0 %v6424_v11, %s6028_s25 }
 0x314   : > { %v1514_v58 = vmul.f32 1.442695, %v1510_v57 }
 0x316   : > { %5847 = vpow2.f32 %v1514_v58 }
 0x323   : > { %v5848_v59 = vpop.eup %5847 }
 0x324   : > { %v1522_v60 = vsel %vm1296_vm3, %v5848_v59, 0.0 }
 0x332   : > { %1523 = vadd.xlane.f32.xlu0 %v1522_v60 }
 0x382   : > { %v1503_v61 = vpop.xlane.xlu0 %1502 }
 0x383   : > { %v1511_v62 = vsub.f32 %v1495_v38, %v1503_v61 }
 0x385   : > { %v1516_v63 = vmul.f32 1.442695, %v1511_v62 }
 0x386   : > { %v1506_v0 = vpop.xlane.xlu0 %1505 }
 0x387   : > { %5849 = vpow2.f32 %v1516_v63  ;;  %v1512_v1 = vsub.f32 %v1496_v45, %v1506_v0  ;;  %v5031_v63 = vld [vmem:[%s7139_s30] ss:$0 sm:$0xff]  ;;  %s7145_s30 = sld [smem:[#allocation37_spill]] }
 0x389   : > { %v1518_v3 = vmul.f32 1.442695, %v1512_v1 }
 0x38a   : > { %v1547_v5 = vpop.permute.xlu0 %1546  ;;  %v1509_v6 = vpop.xlane.xlu1 %1508 }
 0x38b   : > { %5851 = vpow2.f32 %v1518_v3  ;;  %v1553_v7 = vsel %vm1551_vm4, %v1547_v5, 0  ;;  %v1513_v8 = vsub.f32 %v1497_v52, %v1509_v6 }
 0x38c   : > { %5502 = vmatpush3.bf16.msra.mxu1 %v1553_v7 }
 0x38d   : > { %v1520_v9 = vmul.f32 1.442695, %v1513_v8  ;;  %5513 = vmatprep.subr.bf16.mxu1 %v6022_v2 }
 0x38e   : > { %v1596_v10 = vpop.permute.xlu1 %1595 }
 0x38f   : > { %5853 = vpow2.f32 %v1520_v9  ;;  %v1601_v11 = vsel %vm1551_vm4, %v1596_v10, 0 }
 0x390   : > { %5508 = vmatpush3.bf16.msra.mxu0 %v1601_v11 }
 0x391   : > { %5519 = vmatprep.subr.bf16.mxu0 %v6022_v2 }
 0x394   : > { %v5850_v12 = vpop.eup %5849 }
 0x395   : > { %v1525_v13 = vsel %vm1296_vm3, %v5850_v12, 0.0 }
 0x396   : > { %1526 = vadd.xlane.f32.xlu1 %v1525_v13 }
 0x398   : > { %v5852_v14 = vpop.eup %5851 }
 0x399   : > { %v1528_v15 = vsel %vm1296_vm3, %v5852_v14, 0.0 }
 0x39a   : > { %1529 = vadd.xlane.f32.xlu0 %v1528_v15  ;;  %v1207_v15 = vld [vmem:[%s7140_s12] sm:$0xff] }
 0x39c   : > { %v5854_v16 = vpop.eup %5853 }
 0x39d   : > { %v1531_v17 = vsel %vm1296_vm3, %v5854_v16, 0.0 }
 0x39e   : > { %1532 = vadd.xlane.f32.xlu1 %v1531_v17 }
 0x3af   : > { %1643 = vrot.lane.b32.xlu1 %v6435_v19, %s6028_s25 }
 0x3b0   : > { %1691 = vrot.lane.b32.xlu0 %v6433_v18, %s6028_s25 }
 0x3bb   : > { %v1524_v20 = vpop.xlane.xlu0 %1523 }
 0x3bc   : > { %5855 = vrcp.f32 %v1524_v20  ;;  %v5715_v20 = vld [vmem:[%s7141_s13 + $0x8] sm:$0xff]  }
 0x3c9   : > { %v5856_v21 = vpop.eup %5855 }
 0x3ca   : > { %v1538_v22 = vmul.f32 %v5856_v21, %v5848_v59  ;;  %v5716_v21 = vld [vmem:[%s7141_s13] sm:$0xff]  }
 0x3cc   : > { %v1542_v23 = vpack.c.bf16 %v1538_v22, %v1538_v22 }
 0x3ce   : > { %5504 = vmatmul.mubr.msk.bf16.vlgmr.msra.gmra.mxu1 %vm1296_vm3, %v1542_v23 }
 0x3cf   : > { %5515 = vmatprep.mubr.msk.bf16.mxu1 %vm6023_vm1, %v6022_v2 }
 0x41f   : > { %v1527_v24 = vpop.xlane.xlu1 %1526 }
 0x420   : > { %5857 = vrcp.f32 %v1527_v24 }
 0x423   : > { %v1530_v25 = vpop.xlane.xlu0 %1529 }
 0x424   : > { %5859 = vrcp.f32 %v1530_v25 }
 0x427   : > { %v1533_v26 = vpop.xlane.xlu1 %1532  ;;  %v1692_v29 = vpop.permute.xlu0 %1691 }
 0x428   : > { %5861 = vrcp.f32 %v1533_v26  ;;  %v1697_v32 = vsel %vm1551_vm4, %v1692_v29, 0 }
 0x42b   : > { %v1644_v19 = vpop.permute.xlu1 %1643 }
 0x42c   : > { %v1649_v27 = vsel %vm1551_vm4, %v1644_v19, 0 }
 0x42d   : > { %v5858_v18 = vpop.eup %5857  ;;  %5514 = vmatpush3.bf16.msra.mxu1 %v1649_v27 }
 0x42e   : > { %v1539_v28 = vmul.f32 %v5858_v18, %v5850_v12  ;;  %5525 = vmatprep.subr.bf16.mxu1 %v6022_v2 }
 0x430   : > { %v1543_v30 = vpack.c.bf16 %v1539_v28, %v1539_v28  ;;  %v5035_v28 = vld [vmem:[%s7142_s15] ss:$0 sm:$0xff] }
 0x431   : > { %v5860_v31 = vpop.eup %5859 }
 0x432   : > { %5510 = vmatmul.mubr.msk.bf16.vlgmr.msra.gmra.mxu0 %vm1296_vm3, %v1543_v30  ;;  %v1540_v33 = vmul.f32 %v5860_v31, %v5852_v14  ;;  %v5713_v14 = vld [vmem:[%s6332_s29 + $0x8] sm:$0xff]   ;;  %v5036_v31 = vld [vmem:[%s1185_s23] ss:$0 sm:$0xff] }
 0x433   : > { %5520 = vmatpush3.bf16.msra.mxu0 %v1697_v32  ;;  %5521 = vmatprep.mubr.msk.bf16.mxu0 %vm6023_vm1, %v6022_v2 }
 0x434   : > { %v1544_v34 = vpack.c.bf16 %v1540_v33, %v1540_v33  ;;  %5533 = vmatprep.subr.bf16.mxu0 %v6022_v2 }
 0x435   : > { %v5862_v35 = vpop.eup %5861 }
 0x436   : > { %5516 = vmatmul.mubr.msk.bf16.vlgmr.msra.gmra.mxu1 %vm1296_vm3, %v1544_v34  ;;  %v1541_v36 = vmul.f32 %v5862_v35, %v5854_v16  ;;  %v1208_v16 = vld [vmem:[%s7140_s12 + $0x8] sm:$0xff]  ;;  %v5041_v35 = vld [vmem:[%s7144_s26] ss:$0 sm:$0xff]  ;;  %s7146_s12 = scalar_lea.vmem %s7145_s30, %s6284_s21  ;;  %s7157_s26 = scalar_lea.vmem %s7156_s4, %s6284_s21 }
 0x437   : > { %5529 = vmatprep.mubr.msk.bf16.mxu1 %vm6023_vm1, %v6022_v2  ;;  %5526 = vmatpush3.bf16.msra.mxu1 %v5711_v42  ;;  %v1938_v17 = vpack.c.bf16 %v1208_v16, %v1207_v15 }
 0x438   : > { %v1545_v37 = vpack.c.bf16 %v1541_v36, %v1541_v36  ;;  %5527 = vmatprep.subr.bf16.mxu1 %v6022_v2 }
 0x43a   : > { %5522 = vmatmul.mubr.msk.bf16.vlgmr.msra.gmra.mxu0 %vm1296_vm3, %v1545_v37 }
 0x43b   : > { %5537 = vmatprep.mubr.msk.bf16.mxu0 %vm6023_vm1, %v6022_v2  ;;  %5528 = vmatpush3.bf16.msra.mxu1 %v5712_v43 }
 0x43c   : > { %5541 = vmatprep.subr.bf16.mxu1 %v6022_v2  ;;  %5534 = vmatpush3.bf16.msra.mxu0 %v5715_v20 }
 0x43d   : > { %5535 = vmatprep.subr.bf16.mxu0 %v6022_v2 }
 0x440   : > { %5536 = vmatpush3.bf16.msra.mxu0 %v5716_v21 }
 0x441   : > { %5549 = vmatprep.subr.bf16.mxu0 %v6022_v2 }
 0x48e   : > { %v1589_v38 = vpop.f32.mrf.mxu1 }
 0x490   : > { %v5505_v39 = vpop.f32.mrf.mxu1 }
 0x492   : > { %v1592_v40 = vpop.f32.mrf.mxu1 }
 0x494   : > { %v5506_v41 = vpop.f32.mrf.mxu1 }
 0x4f2   : > { %v1637_v44 = vpop.f32.mrf.mxu0 }
 0x4f3   : > { %1740 = vrot.lane.b32.xlu1 %v1637_v44, %s6029_s27 }
 0x4f4   : > { %v5511_v45 = vpop.f32.mrf.mxu0 }
 0x4f6   : > { %v1640_v46 = vpop.f32.mrf.mxu0  ;;  %v1685_v47 = vpop.f32.mrf.mxu1 }
 0x4f7   : > { %1744 = vrot.lane.b32.xlu0 %v1685_v47, %s6030_s10 }
 0x4f8   : > { %v5512_v48 = vpop.f32.mrf.mxu0  ;;  %v5517_v49 = vpop.f32.mrf.mxu1 }
 0x4fa   : > { %v1688_v50 = vpop.f32.mrf.mxu1  ;;  %v1733_v51 = vpop.f32.mrf.mxu0 }
 0x4fb   : > { %1748 = vrot.lane.b32.xlu1 %v1733_v51, %s6031_s22 }
 0x4fc   : > { %v5518_v52 = vpop.f32.mrf.mxu1  ;;  %v5523_v53 = vpop.f32.mrf.mxu0 }
 0x4fd   : > { %v5037_v53 = vld [vmem:[%s7146_s12] ss:$0 sm:$0xff] }
 0x4fe   : > { %v1736_v54 = vpop.f32.mrf.mxu0 }
 0x500   : > { %v5524_v55 = vpop.f32.mrf.mxu0 }
 0x565   : > { %v1741_v56 = vpop.permute.xlu1 %1740 }
 0x566   : > { %v1751_v58 = vsel %vm1296_vm3, %v1589_v38, %v1741_v56 }
 0x569   : > { %v1745_v57 = vpop.permute.xlu0 %1744 }
 0x56a   : > { %v1753_v59 = vsel %vm1752_vm5, %v1751_v58, %v1745_v57 }
 0x56d   : > { %v1749_v60 = vpop.permute.xlu1 %1748 }
 0x56e   : > { %v1755_v61 = vsel %vm1754_vm6, %v1753_v59, %v1749_v60 }
 0x56f   : > { %v1756_v62 = vpack.c.bf16 %v1755_v61, %v1755_v61 }
 0x571   : > { %5530 = vmatmul.mubr.msk.bf16.vlgmr.msra.gmra.mxu1 %vm1235_vm2, %v1756_v62 }
 0x572   : > { %5545 = vmatprep.mubr.msk.bf16.mxu1 %vm6023_vm1, %v6022_v2  ;;  %5542 = vmatpush3.bf16.msra.mxu1 %v5713_v14 }
 0x573   : > { %5543 = vmatprep.subr.bf16.mxu1 %v6022_v2 }
 0x631   : > { %v1817_v0 = vpop.f32.mrf.mxu1 }
 0x632   : > { %v1818_v1 = vadd.f32 %v5031_v63, %v1817_v0 }
 0x633   : > { %v5531_v3 = vpop.f32.mrf.mxu1 }
 0x634   : > { %v1823_v5 = vadd.f32 %v1818_v1, %v6406_v4  ;;  %v5714_v4 = vld [vmem:[%s6332_s29] sm:$0xff]  }
 0x635   : > { %v1820_v6 = vpop.f32.mrf.mxu1  ;;  %5544 = vmatpush3.bf16.msra.mxu1 %v5714_v4 }
 0x636   : > { %v1824_v7 = vsel %vm1235_vm2, %v1823_v5, 0.0  ;;  %5555 = vmatprep.subr.bf16.mxu1 %v6022_v2 }
 0x637   : > { %1825 = vadd.xlane.f32.xlu0 %v1824_v7  ;;  %v5532_v8 = vpop.f32.mrf.mxu1 }
 0x638   : > { %5546 = vmatmul.mubr.msk.bf16.vlgmr.msra.gmra.mxu1 %vm1235_vm2, %v1938_v17 }
 0x639   : > { %5557 = vmatprep.mubr.msk.bf16.mxu1 %vm6023_vm1, %v6022_v2 }
 0x6c0   : > { %v1826_v9 = vpop.xlane.xlu0 %1825 }
 0x6c1   : > { %v1828_v10 = vmul.f32 0.03125, %v1826_v9 }
 0x6c3   : > { %v1829_v11 = vsub.f32 %v1823_v5, %v1828_v10 }
 0x6c5   : > { %v1830_v12 = vmul.f32 %v1829_v11, %v1829_v11  ;;  %v1842_v29 = vmul.f32 %v5035_v28, %v1829_v11 }
 0x6c7   : > { %v1831_v13 = vsel %vm1235_vm2, %v1830_v12, 0.0 }
 0x6c8   : > { %1832 = vadd.xlane.f32.xlu1 %v1831_v13 }
 0x6f8   : > { %v1999_v36 = vpop.f32.mrf.mxu1 }
 0x6f9   : > { %v2000_v38 = vadd.f32 %v5041_v35, %v1999_v36 }
 0x6fa   : > { %v5547_v37 = vpop.f32.mrf.mxu1 }
 0x6fc   : > { %v2002_v39 = vpop.f32.mrf.mxu1 }
 0x6fd   : > { %v2003_v40 = vadd.f32 %v5041_v35, %v2002_v39 }
 0x6fe   : > { %v5548_v41 = vpop.f32.mrf.mxu1 }
 0x6ff   : > { %v5699_v42 = vpack.i.bf16 %v2003_v40, %v2000_v38  ;;  %v6558_v43 = vpack.c.bf16 %v2003_v40, %v2000_v38 }
 0x701   : > { %5700 = vrot.lane.b32.xlu1 %v5699_v42, %s6026_s7  ;;  %5695 = vrot.lane.b32.xlu0 %v5699_v42, %s6025_s6  ;;  %v2038_v44 = vsel %vm1296_vm3, %v6558_v43, 0 }
 0x705   : > { %5705 = vrot.lane.b32.xlu1 %v5699_v42, %s6024_s8 }
 0x751   : > { %v1833_v22 = vpop.xlane.xlu1 %1832 }
 0x752   : > { %v1834_v23 = vmul.f32 0.032258064, %v1833_v22 }
 0x754   : > { %5863 = vrsqrt.f32 %v1834_v23  ;;  %vm1845_vm7 = vcmp.eq.f32.partialorder %v1834_v23, inf  ;;  %v1848_v26 = vand.u32 2147483648, %v1834_v23  ;;  %vm1847_vm8 = vcmp.eq.f32.partialorder %v1834_v23, 0.0 }
 0x761   : > { %v5864_v24 = vpop.eup %5863 }
 0x762   : > { %v1844_v25 = vmul.f32 %v5864_v24, %v1834_v23 }
 0x764   : > { %v1846_v19 = vsel %vm1845_vm7, %v1834_v23, %v1844_v25 }
 0x765   : > { %v1849_v27 = vsel %vm1847_vm8, %v1848_v26, %v1846_v19 }
 0x766   : > { %v1850_v18 = vadd.f32 1e-06, %v1849_v27 }
 0x768   : > { %5865 = vrcp.f32 %v1850_v18 }
 0x773   : > { %v5696_v45 = vpop.permute.xlu0 %5695  ;;  %v5701_v50 = vpop.permute.xlu1 %5700 }
 0x774   : > { %v5698_v46 = vunpack.i.h.bf16 %v5696_v45  ;;  %v5697_v47 = vunpack.i.l.bf16 %v5696_v45  ;;  %v5703_v51 = vunpack.i.h.bf16 %v5701_v50  ;;  %v5702_v52 = vunpack.i.l.bf16 %v5701_v50 }
 0x775   : > { %v5866_v30 = vpop.eup %5865 }
 0x776   : > { %v1852_v32 = vmul.f32 %v5866_v30, %v1842_v29  ;;  %v6566_v48 = vpack.c.bf16 %v5698_v46, %v5697_v47  ;;  %v6576_v54 = vpack.c.bf16 %v5703_v51, %v5702_v52 }
 0x777   : > { %v5706_v62 = vpop.permute.xlu1 %5705 }
 0x778   : > { %v6546_v33 = vadd.f32 %v5036_v31, %v1852_v32  ;;  %v2084_v49 = vsel %vm1296_vm3, %v6566_v48, 0  ;;  %v2130_v59 = vsel %vm1296_vm3, %v6576_v54, 0  ;;  %v5708_v63 = vunpack.i.h.bf16 %v5706_v62 }
 0x779   : > { %5556 = vmatpush3.bf16.xpose.msra.mxu1 %v2084_v49  ;;  %v5707_v0 = vunpack.i.l.bf16 %v5706_v62 }
 0x77a   : > { %v1861_v34 = vpack.c.bf16 %v6546_v33, %v6546_v33  ;;  %5567 = vmatprep.subr.bf16.mxu1 %v6022_v2 }
 0x77b   : > { %v6587_v1 = vpack.c.bf16 %v5708_v63, %v5707_v0 }
 0x77c   : > { %5538 = vmatmul.mubr.msk.bf16.vlgmr.msra.gmra.mxu0 %vm1235_vm2, %v1861_v34 }
 0x77d   : > { %5551 = vmatprep.mubr.msk.bf16.mxu0 %vm6023_vm1, %v6022_v2  ;;  %5550 = vmatpush3.bf16.xpose.msra.mxu0 %v2038_v44  ;;  %v2176_v6 = vsel %vm1296_vm3, %v6587_v1, 0 }
 0x77e   : > { %5561 = vmatprep.subr.bf16.mxu0 %v6022_v2 }
 0x83c   : > { %v1922_v55 = vpop.f32.mrf.mxu0 }
 0x83d   : > { %v1923_v56 = vadd.f32 %v5037_v53, %v1922_v55 }
 0x83e   : > { %v5539_v57 = vpop.f32.mrf.mxu0 }
 0x83f   : > { %v2026_v58 = vpack.c.bf16 %v1923_v56, %v1923_v56  ;;  %1935 = vrot.lane.b32.xlu1 %v1923_v56, %s6024_s8  ;;  %1929 = vrot.lane.b32.xlu0 %v1923_v56, %s6025_s6  ;;  %s7147_s8 = sld [smem:[#allocation21_spill]] }
 0x840   : > { %v1925_v60 = vpop.f32.mrf.mxu0  ;;  %s7148_s6 = sld [smem:[#allocation24_spill]] }
 0x841   : > { %5552 = vmatmul.mubr.msk.bf16.vlgmr.msra.gmra.mxu0 %vm1296_vm3, %v2026_v58 }
 0x842   : > { %v5540_v61 = vpop.f32.mrf.mxu0  ;;  %5562 = vmatpush3.bf16.xpose.msra.mxu0 %v2130_v59  ;;  %5563 = vmatprep.mubr.msk.bf16.mxu0 %vm6023_vm1, %v6022_v2 }
 0x843   : > { %1932 = vrot.lane.b32.xlu0 %v1923_v56, %s6026_s7  ;;  %5573 = vmatprep.subr.bf16.mxu0 %v6022_v2 }
 0x845   : > { %v1210_v12 = vld [vmem:[%s7147_s8] sm:$0xff] }
 0x8b1   : > { %v1930_v3 = vpop.permute.xlu0 %1929  ;;  %v1936_v9 = vpop.permute.xlu1 %1935 }
 0x8b2   : > { %v2027_v5 = vpack.c.bf16 %v1930_v3, %v1930_v3  ;;  %v2029_v10 = vpack.c.bf16 %v1936_v9, %v1936_v9 }
 0x8b4   : > { %5558 = vmatmul.mubr.msk.bf16.vlgmr.msra.gmra.mxu1 %vm1296_vm3, %v2027_v5 }
 0x8b5   : > { %5568 = vmatpush3.bf16.xpose.msra.mxu1 %v2176_v6  ;;  %v1933_v7 = vpop.permute.xlu0 %1932  ;;  %5569 = vmatprep.mubr.msk.bf16.mxu1 %vm6023_vm1, %v6022_v2 }
 0x8b6   : > { %v2028_v8 = vpack.c.bf16 %v1933_v7, %v1933_v7  ;;  %5579 = vmatprep.subr.bf16.mxu1 %v6022_v2 }
 0x8b8   : > { %5564 = vmatmul.mubr.msk.bf16.vlgmr.msra.gmra.mxu0 %vm1296_vm3, %v2028_v8 }
 0x8b9   : > { %5575 = vmatprep.mubr.msk.bf16.mxu0 %vm6023_vm1, %v6022_v2 }
 0x8bc   : > { %5570 = vmatmul.mubr.msk.bf16.vlgmr.msra.gmra.mxu1 %vm1296_vm3, %v2029_v10 }
 0x8bd   : > { %5581 = vmatprep.mubr.msk.bf16.mxu1 %vm6023_vm1, %v6022_v2 }
 0x901   : > { %v2074_v11 = vpop.f32.mrf.mxu0 }
 0x902   : > { %v2218_v13 = vmul.f32 0.35355338, %v2074_v11 }
 0x903   : > { %v5553_v14 = vpop.f32.mrf.mxu0 }
 0x904   : > { %v2222_v4 = vadd.f32 %v2218_v13, %v1210_v12 }
 0x905   : > { %v2077_v15 = vpop.f32.mrf.mxu0 }
 0x906   : > { %v2226_v16 = vsel %vm1752_vm5, %v2222_v4, -inf }
 0x907   : > { %2227 = vmax.xlane.f32.xlu0 %v2226_v16  ;;  %v5554_v17 = vpop.f32.mrf.mxu0 }
 0x974   : > { %v2120_v20 = vpop.f32.mrf.mxu1 }
 0x975   : > { %v2219_v21 = vmul.f32 0.35355338, %v2120_v20 }
 0x976   : > { %v5559_v22 = vpop.f32.mrf.mxu1 }
 0x977   : > { %v2223_v23 = vadd.f32 %v2219_v21, %v1210_v12 }
 0x978   : > { %v2123_v24 = vpop.f32.mrf.mxu1  ;;  %v2166_v25 = vpop.f32.mrf.mxu0 }
 0x979   : > { %v2220_v26 = vmul.f32 0.35355338, %v2166_v25  ;;  %v2229_v19 = vsel %vm1752_vm5, %v2223_v23, -inf  ;;  %v5718_v24 = vld [vmem:[%s7148_s6] sm:$0xff]  }
 0x97a   : > { %2230 = vmax.xlane.f32.xlu1 %v2229_v19  ;;  %v5560_v27 = vpop.f32.mrf.mxu1  ;;  %v5565_v18 = vpop.f32.mrf.mxu0 }
 0x97b   : > { %v2224_v28 = vadd.f32 %v2220_v26, %v1210_v12 }
 0x97c   : > { %v2169_v29 = vpop.f32.mrf.mxu0  ;;  %v2212_v30 = vpop.f32.mrf.mxu1 }
 0x97d   : > { %v2221_v31 = vmul.f32 0.35355338, %v2212_v30  ;;  %v2232_v32 = vsel %vm1752_vm5, %v2224_v28, -inf }
 0x97e   : > { %v5571_v34 = vpop.f32.mrf.mxu1  ;;  %2233 = vmax.xlane.f32.xlu0 %v2232_v32  ;;  %v5566_v35 = vpop.f32.mrf.mxu0 }
 0x97f   : > { %v2225_v36 = vadd.f32 %v2221_v31, %v1210_v12 }
 0x980   : > { %v2215_v37 = vpop.f32.mrf.mxu1 }
 0x981   : > { %v2235_v38 = vsel %vm1752_vm5, %v2225_v36, -inf }
 0x982   : > { %v5572_v39 = vpop.f32.mrf.mxu1  ;;  %2236 = vmax.xlane.f32.xlu0 %v2235_v38 }
 0x98b   : > { %2275 = vrot.lane.b32.xlu1 %v6558_v43, %s6027_s2 }
 0x990   : > { %v2228_v40 = vpop.xlane.xlu0 %2227 }
 0x991   : > { %v2238_v41 = vsub.f32 %v2222_v4, %v2228_v40 }
 0x993   : > { %v2242_v42 = vmul.f32 1.442695, %v2238_v41 }
 0x995   : > { %5867 = vpow2.f32 %v2242_v42 }
 0x9a2   : > { %v5868_v44 = vpop.eup %5867 }
 0x9a3   : > { %v2250_v45 = vsel %vm1752_vm5, %v5868_v44, 0.0 }
 0x9af   : > { %2251 = vadd.xlane.f32.xlu1 %v2250_v45 }
 0xa03   : > { %v2231_v46 = vpop.xlane.xlu1 %2230 }
 0xa04   : > { %v2239_v47 = vsub.f32 %v2223_v23, %v2231_v46  ;;  %v5717_v23 = vld [vmem:[%s7148_s6 + $0x8] sm:$0xff]  }
 0xa06   : > { %v2244_v49 = vmul.f32 1.442695, %v2239_v47 }
 0xa07   : > { %v2276_v50 = vpop.permute.xlu1 %2275  ;;  %v2234_v51 = vpop.xlane.xlu0 %2233 }
 0xa08   : > { %5869 = vpow2.f32 %v2244_v49  ;;  %v2240_v52 = vsub.f32 %v2224_v28, %v2234_v51  ;;  %5574 = vmatpush3.bf16.msra.mxu0 %v2276_v50 }
 0xa09   : > { %5585 = vmatprep.subr.bf16.mxu0 %v6022_v2 }
 0xa0a   : > { %v2246_v53 = vmul.f32 1.442695, %v2240_v52 }
 0xa0b   : > { %v2237_v43 = vpop.xlane.xlu0 %2236 }
 0xa0c   : > { %5871 = vpow2.f32 %v2246_v53  ;;  %v2241_v55 = vsub.f32 %v2225_v36, %v2237_v43 }
 0xa0e   : > { %v2248_v56 = vmul.f32 1.442695, %v2241_v55 }
 0xa10   : > { %5873 = vpow2.f32 %v2248_v56 }
 0xa15   : > { %v5870_v57 = vpop.eup %5869 }
 0xa16   : > { %v2253_v58 = vsel %vm1752_vm5, %v5870_v57, 0.0 }
 0xa17   : > { %2254 = vadd.xlane.f32.xlu0 %v2253_v58 }
 0xa19   : > { %v5872_v59 = vpop.eup %5871 }
 0xa1a   : > { %v2256_v60 = vsel %vm1752_vm5, %v5872_v59, 0.0 }
 0xa1b   : > { %2257 = vadd.xlane.f32.xlu1 %v2256_v60 }
 0xa1d   : > { %v5874_v61 = vpop.eup %5873 }
 0xa1e   : > { %v2259_v62 = vsel %vm1752_vm5, %v5874_v61, 0.0 }
 0xa1f   : > { %2260 = vadd.xlane.f32.xlu0 %v2259_v62 }
 0xa2c   : > { %2369 = vrot.lane.b32.xlu1 %v6576_v54, %s6027_s2 }
 0xa30   : > { %2416 = vrot.lane.b32.xlu1 %v6587_v1, %s6027_s2 }
 0xa35   : > { %2322 = vrot.lane.b32.xlu0 %v6566_v48, %s6027_s2 }
 0xa38   : > { %v2252_v63 = vpop.xlane.xlu1 %2251 }
 0xa39   : > { %5875 = vrcp.f32 %v2252_v63 }
 0xa46   : > { %v5876_v0 = vpop.eup %5875 }
 0xa47   : > { %v2266_v3 = vmul.f32 %v5876_v0, %v5868_v44  ;;  %v6032_v0 = vmov 0  }
 0xa49   : > { %v2270_v5 = vpack.c.bf16 %v2266_v3, %v2266_v3 }
 0xa4b   : > { %5576 = vmatmul.mubr.msk.bf16.vlgmr.msra.gmra.mxu0 %vm1752_vm5, %v2270_v5 }
 0xa4c   : > { %5587 = vmatprep.mubr.msk.bf16.mxu0 %vm6023_vm1, %v6022_v2 }
 0xaa0   : > { %v2255_v6 = vpop.xlane.xlu0 %2254 }
 0xaa1   : > { %5877 = vrcp.f32 %v2255_v6 }
 0xaa4   : > { %v2258_v7 = vpop.xlane.xlu1 %2257 }
 0xaa5   : > { %5879 = vrcp.f32 %v2258_v7 }
 0xaa8   : > { %v2370_v54 = vpop.permute.xlu1 %2369  ;;  %v2261_v8 = vpop.xlane.xlu0 %2260 }
 0xaa9   : > { %5881 = vrcp.f32 %v2261_v8  ;;  %5586 = vmatpush3.bf16.msra.mxu0 %v2370_v54 }
 0xaaa   : > { %5597 = vmatprep.subr.bf16.mxu0 %v6022_v2 }
 0xaac   : > { %v2323_v48 = vpop.permute.xlu0 %2322  ;;  %v2417_v12 = vpop.permute.xlu1 %2416 }
 0xaad   : > { %5580 = vmatpush3.bf16.msra.mxu1 %v2323_v48 }
 0xaae   : > { %v5878_v1 = vpop.eup %5877  ;;  %5591 = vmatprep.subr.bf16.mxu1 %v6022_v2 }
 0xaaf   : > { %v2267_v9 = vmul.f32 %v5878_v1, %v5870_v57 }
 0xab1   : > { %v2271_v10 = vpack.c.bf16 %v2267_v9, %v2267_v9 }
 0xab2   : > { %v5880_v11 = vpop.eup %5879 }
 0xab3   : > { %5582 = vmatmul.mubr.msk.bf16.vlgmr.msra.gmra.mxu1 %vm1752_vm5, %v2271_v10  ;;  %v2268_v13 = vmul.f32 %v5880_v11, %v5872_v59 }
 0xab4   : > { %5592 = vmatpush3.bf16.msra.mxu1 %v2417_v12  ;;  %5593 = vmatprep.mubr.msk.bf16.mxu1 %vm6023_vm1, %v6022_v2 }
 0xab5   : > { %v2272_v14 = vpack.c.bf16 %v2268_v13, %v2268_v13 }
 0xab6   : > { %v5882_v4 = vpop.eup %5881 }
 0xab7   : > { %5588 = vmatmul.mubr.msk.bf16.vlgmr.msra.gmra.mxu0 %vm1752_vm5, %v2272_v14  ;;  %v2269_v15 = vmul.f32 %v5882_v4, %v5874_v61 }
 0xab8   : > { %5601 = vmatprep.mubr.msk.bf16.mxu0 %vm6023_vm1, %v6022_v2  ;;  %5598 = vmatpush3.bf16.msra.mxu0 %v5717_v23 }
 0xab9   : > { %v2273_v16 = vpack.c.bf16 %v2269_v15, %v2269_v15  ;;  %5599 = vmatprep.subr.bf16.mxu0 %v6022_v2 }
 0xabb   : > { %5594 = vmatmul.mubr.msk.bf16.vlgmr.msra.gmra.mxu1 %vm1752_vm5, %v2273_v16 }
 0xabc   : > { %5600 = vmatpush3.bf16.msra.mxu0 %v5718_v24  ;;  %2893 = vmatprep.mubr.bf16.mxu1 %v6032_v0 }
 0xb0b   : > { %v2315_v17 = vpop.f32.mrf.mxu0 }
 0xb0d   : > { %v5577_v20 = vpop.f32.mrf.mxu0 }
 0xb0f   : > { %v2318_v21 = vpop.f32.mrf.mxu0 }
 0xb11   : > { %v5578_v22 = vpop.f32.mrf.mxu0 }
 0xb73   : > { %v2362_v25 = vpop.f32.mrf.mxu1 }
 0xb74   : > { %2463 = vrot.lane.b32.xlu0 %v2362_v25, %s6029_s27  ;;  %s7149_s27 = sld [smem:[#allocation40_spill]] }
 0xb75   : > { %v5583_v26 = vpop.f32.mrf.mxu1 }
 0xb76   : > { %v5057_v26 = vld [vmem:[%s1188_s20] ss:$0 sm:$0xff]  ;;  %s7154_s20 = sld [smem:[#allocation27_spill]] }
 0xb77   : > { %v2365_v19 = vpop.f32.mrf.mxu1  ;;  %v2409_v27 = vpop.f32.mrf.mxu0 }
 0xb78   : > { %2467 = vrot.lane.b32.xlu1 %v2409_v27, %s6030_s10 }
 0xb79   : > { %v5584_v18 = vpop.f32.mrf.mxu1  ;;  %v5589_v28 = vpop.f32.mrf.mxu0 }
 0xb7a   : > { %s7150_s10 = scalar_lea.vmem %s7149_s27, %s6284_s21  ;;  %v5058_v18 = vld [vmem:[%s1191_s0] ss:$0 sm:$0xff]  ;;  %s7155_s0 = sld [smem:[#allocation25_spill]] }
 0xb7b   : > { %v2412_v29 = vpop.f32.mrf.mxu0  ;;  %v2456_v30 = vpop.f32.mrf.mxu1  ;;  %v5053_v42 = vld [vmem:[%s7150_s10] ss:$0 sm:$0xff] }
 0xb7c   : > { %2471 = vrot.lane.b32.xlu0 %v2456_v30, %s6031_s22  ;;  %s7151_s22 = sld [smem:[#allocation26_spill]] }
 0xb7d   : > { %v5590_v31 = vpop.f32.mrf.mxu0  ;;  %v5595_v32 = vpop.f32.mrf.mxu1 }
 0xb7f   : > { %v2459_v2 = vpop.f32.mrf.mxu1 }
 0xb81   : > { %v5596_v34 = vpop.f32.mrf.mxu1 }
 0xb82   : > { %v2598_v57 = vld [vmem:[%s7151_s22 + $0x80] sm:$0xff]  ;;  %v2607_v61 = vld [vmem:[%s7151_s22 + $0xc8] sm:$0xff]  ;;  %v2600_v9 = vld [vmem:[%s7151_s22 + $0x90] sm:$0xff] }
 0xb83   : > { %v2606_v58 = vld [vmem:[%s7151_s22 + $0xc0] sm:$0xff]  ;;  %v2583_v7 = vld [vmem:[%s7151_s22 + $0x8] sm:$0xff]  ;;  %v2608_v10 = vld [vmem:[%s7151_s22 + $0xd0] sm:$0xff] }
 0xb84   : > { %v5075_v59 = vcombine.low %v2598_v57, %v2606_v58  ;;  %v5076_v60 = vcombine.high %v2598_v57, %v2606_v58  ;;  %v2582_v62 = vld [vmem:[%s7151_s22] sm:$0xff]  ;;  %v2591_v54 = vld [vmem:[%s7151_s22 + $0x48] sm:$0xff]  ;;  %v2601_v11 = vld [vmem:[%s7151_s22 + $0x98] sm:$0xff]  ;;  %v5080_v12 = vcombine.high %v2600_v9, %v2608_v10  ;;  %v5079_v14 = vcombine.low %v2600_v9, %v2608_v10 }
 0xb85   : > { %v2590_v63 = vld [vmem:[%s7151_s22 + $0x40] sm:$0xff]  ;;  %v5062_v8 = vcombine.high %v2583_v7, %v2591_v54  ;;  %v5061_v1 = vcombine.low %v2583_v7, %v2591_v54  ;;  %v2609_v13 = vld [vmem:[%s7151_s22 + $0xd8] sm:$0xff]  ;;  %v2584_v29 = vld [vmem:[%s7151_s22 + $0x10] sm:$0xff] }
 0xb86   : > { %v5060_v6 = vcombine.high %v2582_v62, %v2590_v63  ;;  %2873 = vmatprep.subr.bf16.mxu1 %v5076_v60  ;;  %v5059_v48 = vcombine.low %v2582_v62, %v2590_v63  ;;  %v5081_v4 = vcombine.low %v2601_v11, %v2609_v13  ;;  %v5082_v15 = vcombine.high %v2601_v11, %v2609_v13  ;;  %v2592_v30 = vld [vmem:[%s7151_s22 + $0x50] sm:$0xff]  ;;  %v2585_v31 = vld [vmem:[%s7151_s22 + $0x18] sm:$0xff] }
 0xb87   : > { %2874 = vmatpush1.bf16.msra.mxu1 %v5075_v59  ;;  %v2593_v32 = vld [vmem:[%s7151_s22 + $0x58] sm:$0xff]  ;;  %v2588_v62 = vld [vmem:[%s7151_s22 + $0x30] sm:$0xff] }
 0xb88   : > { %2875 = vmatprep.subr.bf16.mxu1 %v5060_v6  ;;  %v2605_v57 = vld [vmem:[%s7151_s22 + $0xb8] sm:$0xff]  ;;  %v2596_v63 = vld [vmem:[%s7151_s22 + $0x70] sm:$0xff] }
 0xb89   : > { %v2613_v58 = vld [vmem:[%s7151_s22 + $0xf8] sm:$0xff]  ;;  %v5072_v54 = vcombine.high %v2588_v62, %v2596_v63  ;;  %v5723_v13 = vld [vmem:[%s7154_s20 + $0x70] sm:$0xff]  }
 0xb8a   : > { %v5089_v7 = vcombine.low %v2605_v57, %v2613_v58  ;;  %v5719_v9 = vld [vmem:[%s7154_s20 + $0x78] sm:$0xff]  }
 0xb8b   : > { %2876 = vmatpush1.bf16.msra.mxu1 %v5059_v48  ;;  %v5071_v48 = vcombine.low %v2588_v62, %v2596_v63  ;;  %v5720_v10 = vld [vmem:[%s7154_s20 + $0xf8] sm:$0xff]  }
 0xb8c   : > { %2955 = vmatprep.subr.bf16.mxu1 %v5080_v12  ;;  %v5721_v11 = vld [vmem:[%s7154_s20 + $0x38] sm:$0xff]  }
 0xb8d   : > { %v5722_v12 = vld [vmem:[%s7154_s20 + $0xb8] sm:$0xff]  }
 0xbe6   : > { %v2464_v35 = vpop.permute.xlu0 %2463 }
 0xbe7   : > { %v2474_v37 = vsel %vm1296_vm3, %v2315_v17, %v2464_v35  ;;  %v5064_v35 = vcombine.high %v2584_v29, %v2592_v30 }
 0xbea   : > { %v2468_v36 = vpop.permute.xlu1 %2467 }
 0xbeb   : > { %v2475_v38 = vsel %vm1752_vm5, %v2474_v37, %v2468_v36  ;;  %v5066_v36 = vcombine.high %v2585_v31, %v2593_v32  ;;  %v2602_v37 = vld [vmem:[%s7151_s22 + $0xa0] sm:$0xff] }
 0xbee   : > { %v2472_v39 = vpop.permute.xlu0 %2471 }
 0xbef   : > { %v2476_v40 = vsel %vm1754_vm6, %v2475_v38, %v2472_v39  ;;  %v2610_v38 = vld [vmem:[%s7151_s22 + $0xe0] sm:$0xff]  ;;  %v2603_v39 = vld [vmem:[%s7151_s22 + $0xa8] sm:$0xff] }
 0xbf0   : > { %v2477_v41 = vpack.c.bf16 %v2476_v40, %v2476_v40  ;;  %v2611_v40 = vld [vmem:[%s7151_s22 + $0xe8] sm:$0xff] }
 0xbf2   : > { %5602 = vmatmul.mubr.msk.bf16.vlgmr.msra.gmra.mxu0 %vm1235_vm2, %v2477_v41  ;;  %v5063_v41 = vcombine.low %v2584_v29, %v2592_v30  ;;  %v5741_v29 = vld [vmem:[%s7154_s20 + $0x10] sm:$0xff]  }
 0xbf3   : > { %2934 = vmatprep.mubr.bf16.mxu0 %v6032_v0  ;;  %v5742_v30 = vld [vmem:[%s7154_s20 + $0x90] sm:$0xff]  }
 0xcb2   : > { %v2538_v44 = vpop.f32.mrf.mxu0 }
 0xcb3   : > { %v2539_v45 = vadd.f32 %v5053_v42, %v2538_v44  ;;  %v5065_v42 = vcombine.low %v2585_v31, %v2593_v32  ;;  %v5084_v44 = vcombine.high %v2602_v37, %v2610_v38  ;;  %v5743_v31 = vld [vmem:[%s7154_s20 + $0x48] sm:$0xff]  }
 0xcb4   : > { %v5603_v46 = vpop.f32.mrf.mxu0  ;;  %v5744_v32 = vld [vmem:[%s7154_s20 + $0xc8] sm:$0xff]  }
 0xcb5   : > { %v2544_v47 = vadd.f32 %v2539_v45, %v6546_v33  ;;  %v2599_v33 = vld [vmem:[%s7151_s22 + $0x88] sm:$0xff]  ;;  %v5086_v45 = vcombine.high %v2603_v39, %v2611_v40  ;;  %v2586_v46 = vld [vmem:[%s7151_s22 + $0x20] sm:$0xff] }
 0xcb6   : > { %v2541_v49 = vpop.f32.mrf.mxu0  ;;  %v5077_v3 = vcombine.low %v2599_v33, %v2607_v61  ;;  %v5078_v5 = vcombine.high %v2599_v33, %v2607_v61  ;;  %v5090_v61 = vcombine.high %v2605_v57, %v2613_v58 }
 0xcb7   : > { %v2545_v50 = vsel %vm1235_vm2, %v2544_v47, 0.0  ;;  %v2587_v49 = vld [vmem:[%s7151_s22 + $0x28] sm:$0xff] }
 0xcb8   : > { %2546 = vadd.xlane.f32.xlu1 %v2545_v50  ;;  %v5604_v51 = vpop.f32.mrf.mxu0  ;;  %2914 = vmatprep.subr.bf16.mxu0 %v5078_v5  ;;  %v2595_v50 = vld [vmem:[%s7151_s22 + $0x68] sm:$0xff]  ;;  %v2597_v5 = vld [vmem:[%s7151_s22 + $0x78] sm:$0xff] }
 0xcb9   : > { %2915 = vmatpush1.bf16.msra.mxu0 %v5077_v3  ;;  %v5083_v51 = vcombine.low %v2602_v37, %v2610_v38  ;;  %v5069_v59 = vcombine.low %v2587_v49, %v2595_v50  ;;  %v2589_v3 = vld [vmem:[%s7151_s22 + $0x38] sm:$0xff]  ;;  %v5748_v37 = vld [vmem:[%s7154_s20 + $0xc0] sm:$0xff]  }
 0xcba   : > { %2916 = vmatprep.subr.bf16.mxu0 %v5062_v8  ;;  %v5074_v8 = vcombine.high %v2589_v3, %v2597_v5  ;;  %v5749_v38 = vld [vmem:[%s7154_s20] sm:$0xff]  }
 0xcbd   : > { %2917 = vmatpush1.bf16.msra.mxu0 %v5061_v1  ;;  %v5073_v1 = vcombine.low %v2589_v3, %v2597_v5 }
 0xcbe   : > { %2996 = vmatprep.subr.bf16.mxu0 %v5082_v15  ;;  %v5727_v15 = vld [vmem:[%s7154_s20 + $0x68] sm:$0xff]  }
 0xd41   : > { %v2547_v52 = vpop.xlane.xlu1 %2546 }
 0xd42   : > { %v2548_v53 = vmul.f32 0.03125, %v2547_v52  ;;  %v5085_v52 = vcombine.low %v2603_v39, %v2611_v40  ;;  %v5750_v39 = vld [vmem:[%s7154_s20 + $0x80] sm:$0xff]   ;;  %v5751_v40 = vld [vmem:[%s7154_s20 + $0x178] sm:$0xff]  }
 0xd44   : > { %v2549_v43 = vsub.f32 %v2544_v47, %v2548_v53  ;;  %v2594_v47 = vld [vmem:[%s7151_s22 + $0x60] sm:$0xff] }
 0xd45   : > { %v5068_v53 = vcombine.high %v2586_v46, %v2594_v47  ;;  %v5067_v33 = vcombine.low %v2586_v46, %v2594_v47  ;;  %v6759_v46 = vld [vmem:[%s7155_s0 + $0x8] sm:$0xff] }
 0xd46   : > { %v2550_v55 = vmul.f32 %v2549_v43, %v2549_v43  ;;  %v2562_v19 = vmul.f32 %v5057_v26, %v2549_v43  ;;  %v5070_v43 = vcombine.high %v2587_v49, %v2595_v50  ;;  %v5736_v26 = vld [vmem:[%s7154_s20 + $0xd8] sm:$0xff]  }
 0xd48   : > { %v2551_v56 = vsel %vm1235_vm2, %v2550_v55, 0.0  ;;  %v2604_v55 = vld [vmem:[%s7151_s22 + $0xb0] sm:$0xff] }
 0xd49   : > { %2552 = vadd.xlane.f32.xlu0 %v2551_v56  ;;  %v2612_v56 = vld [vmem:[%s7151_s22 + $0xf0] sm:$0xff] }
 0xd4a   : > { %v5088_v60 = vcombine.high %v2604_v55, %v2612_v56  ;;  %v5087_v6 = vcombine.low %v2604_v55, %v2612_v56 }
 0xdd2   : > { %v2553_v16 = vpop.xlane.xlu0 %2552 }
 0xdd3   : > { %v2554_v17 = vmul.f32 0.032258064, %v2553_v16  ;;  %v5728_v16 = vld [vmem:[%s7154_s20 + $0xe8] sm:$0xff]  }
 0xdd5   : > { %5883 = vrsqrt.f32 %v2554_v17  ;;  %vm2565_vm9 = vcmp.eq.f32.partialorder %v2554_v17, inf  ;;  %v2568_v22 = vand.u32 2147483648, %v2554_v17  ;;  %vm2567_vm10 = vcmp.eq.f32.partialorder %v2554_v17, 0.0 }
 0xde2   : > { %v5884_v20 = vpop.eup %5883 }
 0xde3   : > { %v2564_v21 = vmul.f32 %v5884_v20, %v2554_v17  ;;  %v5730_v20 = vld [vmem:[%s7154_s20 + $0xa8] sm:$0xff]  }
 0xde5   : > { %v2566_v23 = vsel %vm2565_vm9, %v2554_v17, %v2564_v21  ;;  %v5729_v17 = vld [vmem:[%s7154_s20 + $0x28] sm:$0xff]   ;;  %v5731_v21 = vld [vmem:[%s7154_s20 + $0x60] sm:$0xff]  }
 0xde6   : > { %v2569_v24 = vsel %vm2567_vm10, %v2568_v22, %v2566_v23  ;;  %v5732_v22 = vld [vmem:[%s7154_s20 + $0xe0] sm:$0xff]  }
 0xde7   : > { %v2570_v25 = vadd.f32 1e-06, %v2569_v24  ;;  %v5733_v23 = vld [vmem:[%s7154_s20 + $0x20] sm:$0xff]  }
 0xde8   : > { %v5734_v24 = vld [vmem:[%s7154_s20 + $0xa0] sm:$0xff]  }
 0xde9   : > { %5885 = vrcp.f32 %v2570_v25  ;;  %v5735_v25 = vld [vmem:[%s7154_s20 + $0x58] sm:$0xff]  }
 0xdf6   : > { %v5886_v27 = vpop.eup %5885 }
 0xdf7   : > { %v2572_v28 = vmul.f32 %v5886_v27, %v2562_v19  ;;  %v5737_v19 = vld [vmem:[%s7154_s20 + $0x18] sm:$0xff]  }
 0xdf8   : > { %v5738_v27 = vld [vmem:[%s7154_s20 + $0x98] sm:$0xff]  }
 0xdf9   : > { %v6677_v2 = vadd.f32 %v5058_v18, %v2572_v28  ;;  %v5739_v18 = vld [vmem:[%s7154_s20 + $0x50] sm:$0xff]  }
 0xdfa   : > { %v5740_v28 = vld [vmem:[%s7154_s20 + $0xd0] sm:$0xff]  }
 0xdfb   : > { %v6681_v34 = vpack.c.bf16 %v6677_v2, %v6677_v2 }
 0xdfd   : > { %5091 = vmatmul.mubr.msk.bf16.vlgmr.msra.gmra.mxu1 %vm1235_vm2, %v6681_v34  ;;  %5092 = vmatmul.mubr.msk.bf16.vlgmr.msra.gmra.mxu0 %vm1235_vm2, %v6681_v34 }
 0xdfe   : > { %2956 = vmatpush1.bf16.msra.mxu1 %v5079_v14  ;;  %2997 = vmatpush1.bf16.msra.mxu0 %v5081_v4  ;;  %v5724_v14 = vld [vmem:[%s7154_s20 + $0xf0] sm:$0xff]  }
 0xdff   : > { %2957 = vmatprep.subr.bf16.mxu1 %v5064_v35  ;;  %2998 = vmatprep.subr.bf16.mxu0 %v5066_v36  ;;  %v5726_v4 = vld [vmem:[%s7154_s20 + $0xb0] sm:$0xff]   ;;  %v5746_v35 = vld [vmem:[%s7154_s20 + $0x88] sm:$0xff]   ;;  %v5747_v36 = vld [vmem:[%s7154_s20 + $0x40] sm:$0xff]  }
 0xe00   : > { %2975 = vmatprep.mubr.bf16.mxu1 %v6032_v0  ;;  %3016 = vmatprep.mubr.bf16.mxu0 %v6032_v0 }
 0xe02   : > { %2958 = vmatpush1.bf16.msra.mxu1 %v5063_v41  ;;  %2999 = vmatpush1.bf16.msra.mxu0 %v5065_v42  ;;  %v5752_v41 = vld [vmem:[%s7154_s20 + $0x1f8] sm:$0xff]   ;;  %v2618_v42 = vlaneseq }
 0xe03   : > { %3037 = vmatprep.subr.bf16.mxu1 %v5084_v44  ;;  %3078 = vmatprep.subr.bf16.mxu0 %v5086_v45 }
 0xe04   : > { %v6755_v44 = vshrl.u32 %v2618_v42, 7 }
 0xe05   : > { %5093 = vmatmul.mubr.msk.bf16.vlgmr.msra.gmra.mxu1 %vm1235_vm2, %v6681_v34  ;;  %5094 = vmatmul.mubr.msk.bf16.vlgmr.msra.gmra.mxu0 %vm1235_vm2, %v6681_v34 }
 0xe06   : > { %3038 = vmatpush1.bf16.msra.mxu1 %v5083_v51  ;;  %3079 = vmatpush1.bf16.msra.mxu0 %v5085_v52  ;;  %v2644_v45 = vsub.s32 6, %v6755_v44  ;;  %v2620_v49 = vsub.s32 0, %v6755_v44  ;;  %v2628_v50 = vsub.s32 2, %v6755_v44  ;;  %v6769_v51 = vld [vmem:[%s7155_s0] sm:$0xff]  ;;  %v2624_v52 = vsub.s32 1, %v6755_v44 }
 0xe07   : > { %3039 = vmatprep.subr.bf16.mxu1 %v5068_v53  ;;  %3080 = vmatprep.subr.bf16.mxu0 %v5070_v43  ;;  %v2632_v53 = vsub.s32 3, %v6755_v44  ;;  %v2640_v5 = vsub.s32 5, %v6755_v44 }
 0xe08   : > { %3057 = vmatprep.mubr.bf16.mxu1 %v6032_v0  ;;  %3098 = vmatprep.mubr.bf16.mxu0 %v6032_v0  ;;  %v6764_v47 = vrot.slane %v6759_v46, %v2644_v45  ;;  %v2621_v43 = vrot.slane %v6769_v51, %v2620_v49  ;;  %v2629_v55 = vrot.slane %v6769_v51, %v2628_v50 }
 0xe09   : > { %v2625_v56 = vrot.slane %v6769_v51, %v2624_v52  ;;  %v2633_v57 = vrot.slane %v6769_v51, %v2632_v53 }
 0xe0a   : > { %3040 = vmatpush1.bf16.msra.mxu1 %v5067_v33  ;;  %3081 = vmatpush1.bf16.msra.mxu0 %v5069_v59 }
 0xe0b   : > { %3119 = vmatprep.subr.bf16.mxu1 %v5088_v60  ;;  %3160 = vmatprep.subr.bf16.mxu0 %v5090_v61 }
 0xe0d   : > { %5095 = vmatmul.mubr.msk.bf16.vlgmr.msra.gmra.mxu1 %vm1235_vm2, %v6681_v34  ;;  %5096 = vmatmul.mubr.msk.bf16.vlgmr.msra.gmra.mxu0 %vm1235_vm2, %v6681_v34 }
 0xe0e   : > { %3120 = vmatpush1.bf16.msra.mxu1 %v5087_v6  ;;  %3161 = vmatpush1.bf16.msra.mxu0 %v5089_v7  ;;  %v2648_v6 = vsub.s32 7, %v6755_v44 }
 0xe0f   : > { %3121 = vmatprep.subr.bf16.mxu1 %v5072_v54  ;;  %3162 = vmatprep.subr.bf16.mxu0 %v5074_v8 }
 0xe10   : > { %3139 = vmatprep.mubr.bf16.mxu1 %v6032_v0  ;;  %3180 = vmatprep.mubr.bf16.mxu0 %v6032_v0  ;;  %v5725_v0 = vld [vmem:[%s7154_s20 + $0x30] sm:$0xff]  }
 0xe12   : > { %3122 = vmatpush1.bf16.msra.mxu1 %v5071_v48  ;;  %3163 = vmatpush1.bf16.msra.mxu0 %v5073_v1 }
 0xe13   : > { %5293 = vmatprep.subr.bf16.mxu1 %v5719_v9  ;;  %5315 = vmatprep.subr.bf16.mxu0 %v5720_v10 }
 0xe15   : > { %5097 = vmatmul.mubr.msk.bf16.vlgmr.msra.gmra.mxu1 %vm1235_vm2, %v6681_v34  ;;  %5098 = vmatmul.mubr.msk.bf16.vlgmr.msra.gmra.mxu0 %vm1235_vm2, %v6681_v34  ;;  %v5745_v34 = vld [vmem:[%s7154_s20 + $0x8] sm:$0xff]  }
 0xe16   : > { %5294 = vmatpush3.bf16.msra.mxu1 %v5721_v11  ;;  %5316 = vmatpush3.bf16.msra.mxu0 %v5722_v12 }
 0xe17   : > { %5295 = vmatprep.subr.bf16.mxu1 %v5723_v13  ;;  %5317 = vmatprep.subr.bf16.mxu0 %v5724_v14  ;;  %v2641_v14 = vrot.slane %v6769_v51, %v2640_v5 }
 0xe1a   : > { %5296 = vmatpush3.bf16.msra.mxu1 %v5725_v0  ;;  %5318 = vmatpush3.bf16.msra.mxu0 %v5726_v4  ;;  %v2649_v0 = vrot.slane %v6769_v51, %v2648_v6  ;;  %v5753_v4 = vld [vmem:[%s7154_s20 + $0x138] sm:$0xff]  }
 0xe1b   : > { %5297 = vmatprep.subr.bf16.mxu1 %v5727_v15  ;;  %5319 = vmatprep.subr.bf16.mxu0 %v5728_v16  ;;  %v5754_v15 = vld [vmem:[%s7154_s20 + $0x1b8] sm:$0xff]  }
 0xe1e   : > { %5298 = vmatpush3.bf16.msra.mxu1 %v5729_v17  ;;  %5320 = vmatpush3.bf16.msra.mxu0 %v5730_v20 }
 0xe1f   : > { %5299 = vmatprep.subr.bf16.mxu1 %v5731_v21  ;;  %5321 = vmatprep.subr.bf16.mxu0 %v5732_v22  ;;  %v5755_v22 = vld [vmem:[%s7154_s20 + $0x170] sm:$0xff]  }
 0xe22   : > { %5300 = vmatpush3.bf16.msra.mxu1 %v5733_v23  ;;  %5322 = vmatpush3.bf16.msra.mxu0 %v5734_v24  ;;  %v5756_v23 = vld [vmem:[%s7154_s20 + $0x1f0] sm:$0xff]  }
 0xe23   : > { %5301 = vmatprep.subr.bf16.mxu1 %v5735_v25  ;;  %5323 = vmatprep.subr.bf16.mxu0 %v5736_v26 }
 0xe26   : > { %5302 = vmatpush3.bf16.msra.mxu1 %v5737_v19  ;;  %5324 = vmatpush3.bf16.msra.mxu0 %v5738_v27  ;;  %v5757_v27 = vld [vmem:[%s7154_s20 + $0x130] sm:$0xff]  }
 0xe27   : > { %5303 = vmatprep.subr.bf16.mxu1 %v5739_v18  ;;  %5325 = vmatprep.subr.bf16.mxu0 %v5740_v28  ;;  %v5758_v18 = vld [vmem:[%s7154_s20 + $0x1b0] sm:$0xff]  }
 0xe2a   : > { %5304 = vmatpush3.bf16.msra.mxu1 %v5741_v29  ;;  %5326 = vmatpush3.bf16.msra.mxu0 %v5742_v30  ;;  %v5759_v30 = vld [vmem:[%s7154_s20 + $0x168] sm:$0xff]  }
 0xe2b   : > { %5305 = vmatprep.subr.bf16.mxu1 %v5743_v31  ;;  %5327 = vmatprep.subr.bf16.mxu0 %v5744_v32  ;;  %v5760_v31 = vld [vmem:[%s7154_s20 + $0x1e8] sm:$0xff]  }
 0xe2e   : > { %5306 = vmatpush3.bf16.msra.mxu1 %v5745_v34  ;;  %5328 = vmatpush3.bf16.msra.mxu0 %v5746_v35 }
 0xe2f   : > { %5307 = vmatprep.subr.bf16.mxu1 %v5747_v36  ;;  %5329 = vmatprep.subr.bf16.mxu0 %v5748_v37 }
 0xe32   : > { %5308 = vmatpush3.bf16.msra.mxu1 %v5749_v38  ;;  %5330 = vmatpush3.bf16.msra.mxu0 %v5750_v39  ;;  %v5761_v39 = vld [vmem:[%s7154_s20 + $0x128] sm:$0xff]  }
 0xe33   : > { %5337 = vmatprep.subr.bf16.mxu1 %v5751_v40  ;;  %5359 = vmatprep.subr.bf16.mxu0 %v5752_v41  ;;  %v5762_v40 = vld [vmem:[%s7154_s20 + $0x1a8] sm:$0xff]  }
 0xebd   : > { %v2895_v58 = vpop.f32.mrf.mxu1  ;;  %v2936_v33 = vpop.f32.mrf.mxu0 }
 0xebe   : > { %v2896_v59 = vadd.f32 %v2895_v58, %v2621_v43  ;;  %v2937_v60 = vadd.f32 %v2936_v33, %v2629_v55  ;;  %v5763_v43 = vld [vmem:[%s7154_s20 + $0x160] sm:$0xff]   ;;  %v2636_v58 = vsub.s32 4, %v6755_v44 }
 0xebf   : > { %v2897_v61 = vpop.f32.mrf.mxu1  ;;  %v2938_v62 = vpop.f32.mrf.mxu0  ;;  %v5764_v55 = vld [vmem:[%s7154_s20 + $0x1e0] sm:$0xff]  }
 0xec0   : > { %v2898_v63 = vadd.f32 %v2897_v61, %v2625_v56  ;;  %v2939_v3 = vadd.f32 %v2938_v62, %v2633_v57  ;;  %v3189_v7 = vmax.f32 %v2896_v59, 0.0  ;;  %v3191_v54 = vmax.f32 %v2937_v60, 0.0  ;;  %v5765_v33 = vld [vmem:[%s7154_s20 + $0x120] sm:$0xff]   ;;  %v5767_v62 = vld [vmem:[%s7154_s20 + $0x158] sm:$0xff]  }
 0xec1   : > { %v2899_v8 = vpop.f32.mrf.mxu1  ;;  %v2940_v48 = vpop.f32.mrf.mxu0  ;;  %v5766_v59 = vld [vmem:[%s7154_s20 + $0x1a0] sm:$0xff]  }
 0xec2   : > { %v3190_v1 = vmax.f32 %v2898_v63, 0.0  ;;  %v3192_v9 = vmax.f32 %v2939_v3, 0.0  ;;  %v3205_v16 = vpack.c.bf16 %v3189_v7, %v3189_v7  ;;  %v3207_v17 = vpack.c.bf16 %v3191_v54, %v3191_v54  ;;  %v5768_v63 = vld [vmem:[%s7154_s20 + $0x1d8] sm:$0xff]  }
 0xec3   : > { %v2900_v10 = vpop.f32.mrf.mxu1  ;;  %v2941_v11 = vpop.f32.mrf.mxu0  ;;  %v2669_v3 = vrot.slane %v6759_v46, %v2636_v58  ;;  %v5769_v8 = vld [vmem:[%s7154_s20 + $0x118] sm:$0xff]  }
 0xec4   : > { %v3206_v12 = vpack.c.bf16 %v3190_v1, %v3190_v1  ;;  %v3208_v13 = vpack.c.bf16 %v3192_v9, %v3192_v9  ;;  %v5770_v48 = vld [vmem:[%s7154_s20 + $0x198] sm:$0xff]   ;;  %v5771_v10 = vld [vmem:[%s7154_s20 + $0x150] sm:$0xff]  }
 0xec5   : > { %v6795_v20 = vpop.f32.mrf.mxu1  ;;  %v6797_v21 = vpop.f32.mrf.mxu0  ;;  %v5772_v11 = vld [vmem:[%s7154_s20 + $0x1d0] sm:$0xff]  }
 0xec6   : > { %4284 = vmatprep.mubr.bf16.mxu1 %v3206_v12  ;;  %4324 = vmatprep.mubr.bf16.mxu0 %v3208_v13 }
 0xec7   : > { %v2979_v24 = vpop.f32.mrf.mxu1  ;;  %v3020_v25 = vpop.f32.mrf.mxu0  ;;  %4285 = vmatmul.mubr.bf16.vlgmr.msra.gmra.mxu1 %v3205_v16  ;;  %4325 = vmatmul.mubr.bf16.vlgmr.msra.gmra.mxu0 %v3207_v17  ;;  %v2637_v16 = vrot.slane %v6769_v51, %v2636_v58  ;;  %v2645_v17 = vrot.slane %v6769_v51, %v2644_v45  ;;  %v5777_v45 = vld [vmem:[%s7154_s20 + $0x108] sm:$0xff]  }
 0xec8   : > { %v2980_v26 = vadd.f32 %v2979_v24, %v2641_v14  ;;  %v3021_v19 = vadd.f32 %v3020_v25, %v2649_v0  ;;  %5338 = vmatpush3.bf16.msra.mxu1 %v5753_v4  ;;  %5360 = vmatpush3.bf16.msra.mxu0 %v5754_v15  ;;  %v5773_v4 = vld [vmem:[%s7154_s20 + $0x110] sm:$0xff]   ;;  %v5776_v24 = vld [vmem:[%s7154_s20 + $0x1c8] sm:$0xff]   ;;  %v2657_v25 = vrot.slane %v6759_v46, %v2624_v52  ;;  %v5779_v52 = vld [vmem:[%s7154_s20 + $0x140] sm:$0xff]  }
 0xec9   : > { %v2981_v28 = vpop.f32.mrf.mxu1  ;;  %v3022_v29 = vpop.f32.mrf.mxu0  ;;  %5339 = vmatprep.subr.bf16.mxu1 %v5755_v22  ;;  %5361 = vmatprep.subr.bf16.mxu0 %v5756_v23  ;;  %v5774_v15 = vld [vmem:[%s7154_s20 + $0x190] sm:$0xff]   ;;  %v5778_v51 = vld [vmem:[%s7154_s20 + $0x188] sm:$0xff]  }
 0xeca   : > { %v3194_v32 = vmax.f32 %v2980_v26, 0.0  ;;  %v3196_v34 = vmax.f32 %v3021_v19, 0.0  ;;  %v2665_v26 = vrot.slane %v6759_v46, %v2632_v53  ;;  %v3019_v28 = vadd.f32 %v6797_v21, %v2645_v17  ;;  %v5780_v29 = vld [vmem:[%s7154_s20 + $0x1c0] sm:$0xff]   ;;  %v5784_v21 = vld [vmem:[%s7154_s20 + $0x2f8] sm:$0xff]   ;;  %v5806_v17 = vld [vmem:[%s7154_s20 + $0x290] sm:$0xff]  }
 0xecb   : > { %v2982_v35 = vpop.f32.mrf.mxu1  ;;  %v3023_v36 = vpop.f32.mrf.mxu0 }
 0xecc   : > { %v3210_v37 = vpack.c.bf16 %v3194_v32, %v3194_v32  ;;  %v3212_v38 = vpack.c.bf16 %v3196_v34, %v3196_v34  ;;  %5340 = vmatpush3.bf16.msra.mxu1 %v5757_v27  ;;  %5362 = vmatpush3.bf16.msra.mxu0 %v5758_v18  ;;  %v2978_v18 = vadd.f32 %v6795_v20, %v2637_v16  ;;  %v5782_v32 = vld [vmem:[%s7154_s20 + $0x180] sm:$0xff]   ;;  %v3195_v35 = vmax.f32 %v3019_v28, 0.0  ;;  %v5783_v20 = vld [vmem:[%s7154_s20 + $0x278] sm:$0xff]  }
 0xecd   : > { %v6807_v41 = vpop.f32.mrf.mxu1  ;;  %v6809_v42 = vpop.f32.mrf.mxu0  ;;  %5341 = vmatprep.subr.bf16.mxu1 %v5759_v30  ;;  %5363 = vmatprep.subr.bf16.mxu0 %v5760_v31  ;;  %v5781_v31 = vld [vmem:[%s7154_s20 + $0x100] sm:$0xff]   ;;  %v2653_v16 = vrot.slane %v6759_v46, %v2620_v49  ;;  %v2681_v49 = vrot.slane %v6759_v46, %v2648_v6 }
 0xece   : > { %4364 = vmatprep.mubr.bf16.mxu1 %v3210_v37  ;;  %4404 = vmatprep.mubr.bf16.mxu0 %v3212_v38  ;;  %v3193_v34 = vmax.f32 %v2978_v18, 0.0  ;;  %v5785_v38 = vld [vmem:[%s7154_s20 + $0x238] sm:$0xff]  }
 0xecf   : > { %v3061_v56 = vpop.f32.mrf.mxu1  ;;  %v3102_v57 = vpop.f32.mrf.mxu0 }
 0xed0   : > { %5342 = vmatpush3.bf16.msra.mxu1 %v5761_v39  ;;  %5364 = vmatpush3.bf16.msra.mxu0 %v5762_v40  ;;  %v3062_v30 = vadd.f32 %v3061_v56, %v2657_v25  ;;  %v3103_v53 = vadd.f32 %v3102_v57, %v2665_v26  ;;  %v3209_v39 = vpack.c.bf16 %v3193_v34, %v3193_v34  ;;  %v5787_v56 = vld [vmem:[%s7154_s20 + $0x270] sm:$0xff]   ;;  %v5809_v25 = vld [vmem:[%s7154_s20 + $0x208] sm:$0xff]  }
 0xed1   : > { %v3063_v60 = vpop.f32.mrf.mxu1  ;;  %v3104_v61 = vpop.f32.mrf.mxu0  ;;  %5343 = vmatprep.subr.bf16.mxu1 %v5763_v43  ;;  %5365 = vmatprep.subr.bf16.mxu0 %v5764_v55  ;;  %v3211_v40 = vpack.c.bf16 %v3195_v35, %v3195_v35  ;;  %v5786_v43 = vld [vmem:[%s7154_s20 + $0x2b8] sm:$0xff]   ;;  %v5788_v57 = vld [vmem:[%s7154_s20 + $0x2f0] sm:$0xff]   ;;  %v3060_v26 = vadd.f32 %v6807_v41, %v2653_v16  ;;  %v5814_v41 = vld [vmem:[%s7154_s20 + $0x280] sm:$0xff]  }
 0xed2   : > { %v3198_v36 = vmax.f32 %v3062_v30, 0.0  ;;  %v3200_v37 = vmax.f32 %v3103_v53, 0.0  ;;  %v5791_v60 = vld [vmem:[%s7154_s20 + $0x268] sm:$0xff]   ;;  %v5819_v53 = vld [vmem:[%s7154_s20 + $0x370] sm:$0xff]  }
 0xed3   : > { %v3064_v7 = vpop.f32.mrf.mxu1  ;;  %v3105_v54 = vpop.f32.mrf.mxu0  ;;  %v5792_v61 = vld [vmem:[%s7154_s20 + $0x2e8] sm:$0xff]   ;;  %v3197_v6 = vmax.f32 %v3060_v26, 0.0  ;;  %v5821_v35 = vld [vmem:[%s7154_s20 + $0x330] sm:$0xff]  }
 0xed4   : > { %5344 = vmatpush3.bf16.msra.mxu1 %v5765_v33  ;;  %5366 = vmatpush3.bf16.msra.mxu0 %v5766_v59  ;;  %v3214_v55 = vpack.c.bf16 %v3198_v36, %v3198_v36  ;;  %v3216_v58 = vpack.c.bf16 %v3200_v37, %v3200_v37  ;;  %v5789_v33 = vld [vmem:[%s7154_s20 + $0x230] sm:$0xff]   ;;  %v5796_v7 = vld [vmem:[%s7154_s20 + $0x2e0] sm:$0xff]   ;;  %v5824_v36 = vld [vmem:[%s7154_s20 + $0x3e8] sm:$0xff]  }
 0xed5   : > { %v3141_v1 = vpop.f32.mrf.mxu1  ;;  %v3182_v9 = vpop.f32.mrf.mxu0  ;;  %5345 = vmatprep.subr.bf16.mxu1 %v5767_v62  ;;  %5367 = vmatprep.subr.bf16.mxu0 %v5768_v63  ;;  %v5790_v59 = vld [vmem:[%s7154_s20 + $0x2b0] sm:$0xff]   ;;  %v5793_v62 = vld [vmem:[%s7154_s20 + $0x228] sm:$0xff]   ;;  %v5797_v54 = vld [vmem:[%s7154_s20 + $0x220] sm:$0xff]  }
 0xed6   : > { %v6823_v12 = vadd.f32 %v3141_v1, %v2669_v3  ;;  %v6826_v13 = vadd.f32 %v3182_v9, %v6764_v47  ;;  %v5775_v47 = vld [vmem:[%s7154_s20 + $0x148] sm:$0xff]   ;;  %v5795_v3 = vld [vmem:[%s7154_s20 + $0x260] sm:$0xff]   ;;  %v5800_v1 = vld [vmem:[%s7154_s20 + $0x2d8] sm:$0xff]  }
 0xed7   : > { %v6828_v14 = vpop.f32.mrf.mxu1  ;;  %v6830_v0 = vpop.f32.mrf.mxu0  ;;  %v5794_v63 = vld [vmem:[%s7154_s20 + $0x2a8] sm:$0xff]   ;;  %v5801_v9 = vld [vmem:[%s7154_s20 + $0x218] sm:$0xff]  }
 0xed8   : > { %5346 = vmatpush3.bf16.msra.mxu1 %v5769_v8  ;;  %5368 = vmatpush3.bf16.msra.mxu0 %v5770_v48  ;;  %v5798_v8 = vld [vmem:[%s7154_s20 + $0x2a0] sm:$0xff]   ;;  %v5799_v48 = vld [vmem:[%s7154_s20 + $0x258] sm:$0xff]   ;;  %v5825_v37 = vld [vmem:[%s7154_s20 + $0x328] sm:$0xff]  }
 0xed9   : > { %v3145_v22 = vpop.f32.mrf.mxu1  ;;  %v3186_v23 = vpop.f32.mrf.mxu0  ;;  %5347 = vmatprep.subr.bf16.mxu1 %v5771_v10  ;;  %5369 = vmatprep.subr.bf16.mxu0 %v5772_v11  ;;  %v5802_v10 = vld [vmem:[%s7154_s20 + $0x298] sm:$0xff]   ;;  %v5803_v11 = vld [vmem:[%s7154_s20 + $0x250] sm:$0xff]  }
 0xeda   : > { %v5807_v22 = vld [vmem:[%s7154_s20 + $0x248] sm:$0xff]   ;;  %v2661_v23 = vrot.slane %v6759_v46, %v2628_v50 }
 0xedb   : > { %v3146_v19 = vpop.f32.mrf.mxu1  ;;  %v3187_v27 = vpop.f32.mrf.mxu0  ;;  %v5810_v50 = vld [vmem:[%s7154_s20 + $0x288] sm:$0xff]  }
 0xedc   : > { %5348 = vmatpush3.bf16.msra.mxu1 %v5773_v4  ;;  %5370 = vmatpush3.bf16.msra.mxu0 %v5774_v15  ;;  %v5804_v4 = vld [vmem:[%s7154_s20 + $0x2d0] sm:$0xff]   ;;  %v5811_v19 = vld [vmem:[%s7154_s20 + $0x240] sm:$0xff]   ;;  %v3101_v27 = vadd.f32 %v6809_v42, %v2661_v23  ;;  %v5816_v42 = vld [vmem:[%s7154_s20 + $0x3f8] sm:$0xff]  }
 0xedd   : > { %5349 = vmatprep.subr.bf16.mxu1 %v5775_v47  ;;  %5371 = vmatprep.subr.bf16.mxu0 %v5776_v24  ;;  %v5805_v15 = vld [vmem:[%s7154_s20 + $0x210] sm:$0xff]   ;;  %v5808_v47 = vld [vmem:[%s7154_s20 + $0x2c8] sm:$0xff]   ;;  %v2673_v24 = vrot.slane %v6759_v46, %v2640_v5  ;;  %v3185_v46 = vadd.f32 %v6830_v0, %v2681_v49  ;;  %v5813_v5 = vld [vmem:[%s7154_s20 + $0x200] sm:$0xff]  }
 0xede   : > { %v3199_v18 = vmax.f32 %v3101_v27, 0.0  ;;  %v5818_v0 = vld [vmem:[%s7154_s20 + $0x3b8] sm:$0xff]  }
 0xedf   : > { %v3144_v44 = vadd.f32 %v6828_v14, %v2673_v24  ;;  %v5817_v14 = vld [vmem:[%s7154_s20 + $0x338] sm:$0xff]  }
 0xee0   : > { %5350 = vmatpush3.bf16.msra.mxu1 %v5777_v45  ;;  %5372 = vmatpush3.bf16.msra.mxu0 %v5778_v51  ;;  %v5812_v45 = vld [vmem:[%s7154_s20 + $0x2c0] sm:$0xff]   ;;  %v5815_v51 = vld [vmem:[%s7154_s20 + $0x378] sm:$0xff]   ;;  %v3215_v30 = vpack.c.bf16 %v3199_v18, %v3199_v18 }
 0xee1   : > { %5351 = vmatprep.subr.bf16.mxu1 %v5779_v52  ;;  %5373 = vmatprep.subr.bf16.mxu0 %v5780_v29  ;;  %v3202_v28 = vmax.f32 %v3144_v44, 0.0  ;;  %v3204_v52 = vmax.f32 %v3185_v46, 0.0  ;;  %v3213_v29 = vpack.c.bf16 %v3197_v6, %v3197_v6 }
 0xee3   : > { %v3220_v34 = vpack.c.bf16 %v3204_v52, %v3204_v52 }
 0xee4   : > { %5352 = vmatpush3.bf16.msra.mxu1 %v5781_v31  ;;  %5374 = vmatpush3.bf16.msra.mxu0 %v5782_v32  ;;  %v3218_v31 = vpack.c.bf16 %v3202_v28, %v3202_v28  ;;  %v5820_v32 = vld [vmem:[%s7154_s20 + $0x3f0] sm:$0xff]  }
 0xee5   : > { %5381 = vmatprep.subr.bf16.mxu1 %v5783_v20  ;;  %5403 = vmatprep.subr.bf16.mxu0 %v5784_v21  ;;  %v5822_v20 = vld [vmem:[%s7154_s20 + $0x3b0] sm:$0xff]   ;;  %v5823_v21 = vld [vmem:[%s7154_s20 + $0x368] sm:$0xff]  }
 0xee7   : > { %4365 = vmatmul.mubr.bf16.vlgmr.msra.gmra.mxu1 %v3209_v39  ;;  %4405 = vmatmul.mubr.bf16.vlgmr.msra.gmra.mxu0 %v3211_v40  ;;  %v5827_v39 = vld [vmem:[%s7154_s20 + $0x360] sm:$0xff]  }
 0xee8   : > { %5382 = vmatpush3.bf16.msra.mxu1 %v5785_v38  ;;  %4444 = vmatprep.mubr.bf16.mxu1 %v3214_v55  ;;  %v5826_v38 = vld [vmem:[%s7154_s20 + $0x3a8] sm:$0xff]   ;;  %v5828_v40 = vld [vmem:[%s7154_s20 + $0x3e0] sm:$0xff]  }
 0xee9   : > { %5404 = vmatpush3.bf16.msra.mxu0 %v5786_v43  ;;  %4484 = vmatprep.mubr.bf16.mxu0 %v3216_v58  ;;  %v5829_v43 = vld [vmem:[%s7154_s20 + $0x320] sm:$0xff]   ;;  %v5833_v58 = vld [vmem:[%s7154_s20 + $0x318] sm:$0xff]  }
 0xeea   : > { %5383 = vmatprep.subr.bf16.mxu1 %v5787_v56  ;;  %5405 = vmatprep.subr.bf16.mxu0 %v5788_v57  ;;  %v5830_v55 = vld [vmem:[%s7154_s20 + $0x3a0] sm:$0xff]   ;;  %v5831_v56 = vld [vmem:[%s7154_s20 + $0x358] sm:$0xff]  }
 0xeeb   : > { %v5832_v57 = vld [vmem:[%s7154_s20 + $0x3d8] sm:$0xff]  }
 0xeec   : > { %5384 = vmatpush3.bf16.msra.mxu1 %v5789_v33  ;;  %v5834_v33 = vld [vmem:[%s7154_s20 + $0x398] sm:$0xff]  }
 0xeed   : > { %5406 = vmatpush3.bf16.msra.mxu0 %v5790_v59  ;;  %5385 = vmatprep.subr.bf16.mxu1 %v5791_v60  ;;  %v5835_v59 = vld [vmem:[%s7154_s20 + $0x350] sm:$0xff]  }
 0xeee   : > { %5407 = vmatprep.subr.bf16.mxu0 %v5792_v61  ;;  %v5836_v60 = vld [vmem:[%s7154_s20 + $0x3d0] sm:$0xff]  }
 0xeef   : > { %v5837_v61 = vld [vmem:[%s7154_s20 + $0x310] sm:$0xff]  }
 0xef0   : > { %5386 = vmatpush3.bf16.msra.mxu1 %v5793_v62  ;;  %v5838_v62 = vld [vmem:[%s7154_s20 + $0x390] sm:$0xff]  }
 0xef1   : > { %5408 = vmatpush3.bf16.msra.mxu0 %v5794_v63  ;;  %5387 = vmatprep.subr.bf16.mxu1 %v5795_v3  ;;  %v5839_v63 = vld [vmem:[%s7154_s20 + $0x348] sm:$0xff]  }
 0xef2   : > { %5409 = vmatprep.subr.bf16.mxu0 %v5796_v7  ;;  %v5840_v3 = vld [vmem:[%s7154_s20 + $0x3c8] sm:$0xff]  }
 0xef3   : > { %v5841_v7 = vld [vmem:[%s7154_s20 + $0x308] sm:$0xff]  }
 0xef4   : > { %5388 = vmatpush3.bf16.msra.mxu1 %v5797_v54  ;;  %v5842_v54 = vld [vmem:[%s7154_s20 + $0x388] sm:$0xff]  }
 0xef5   : > { %5410 = vmatpush3.bf16.msra.mxu0 %v5798_v8  ;;  %5389 = vmatprep.subr.bf16.mxu1 %v5799_v48  ;;  %v5843_v8 = vld [vmem:[%s7154_s20 + $0x340] sm:$0xff]  }
 0xef6   : > { %5411 = vmatprep.subr.bf16.mxu0 %v5800_v1  ;;  %v5844_v48 = vld [vmem:[%s7154_s20 + $0x3c0] sm:$0xff]  }
 0xef7   : > { %v5845_v1 = vld [vmem:[%s7154_s20 + $0x300] sm:$0xff]  }
 0xef8   : > { %5390 = vmatpush3.bf16.msra.mxu1 %v5801_v9  ;;  %v3201_v9 = vmax.f32 %v6823_v12, 0.0 }
 0xef9   : > { %5412 = vmatpush3.bf16.msra.mxu0 %v5802_v10  ;;  %5391 = vmatprep.subr.bf16.mxu1 %v5803_v11  ;;  %v5846_v10 = vld [vmem:[%s7154_s20 + $0x380] sm:$0xff]   ;;  %v3203_v11 = vmax.f32 %v6826_v13, 0.0 }
 0xefa   : > { %5413 = vmatprep.subr.bf16.mxu0 %v5804_v4  ;;  %v3217_v4 = vpack.c.bf16 %v3201_v9, %v3201_v9 }
 0xefc   : > { %5392 = vmatpush3.bf16.msra.mxu1 %v5805_v15  ;;  %v3219_v15 = vpack.c.bf16 %v3203_v11, %v3203_v11 }
 0xefd   : > { %5414 = vmatpush3.bf16.msra.mxu0 %v5806_v17  ;;  %5393 = vmatprep.subr.bf16.mxu1 %v5807_v22  ;;  %v5099_v22 = vld [vmem:[%s7157_s26] ss:$0 sm:$0xff] }
 0xefe   : > { %5415 = vmatprep.subr.bf16.mxu0 %v5808_v47 }
 0xf00   : > { %5394 = vmatpush3.bf16.msra.mxu1 %v5809_v25 }
 0xf01   : > { %5416 = vmatpush3.bf16.msra.mxu0 %v5810_v50  ;;  %5395 = vmatprep.subr.bf16.mxu1 %v5811_v19 }
 0xf02   : > { %5417 = vmatprep.subr.bf16.mxu0 %v5812_v45 }
 0xf04   : > { %5396 = vmatpush3.bf16.msra.mxu1 %v5813_v5 }
 0xf05   : > { %5418 = vmatpush3.bf16.msra.mxu0 %v5814_v41  ;;  %5425 = vmatprep.subr.bf16.mxu1 %v5815_v51 }
 0xf06   : > { %5447 = vmatprep.subr.bf16.mxu0 %v5816_v42 }
 0xf07   : > { %4445 = vmatmul.mubr.bf16.vlgmr.msra.gmra.mxu1 %v3213_v29 }
 0xf08   : > { %4485 = vmatmul.mubr.bf16.vlgmr.msra.gmra.mxu0 %v3215_v30  ;;  %5426 = vmatpush3.bf16.msra.mxu1 %v5817_v14 }
 0xf09   : > { %4524 = vmatprep.mubr.bf16.mxu1 %v3218_v31  ;;  %5448 = vmatpush3.bf16.msra.mxu0 %v5818_v0 }
 0xf0a   : > { %4564 = vmatprep.mubr.bf16.mxu0 %v3220_v34  ;;  %5427 = vmatprep.subr.bf16.mxu1 %v5819_v53 }
 0xf0b   : > { %5449 = vmatprep.subr.bf16.mxu0 %v5820_v32 }
 0xf0c   : > { %5428 = vmatpush3.bf16.msra.mxu1 %v5821_v35 }
 0xf0d   : > { %5450 = vmatpush3.bf16.msra.mxu0 %v5822_v20  ;;  %5429 = vmatprep.subr.bf16.mxu1 %v5823_v21 }
 0xf0e   : > { %5451 = vmatprep.subr.bf16.mxu0 %v5824_v36 }
 0xf10   : > { %5430 = vmatpush3.bf16.msra.mxu1 %v5825_v37 }
 0xf11   : > { %5452 = vmatpush3.bf16.msra.mxu0 %v5826_v38  ;;  %5431 = vmatprep.subr.bf16.mxu1 %v5827_v39 }
 0xf12   : > { %5453 = vmatprep.subr.bf16.mxu0 %v5828_v40 }
 0xf14   : > { %5432 = vmatpush3.bf16.msra.mxu1 %v5829_v43 }
 0xf15   : > { %5454 = vmatpush3.bf16.msra.mxu0 %v5830_v55  ;;  %5433 = vmatprep.subr.bf16.mxu1 %v5831_v56 }
 0xf16   : > { %5455 = vmatprep.subr.bf16.mxu0 %v5832_v57 }
 0xf18   : > { %5434 = vmatpush3.bf16.msra.mxu1 %v5833_v58 }
 0xf19   : > { %5456 = vmatpush3.bf16.msra.mxu0 %v5834_v33  ;;  %5435 = vmatprep.subr.bf16.mxu1 %v5835_v59 }
 0xf1a   : > { %5457 = vmatprep.subr.bf16.mxu0 %v5836_v60 }
 0xf1c   : > { %5436 = vmatpush3.bf16.msra.mxu1 %v5837_v61 }
 0xf1d   : > { %5458 = vmatpush3.bf16.msra.mxu0 %v5838_v62  ;;  %5437 = vmatprep.subr.bf16.mxu1 %v5839_v63 }
 0xf1e   : > { %5459 = vmatprep.subr.bf16.mxu0 %v5840_v3 }
 0xf20   : > { %5438 = vmatpush3.bf16.msra.mxu1 %v5841_v7 }
 0xf21   : > { %5460 = vmatpush3.bf16.msra.mxu0 %v5842_v54  ;;  %5439 = vmatprep.subr.bf16.mxu1 %v5843_v8 }
 0xf22   : > { %5461 = vmatprep.subr.bf16.mxu0 %v5844_v48 }
 0xf24   : > { %5440 = vmatpush3.bf16.msra.mxu1 %v5845_v1 }
 0xf25   : > { %5462 = vmatpush3.bf16.msra.mxu0 %v5846_v10 }
 0xf27   : > { %4525 = vmatmul.mubr.bf16.vlgmr.msra.gmra.mxu1 %v3217_v4 }
 0xf28   : > { %4565 = vmatmul.mubr.bf16.vlgmr.msra.gmra.mxu0 %v3219_v15 }
 0xf87   : > { %v5309_v16 = vpop.f32.mrf.mxu1  ;;  %v5331_v17 = vpop.f32.mrf.mxu0 }
 0xf89   : > { %v5310_v12 = vpop.f32.mrf.mxu1  ;;  %v5332_v23 = vpop.f32.mrf.mxu0 }
 0xf8a   : > { %v5311_v47 = vadd.f32 %v5310_v12, %v5309_v16  ;;  %v5333_v24 = vadd.f32 %v5332_v23, %v5331_v17  ;;  %v5228_v16 = vld [vmem:[%s1194_s3] ss:$0 sm:$0xff] }
 0xf8b   : > { %v5312_v49 = vpop.f32.mrf.mxu1  ;;  %v5334_v13 = vpop.f32.mrf.mxu0  ;;  %v5229_v12 = vld [vmem:[%s1197_s1] ss:$0 sm:$0xff] }
 0xf8c   : > { %v4287_v25 = vadd.f32 %v5311_v47, %v5099_v22 }
 0xf8d   : > { %v5313_v26 = vpop.f32.mrf.mxu1  ;;  %v5335_v50 = vpop.f32.mrf.mxu0 }
 0xf8e   : > { %v4327_v19 = vadd.f32 %v5333_v24, %v4287_v25 }
 0xfa7   : > { %v5353_v27 = vpop.f32.mrf.mxu1  ;;  %v5375_v45 = vpop.f32.mrf.mxu0 }
 0xfa9   : > { %v5354_v44 = vpop.f32.mrf.mxu1  ;;  %v5376_v46 = vpop.f32.mrf.mxu0 }
 0xfaa   : > { %v5355_v53 = vadd.f32 %v5354_v44, %v5353_v27  ;;  %v5377_v32 = vadd.f32 %v5376_v46, %v5375_v45 }
 0xfab   : > { %v5356_v5 = vpop.f32.mrf.mxu1  ;;  %v5378_v6 = vpop.f32.mrf.mxu0 }
 0xfac   : > { %v4367_v31 = vadd.f32 %v5355_v53, %v4327_v19 }
 0xfad   : > { %v5357_v41 = vpop.f32.mrf.mxu1  ;;  %v5379_v51 = vpop.f32.mrf.mxu0 }
 0xfae   : > { %v4407_v35 = vadd.f32 %v5377_v32, %v4367_v31 }
 0xfc7   : > { %v5397_v18 = vpop.f32.mrf.mxu1 }
 0xfc8   : > { %v5419_v42 = vpop.f32.mrf.mxu0 }
 0xfc9   : > { %v5398_v28 = vpop.f32.mrf.mxu1 }
 0xfca   : > { %v5420_v52 = vpop.f32.mrf.mxu0  ;;  %v5399_v34 = vadd.f32 %v5398_v28, %v5397_v18 }
 0xfcb   : > { %v5400_v14 = vpop.f32.mrf.mxu1  ;;  %v5421_v36 = vadd.f32 %v5420_v52, %v5419_v42 }
 0xfcc   : > { %v5422_v29 = vpop.f32.mrf.mxu0  ;;  %v4447_v20 = vadd.f32 %v5399_v34, %v4407_v35 }
 0xfcd   : > { %v5401_v0 = vpop.f32.mrf.mxu1 }
 0xfce   : > { %v5423_v30 = vpop.f32.mrf.mxu0  ;;  %v4487_v39 = vadd.f32 %v5421_v36, %v4447_v20 }
 0xfe7   : > { %v5441_v21 = vpop.f32.mrf.mxu1 }
 0xfe8   : > { %v5463_v37 = vpop.f32.mrf.mxu0 }
 0xfe9   : > { %v5442_v38 = vpop.f32.mrf.mxu1 }
 0xfea   : > { %v5443_v40 = vadd.f32 %v5442_v38, %v5441_v21  ;;  %v5464_v43 = vpop.f32.mrf.mxu0 }
 0xfeb   : > { %v5444_v55 = vpop.f32.mrf.mxu1  ;;  %v5465_v57 = vadd.f32 %v5464_v43, %v5463_v37 }
 0xfec   : > { %v4527_v56 = vadd.f32 %v5443_v40, %v4487_v39  ;;  %v5466_v58 = vpop.f32.mrf.mxu0 }
 0xfed   : > { %v5445_v33 = vpop.f32.mrf.mxu1 }
 0xfee   : > { %v4567_v59 = vadd.f32 %v5465_v57, %v4527_v56  ;;  %v5467_v60 = vpop.f32.mrf.mxu0 }
 0xff0   : > { %v4572_v61 = vadd.f32 %v4567_v59, %v6677_v2 }
 0xff2   : > { %v4573_v62 = vsel %vm1235_vm2, %v4572_v61, 0.0 }
 0xff3   : > { %4574 = vadd.xlane.f32.xlu0 %v4573_v62 }
0x107c   : > { %v4575_v63 = vpop.xlane.xlu0 %4574 }
0x107d   : > { %v4576_v3 = vmul.f32 0.03125, %v4575_v63 }
0x107f   : > { %v4577_v7 = vsub.f32 %v4572_v61, %v4576_v3 }
0x1081   : > { %v4578_v54 = vmul.f32 %v4577_v7, %v4577_v7  ;;  %v4590_v17 = vmul.f32 %v5228_v16, %v4577_v7 }
0x1083   : > { %v4579_v8 = vsel %vm1235_vm2, %v4578_v54, 0.0 }
0x1084   : > { %4580 = vadd.xlane.f32.xlu1 %v4579_v8 }
0x110d   : > { %v4581_v48 = vpop.xlane.xlu1 %4580 }
0x110e   : > { %v4582_v1 = vmul.f32 0.032258064, %v4581_v48 }
0x1110   : > { %5887 = vrsqrt.f32 %v4582_v1  ;;  %vm4593_vm11 = vcmp.eq.f32.partialorder %v4582_v1, inf  ;;  %v4596_v11 = vand.u32 2147483648, %v4582_v1  ;;  %vm4595_vm12 = vcmp.eq.f32.partialorder %v4582_v1, 0.0 }
0x111d   : > { %v5888_v9 = vpop.eup %5887 }
0x111e   : > { %v4592_v10 = vmul.f32 %v5888_v9, %v4582_v1 }
0x1120   : > { %v4594_v2 = vsel %vm4593_vm11, %v4582_v1, %v4592_v10 }
0x1121   : > { %v4597_v4 = vsel %vm4595_vm12, %v4596_v11, %v4594_v2 }
0x1122   : > { %v4598_v15 = vadd.f32 1e-06, %v4597_v4 }
0x1124   : > { %5889 = vrcp.f32 %v4598_v15 }
0x1130   : > { %4612 = sbr.rel (%p5230_p1) target bundleno = 4407 (0x1137), region = 136 }
0x1131   : > { %v5890_v22 = vpop.eup %5889 }
0x1132   : > { %v4600_v23 = vmul.f32 %v5890_v22, %v4590_v17 }
0x1134   : > { %v4608_v47 = vadd.f32 %v5229_v12, %v4600_v23 }
0x1136   : > { %4613 = vst.msk [vmem:[%s6394_s19] sm:$0xff] %vm1235_vm2, %v4608_v47 }
0x1137 PF: > { %p5231_p2 = scmp.ne.s32.totalorder %s6003_s28, 1 }
0x1138   : > { %s7160_s3 = sld [smem:[#allocation50_spill]] (!%p5231_p2) }
0x1139   : > { %4617 = sbr.rel (%p5231_p2) target bundleno = 4739 (0x1283), region = 140  ;;  %s7161_s2 = sld [smem:[#allocation51_spill]] (!%p5231_p2) }
0x113e   : > { %v4618_v24 = vsel %vm1235_vm2, %v4608_v47, 0.0  ;;  %v5232_v51 = vld [vmem:[%s7160_s3] ss:$0 sm:$0xff] }
0x113f   : > { %4619 = vadd.xlane.f32.xlu0 %v4618_v24  ;;  %v5233_v28 = vld [vmem:[%s7161_s2] ss:$0 sm:$0xff] }
0x11c8   : > { %v4620_v49 = vpop.xlane.xlu0 %4619 }
0x11c9   : > { %v4621_v13 = vmul.f32 0.03125, %v4620_v49 }
0x11cb   : > { %v4622_v25 = vsub.f32 %v4608_v47, %v4621_v13 }
0x11cd   : > { %v4623_v26 = vmul.f32 %v4622_v25, %v4622_v25  ;;  %v4635_v18 = vmul.f32 %v5232_v51, %v4622_v25 }
0x11cf   : > { %v4624_v50 = vsel %vm1235_vm2, %v4623_v26, 0.0 }
0x11d0   : > { %4625 = vadd.xlane.f32.xlu0 %v4624_v50 }
0x1259   : > { %v4626_v19 = vpop.xlane.xlu0 %4625 }
0x125a   : > { %v4627_v27 = vmul.f32 0.032258064, %v4626_v19 }
0x125c   : > { %5891 = vrsqrt.f32 %v4627_v27  ;;  %vm4638_vm13 = vcmp.eq.f32.partialorder %v4627_v27, inf  ;;  %v4641_v46 = vand.u32 2147483648, %v4627_v27  ;;  %vm4640_vm14 = vcmp.eq.f32.partialorder %v4627_v27, 0.0 }
0x1269   : > { %v5892_v45 = vpop.eup %5891 }
0x126a   : > { %v4637_v44 = vmul.f32 %v5892_v45, %v4627_v27 }
0x126c   : > { %v4639_v5 = vsel %vm4638_vm13, %v4627_v27, %v4637_v44 }
0x126d   : > { %v4642_v6 = vsel %vm4640_vm14, %v4641_v46, %v4639_v5 }
0x126e   : > { %v4643_v41 = vadd.f32 1e-06, %v4642_v6 }
0x1270   : > { %5893 = vrcp.f32 %v4643_v41 }
0x127d   : > { %v5894_v42 = vpop.eup %5893 }
0x127e   : > { %v4645_v52 = vmul.f32 %v5894_v42, %v4635_v18 }
0x1280   : > { %v4653_v14 = vadd.f32 %v5233_v28, %v4645_v52 }
0x1282   : > { %4654 = vst.msk [vmem:[%s6394_s19] sm:$0xff] %vm1235_vm2, %v4653_v14 }
0x1283 PF: > { %s7162_s27 = sld [smem:[#allocation11_spill]]  ;;  %s4669_s16 = sshll.u32 %s6394_s19, 4  ;;  %s4670_s16 = int_to_ptr.vmem [resolvable:$true] %s4669_s16 }
0x1284   : > { %s7164_s14 = sld [smem:[#allocation52_spill]]  ;;  %s4656_s17 = scalar_lea.sflag [#allocation4], %s6268_s24 }
0x1285   : > { %s5923_s20 = scalar_lea.vmem %s4670_s16, 128  ;;  %s6033_s0 = smov [#allocation5]  }
0x1286   : > { %p5924_p4 = scmp.ne.s32.totalorder %s4670_s16, %s5923_s20  ;;  %s5927_s25 = sshll.u32 %s6033_s0, 4  ;;  %s5928_s25 = int_to_ptr.vmem [resolvable:$false] %s5927_s25 }
0x1287   : > { %s5929_s5 = scalar_lea.vmem %s5928_s25, 256  ;;  %p5930_p7 = scmp.lt.s32.totalorder %s4670_s16, %s5928_s25 }
0x1288   : > { %p5925_p5 = pnand %p5924_p4, %p6232_p10  ;;  %p5931_p8 = scmp.lt.s32.totalorder %s5929_s5, %s5923_s20 }
0x1289   : > { %s5235_s22 = sshll.u32 %s7162_s27, 7 }
0x128a   : > { %s4667_s15 = scalar_lea.hbm %s7164_s14, %s5235_s22  ;;  %p5926_p6 = pneg %p5925_p5 }
0x128b   : > { %p5932_p12 = por %p5931_p8, %p5930_p7 }
0x128d   : > { %p5933_p3 = pnand %p5932_p12, %p5926_p6 }
0x128f   : > { %5936 = shalt.err (!%p5933_p3)
}
0x1290   : > { %s5937_s4 = scalar_lea.hbm %s4667_s15, 128  ;;  %s5941_s26 = scalar_lea.hbm %s7164_s14, 256 }
0x1291   : > { %p5938_p13 = scmp.ne.s32.totalorder %s4667_s15, %s5937_s4  ;;  %p5942_p9 = scmp.lt.s32.totalorder %s4667_s15, %s7164_s14 }
0x1292   : > { %p5943_p1 = scmp.lt.s32.totalorder %s5941_s26, %s5937_s4 }
0x1293   : > { %p5939_p11 = pnand %p5938_p13, %p6232_p10 }
0x1294   : > { %p5944_p2 = por %p5943_p1, %p5942_p9 }
0x1295   : > { %p5940_p0 = pneg %p5939_p11 }
0x1297   : > { %p5945_p4 = pnand %p5944_p2, %p5940_p0 }
0x1299   : > { %5948 = shalt.err (!%p5945_p4)
}
0x129a   : > { %5607 = dma.vmem_to_hbm [thread:$0]  (%p6232_p10), %s4670_s16, 128, %s4667_s15, %s4656_s17  }
0x129b PF: > { %s7165_s30 = sld [smem:[#allocation14_spill]] }
0x129c   : > { %s7166_s12 = sld [smem:[#allocation8_spill]] }
0x129d   : > { %s7167_s8 = sld [smem:[#allocation18_spill]] }
0x12a1   : > { %p5618_p5 = scmp.ge.s32.totalorder %s7165_s30, 2 }
0x12a2   : > { %s4681_s6 = sand.u32 1, %s7166_s12  }
0x12a3   : > { %p7168_p6 = scmp.ne.s32.totalorder %s7167_s8, 0  ;;  %s4682_s28 = scalar_lea.sflag [#allocation4], %s4681_s6 }
0x12a5   : > { %p5614_p7 = pnand %p5618_p5, %p7168_p6 }
0x12a7   : > { %p5615_p8 = pneg %p5614_p7 }
0x12a9   : > { %5986 = dma.done.wait (%p5615_p8), %s4682_s28, 128  }
0x12aa   : > { %5988 = vsyncadd (%p5615_p8), %s4682_s28, 4294967168  ;;  %s42_s0 = sadd.s32 1, %s7165_s30   ;;  %s7169_s27 = sld [smem:[#allocation9_spill]] }
0x12ab   : > { %p39_p12 = scmp.ge.s32.totalorder %s42_s0, 6   ;;  %s7170_s3 = sld [smem:[#allocation10_spill]] }
0x12ac   : > { %s7171_s7 = sld [smem:[#allocation19_spill]] }
0x12ad   : > { %s7172_s28 = sld [smem:[#allocation12_spill]]  ;;  %41 = sbr.rel (!%p39_p12) target bundleno = 33 (0x21), region = 250 }
0x12ae   : > { %s7173_s8 = sld [smem:[#allocation13_spill]] }
0x12af   : > { %s7174_s4 = sld [smem:[#allocation15_spill]] }
0x12b0   : > { %s7175_s29 = sld [smem:[#allocation16_spill]] }
0x12b2   :  { %4687 = vsyncpa [#allocation3], 1 }
0x12b3   :  { %4689 = vsyncpa [#allocation3 + $0x1], 1 }
0x12b4   :  { %4690 = vsyncpa [#allocation4], 1 }
0x12b5   :  { %4692 = vsyncpa [#allocation4 + $0x1], 1 }

</bundles_post_ra>
